<compile_context>
chip_gen: v5e
topology: v5e:2x2
jax: 0.10.0
libtpu: 0.0.40
codegen_flags: <defaults>
</compile_context>

<pallas_src>
import functools
import math

import jax
import jax.numpy as jnp
from jax.experimental import pallas as pl
from jax.experimental.pallas import tpu as pltpu


def _layernorm(v, g, b, eps=1e-6):
    mu = jnp.mean(v, axis=-1, keepdims=True)
    d = v - mu
    var = jnp.mean(d * d, axis=-1, keepdims=True)
    return d * jax.lax.rsqrt(var + eps) * g + b


def _gelu(v):
    # TODO(synk): torch's exact erf-based GELU is approximated with the tanh
    # formulation (Mosaic has no guaranteed erf lowering); max abs error ~1e-3.
    c = 0.7978845608028654  # sqrt(2/pi)
    return 0.5 * v * (1.0 + jnp.tanh(c * (v + 0.044715 * v * v * v)))


def _vit_kernel(dims, patches_ref, pos_ref, wp_ref, bp_ref,
                ln1g_ref, ln1b_ref, wq_ref, bq_ref, wk_ref, bk_ref,
                wv_ref, bv_ref, wo_ref, bo_ref, ln2g_ref, ln2b_ref,
                w1_ref, b1_ref, w2_ref, b2_ref, lnfg_ref, lnfb_ref,
                out_ref):
    B, N, H, NH, L = dims
    dh = H // NH
    scale = 1.0 / math.sqrt(dh)

    # ---- Embeddings: im2col patches @ W_patch + bias + position embeddings ----
    x = jnp.dot(patches_ref[...], wp_ref[...],
                preferred_element_type=jnp.float32)
    x = x + bp_ref[...] + pos_ref[...]
    # TODO(synk): Dropout layers are inference-mode identities (no RNG masks).

    # ---- Encoder: L Blocks, statically unrolled over stacked weights ----
    for l in range(L):
        # --- attention sub-block ---
        res = x
        y = _layernorm(x, ln1g_ref[l], ln1b_ref[l])
        q = jnp.dot(y, wq_ref[l], preferred_element_type=jnp.float32) + bq_ref[l]
        k = jnp.dot(y, wk_ref[l], preferred_element_type=jnp.float32) + bk_ref[l]
        v = jnp.dot(y, wv_ref[l], preferred_element_type=jnp.float32) + bv_ref[l]

        per_batch = []
        for b in range(B):
            r = slice(b * N, (b + 1) * N)
            qb, kb, vb = q[r], k[r], v[r]
            acc = jnp.zeros((N, H), jnp.float32)
            for hh in range(NH):
                c = slice(hh * dh, (hh + 1) * dh)
                qh, kh, vh = qb[:, c], kb[:, c], vb[:, c]
                s = jnp.einsum('qd,kd->qk', qh, kh,
                               preferred_element_type=jnp.float32) * scale
                s = s - jnp.max(s, axis=-1, keepdims=True)
                e = jnp.exp(s)
                p = e / jnp.sum(e, axis=-1, keepdims=True)
                ctx = jnp.dot(p, vh, preferred_element_type=jnp.float32)
                # fold the per-head context straight through the matching rows
                # of the output projection (avoids a lane-axis concatenate)
                acc = acc + jnp.dot(ctx, wo_ref[l, hh * dh:(hh + 1) * dh, :],
                                    preferred_element_type=jnp.float32)
            per_batch.append(acc)
        attn_out = jnp.concatenate(per_batch, axis=0) + bo_ref[l]
        x = attn_out + res

        # --- MLP sub-block ---
        res = x
        y = _layernorm(x, ln2g_ref[l], ln2b_ref[l])
        y = jnp.dot(y, w1_ref[l], preferred_element_type=jnp.float32) + b1_ref[l]
        y = _gelu(y)
        y = jnp.dot(y, w2_ref[l], preferred_element_type=jnp.float32) + b2_ref[l]
        x = y + res

    # ---- final encoder LayerNorm ----
    out_ref[...] = _layernorm(x, lnfg_ref[...], lnfb_ref[...])


def transformer_forward(x, params):
    """Matches Transformer.forward: returns (encoded, attn_weights, features)."""
    B, C, Hi, Wi = x.shape
    ph, pw = params['patch_size']
    Gh, Gw = Hi // ph, Wi // pw
    N = Gh * Gw
    P = C * ph * pw
    Hd = params['w_patch'].shape[1]
    L = params['wq'].shape[0]
    NH = params['num_heads']

    # layout plumbing only: non-overlapping patch extraction (Conv2d stride==kernel)
    patches = x.reshape(B, C, Gh, ph, Gw, pw).transpose(0, 2, 4, 1, 3, 5)
    patches = patches.reshape(B * N, P).astype(jnp.float32)
    pos_tiled = jnp.tile(params['pos_emb'], (B, 1))            # (B*N, H)

    def fullspec(a):
        nd = a.ndim
        return pl.BlockSpec(a.shape, lambda i, _nd=nd: (0,) * _nd)

    operands = (patches, pos_tiled, params['w_patch'], params['b_patch'],
                params['ln1_g'], params['ln1_b'],
                params['wq'], params['bq'], params['wk'], params['bk'],
                params['wv'], params['bv'], params['wo'], params['bo'],
                params['ln2_g'], params['ln2_b'],
                params['w1'], params['b1'], params['w2'], params['b2'],
                params['lnf_g'], params['lnf_b'])

    out = pl.pallas_call(
        functools.partial(_vit_kernel, (B, N, Hd, NH, L)),
        grid=(1,),
        in_specs=[fullspec(a) for a in operands],
        out_specs=pl.BlockSpec((B * N, Hd), lambda i: (0, 0)),
        out_shape=jax.ShapeDtypeStruct((B * N, Hd), jnp.float32),
        compiler_params=pltpu.CompilerParams(
            dimension_semantics=("arbitrary",)),
    )(*operands)

    encoded = out.reshape(B, N, Hd)
    attn_weights = []   # vis=False: Attention returns None weights, Encoder collects nothing
    features = None     # non-hybrid Embeddings (config.patches['size'] path)
    return encoded, attn_weights, features


if __name__ == "__main__":
    # small shapes: B=2, 3x16x16 images, 4x4 patches -> 16 tokens, hidden=128 (lane-dense),
    # 4 heads, mlp_dim=256, 2 encoder layers.
    B, C, IMG, PATCH = 2, 3, 16, 4
    HIDDEN, NUM_HEADS, MLP_DIM, LAYERS = 128, 4, 256, 2
    N = (IMG // PATCH) * (IMG // PATCH)
    P = C * PATCH * PATCH

    key = jax.random.PRNGKey(0)
    ks = jax.random.split(key, 24)
    x = jax.random.normal(ks[0], (B, C, IMG, IMG), jnp.float32)

    # Conv2d(C, HIDDEN, kernel=PATCH, stride=PATCH) weight, folded to an im2col matmul.
    conv_w = 0.05 * jax.random.normal(ks[1], (HIDDEN, C, PATCH, PATCH), jnp.float32)

    def nrm(k, shape, s=0.05):
        return s * jax.random.normal(k, shape, jnp.float32)

    # NOTE: linear weights are stored pre-transposed (in_features, out_features),
    # i.e. torch `Linear.weight.T`, so the kernel applies them as y @ W.
    params = dict(
        patch_size=(PATCH, PATCH),
        num_heads=NUM_HEADS,
        w_patch=conv_w.reshape(HIDDEN, P).T,                               # (P, H)
        b_patch=nrm(ks[2], (1, HIDDEN), 0.01),
        pos_emb=nrm(ks[3], (N, HIDDEN), 0.02),
        ln1_g=jnp.ones((LAYERS, 1, HIDDEN), jnp.float32)
              + nrm(ks[4], (LAYERS, 1, HIDDEN)),
        ln1_b=nrm(ks[5], (LAYERS, 1, HIDDEN), 0.02),
        wq=nrm(ks[6], (LAYERS, HIDDEN, HIDDEN)),
        bq=nrm(ks[7], (LAYERS, 1, HIDDEN), 0.01),
        wk=nrm(ks[8], (LAYERS, HIDDEN, HIDDEN)),
        bk=nrm(ks[9], (LAYERS, 1, HIDDEN), 0.01),
        wv=nrm(ks[10], (LAYERS, HIDDEN, HIDDEN)),
        bv=nrm(ks[11], (LAYERS, 1, HIDDEN), 0.01),
        wo=nrm(ks[12], (LAYERS, HIDDEN, HIDDEN)),
        bo=nrm(ks[13], (LAYERS, 1, HIDDEN), 0.01),
        ln2_g=jnp.ones((LAYERS, 1, HIDDEN), jnp.float32)
              + nrm(ks[14], (LAYERS, 1, HIDDEN)),
        ln2_b=nrm(ks[15], (LAYERS, 1, HIDDEN), 0.02),
        w1=nrm(ks[16], (LAYERS, HIDDEN, MLP_DIM)),
        b1=nrm(ks[17], (LAYERS, 1, MLP_DIM), 0.01),
        w2=nrm(ks[18], (LAYERS, MLP_DIM, HIDDEN)),
        b2=nrm(ks[19], (LAYERS, 1, HIDDEN), 0.01),
        lnf_g=jnp.ones((1, HIDDEN), jnp.float32) + nrm(ks[20], (1, HIDDEN)),
        lnf_b=nrm(ks[21], (1, HIDDEN), 0.02),
    )

    encoded, attn_w, feats = transformer_forward(x, params)
    encoded = jax.block_until_ready(encoded)
    assert encoded.shape == (B, N, HIDDEN), encoded.shape
    assert bool(jnp.all(jnp.isfinite(encoded)))
    assert attn_w == [] and feats is None
    print("KERNEL_OK")
</pallas_src>

<mosaic_0001>
module attributes {stable_mosaic.version = 11 : i64} {
  func.func @_vit_kernel(%arg0: i32, %arg1: memref<32x48xf32, #tpu.memory_space<vmem>>, %arg2: memref<32x128xf32, #tpu.memory_space<vmem>>, %arg3: memref<48x128xf32, #tpu.memory_space<vmem>>, %arg4: memref<1x128xf32, #tpu.memory_space<vmem>>, %arg5: memref<2x1x128xf32, #tpu.memory_space<vmem>>, %arg6: memref<2x1x128xf32, #tpu.memory_space<vmem>>, %arg7: memref<2x128x128xf32, #tpu.memory_space<vmem>>, %arg8: memref<2x1x128xf32, #tpu.memory_space<vmem>>, %arg9: memref<2x128x128xf32, #tpu.memory_space<vmem>>, %arg10: memref<2x1x128xf32, #tpu.memory_space<vmem>>, %arg11: memref<2x128x128xf32, #tpu.memory_space<vmem>>, %arg12: memref<2x1x128xf32, #tpu.memory_space<vmem>>, %arg13: memref<2x128x128xf32, #tpu.memory_space<vmem>>, %arg14: memref<2x1x128xf32, #tpu.memory_space<vmem>>, %arg15: memref<2x1x128xf32, #tpu.memory_space<vmem>>, %arg16: memref<2x1x128xf32, #tpu.memory_space<vmem>>, %arg17: memref<2x128x256xf32, #tpu.memory_space<vmem>>, %arg18: memref<2x1x256xf32, #tpu.memory_space<vmem>>, %arg19: memref<2x256x128xf32, #tpu.memory_space<vmem>>, %arg20: memref<2x1x128xf32, #tpu.memory_space<vmem>>, %arg21: memref<1x128xf32, #tpu.memory_space<vmem>>, %arg22: memref<1x128xf32, #tpu.memory_space<vmem>>, %arg23: memref<32x128xf32, #tpu.memory_space<vmem>>) attributes {dimension_semantics = [#tpu.dimension_semantics<arbitrary>], iteration_bounds = array<i64: 1>, scalar_prefetch = 0 : i64, scratch_operands = 0 : i64, tpu.core_type = #tpu.core_type<tc>, window_params = [{pipeline_mode = #tpu.pipeline_mode<synchronous>, transform_indices = @transform_0, window_bounds = array<i64: 32, 48>}, {pipeline_mode = #tpu.pipeline_mode<synchronous>, transform_indices = @transform_1, window_bounds = array<i64: 32, 128>}, {pipeline_mode = #tpu.pipeline_mode<synchronous>, transform_indices = @transform_2, window_bounds = array<i64: 48, 128>}, {pipeline_mode = #tpu.pipeline_mode<synchronous>, transform_indices = @transform_3, window_bounds = array<i64: 1, 128>}, {pipeline_mode = #tpu.pipeline_mode<synchronous>, transform_indices = @transform_4, window_bounds = array<i64: 2, 1, 128>}, {pipeline_mode = #tpu.pipeline_mode<synchronous>, transform_indices = @transform_5, window_bounds = array<i64: 2, 1, 128>}, {pipeline_mode = #tpu.pipeline_mode<synchronous>, transform_indices = @transform_6, window_bounds = array<i64: 2, 128, 128>}, {pipeline_mode = #tpu.pipeline_mode<synchronous>, transform_indices = @transform_7, window_bounds = array<i64: 2, 1, 128>}, {pipeline_mode = #tpu.pipeline_mode<synchronous>, transform_indices = @transform_8, window_bounds = array<i64: 2, 128, 128>}, {pipeline_mode = #tpu.pipeline_mode<synchronous>, transform_indices = @transform_9, window_bounds = array<i64: 2, 1, 128>}, {pipeline_mode = #tpu.pipeline_mode<synchronous>, transform_indices = @transform_10, window_bounds = array<i64: 2, 128, 128>}, {pipeline_mode = #tpu.pipeline_mode<synchronous>, transform_indices = @transform_11, window_bounds = array<i64: 2, 1, 128>}, {pipeline_mode = #tpu.pipeline_mode<synchronous>, transform_indices = @transform_12, window_bounds = array<i64: 2, 128, 128>}, {pipeline_mode = #tpu.pipeline_mode<synchronous>, transform_indices = @transform_13, window_bounds = array<i64: 2, 1, 128>}, {pipeline_mode = #tpu.pipeline_mode<synchronous>, transform_indices = @transform_14, window_bounds = array<i64: 2, 1, 128>}, {pipeline_mode = #tpu.pipeline_mode<synchronous>, transform_indices = @transform_15, window_bounds = array<i64: 2, 1, 128>}, {pipeline_mode = #tpu.pipeline_mode<synchronous>, transform_indices = @transform_16, window_bounds = array<i64: 2, 128, 256>}, {pipeline_mode = #tpu.pipeline_mode<synchronous>, transform_indices = @transform_17, window_bounds = array<i64: 2, 1, 256>}, {pipeline_mode = #tpu.pipeline_mode<synchronous>, transform_indices = @transform_18, window_bounds = array<i64: 2, 256, 128>}, {pipeline_mode = #tpu.pipeline_mode<synchronous>, transform_indices = @transform_19, window_bounds = array<i64: 2, 1, 128>}, {pipeline_mode = #tpu.pipeline_mode<synchronous>, transform_indices = @transform_20, window_bounds = array<i64: 1, 128>}, {pipeline_mode = #tpu.pipeline_mode<synchronous>, transform_indices = @transform_21, window_bounds = array<i64: 1, 128>}, {pipeline_mode = #tpu.pipeline_mode<synchronous>, transform_indices = @transform_22, window_bounds = array<i64: 32, 128>}]} {
    %c0 = arith.constant 0 : index
    %c0_0 = arith.constant 0 : index
    %0 = vector.load %arg1[%c0, %c0_0] : memref<32x48xf32, #tpu.memory_space<vmem>>, vector<32x48xf32>
    %c0_1 = arith.constant 0 : index
    %c0_2 = arith.constant 0 : index
    %1 = vector.load %arg3[%c0_1, %c0_2] : memref<48x128xf32, #tpu.memory_space<vmem>>, vector<48x128xf32>
    %cst = arith.constant dense<0.000000e+00> : vector<32x128xf32>
    %2 = tpu.matmul %0, %1, %cst {dimension_numbers = #tpu.dot_dimension_numbers<[1], [0], [0], [1], [0, 0, 1, 1], [], []>} : vector<32x48xf32>, vector<48x128xf32>, vector<32x128xf32> -> vector<32x128xf32>
    %c0_3 = arith.constant 0 : index
    %c0_4 = arith.constant 0 : index
    %3 = vector.load %arg4[%c0_3, %c0_4] : memref<1x128xf32, #tpu.memory_space<vmem>>, vector<1x128xf32>
    %4 = vector.broadcast %3 : vector<1x128xf32> to vector<32x128xf32>
    %5 = arith.addf %2, %4 : vector<32x128xf32>
    %c0_5 = arith.constant 0 : index
    %c0_6 = arith.constant 0 : index
    %6 = vector.load %arg2[%c0_5, %c0_6] : memref<32x128xf32, #tpu.memory_space<vmem>>, vector<32x128xf32>
    %7 = arith.addf %5, %6 : vector<32x128xf32>
    %c0_7 = arith.constant 0 : index
    %c0_8 = arith.constant 0 : index
    %c0_9 = arith.constant 0 : index
    %8 = vector.load %arg5[%c0_7, %c0_8, %c0_9] : memref<2x1x128xf32, #tpu.memory_space<vmem>>, vector<1x1x128xf32>
    %9 = vector.shape_cast %8 : vector<1x1x128xf32> to vector<1x128xf32>
    %c0_10 = arith.constant 0 : index
    %c0_11 = arith.constant 0 : index
    %c0_12 = arith.constant 0 : index
    %10 = vector.load %arg6[%c0_10, %c0_11, %c0_12] : memref<2x1x128xf32, #tpu.memory_space<vmem>>, vector<1x1x128xf32>
    %11 = vector.shape_cast %10 : vector<1x1x128xf32> to vector<1x128xf32>
    %cst_13 = arith.constant dense<0.000000e+00> : vector<32xf32>
    %12 = vector.multi_reduction <add>, %7, %cst_13 [1] : vector<32x128xf32> to vector<32xf32>
    %13 = vector.shape_cast %12 : vector<32xf32> to vector<32x1xf32>
    %cst_14 = arith.constant 1.280000e+02 : f32
    %14 = vector.broadcast %cst_14 : f32 to vector<32x1xf32>
    %15 = arith.divf %13, %14 : vector<32x1xf32>
    %16 = vector.broadcast %15 : vector<32x1xf32> to vector<32x128xf32>
    %17 = arith.subf %7, %16 : vector<32x128xf32>
    %18 = arith.mulf %17, %17 : vector<32x128xf32>
    %cst_15 = arith.constant dense<0.000000e+00> : vector<32xf32>
    %19 = vector.multi_reduction <add>, %18, %cst_15 [1] : vector<32x128xf32> to vector<32xf32>
    %20 = vector.shape_cast %19 : vector<32xf32> to vector<32x1xf32>
    %cst_16 = arith.constant 1.280000e+02 : f32
    %21 = vector.broadcast %cst_16 : f32 to vector<32x1xf32>
    %22 = arith.divf %20, %21 : vector<32x1xf32>
    %cst_17 = arith.constant 9.99999997E-7 : f32
    %23 = vector.broadcast %cst_17 : f32 to vector<32x1xf32>
    %24 = arith.addf %22, %23 : vector<32x1xf32>
    %25 = math.rsqrt %24 : vector<32x1xf32>
    %26 = vector.broadcast %25 : vector<32x1xf32> to vector<32x128xf32>
    %27 = arith.mulf %17, %26 : vector<32x128xf32>
    %28 = vector.broadcast %9 : vector<1x128xf32> to vector<32x128xf32>
    %29 = arith.mulf %27, %28 : vector<32x128xf32>
    %30 = vector.broadcast %11 : vector<1x128xf32> to vector<32x128xf32>
    %31 = arith.addf %29, %30 : vector<32x128xf32>
    %c0_18 = arith.constant 0 : index
    %c0_19 = arith.constant 0 : index
    %c0_20 = arith.constant 0 : index
    %32 = vector.load %arg7[%c0_18, %c0_19, %c0_20] : memref<2x128x128xf32, #tpu.memory_space<vmem>>, vector<1x128x128xf32>
    %33 = vector.shape_cast %32 : vector<1x128x128xf32> to vector<128x128xf32>
    %cst_21 = arith.constant dense<0.000000e+00> : vector<32x128xf32>
    %34 = tpu.matmul %31, %33, %cst_21 {dimension_numbers = #tpu.dot_dimension_numbers<[1], [0], [0], [1], [0, 0, 1, 1], [], []>} : vector<32x128xf32>, vector<128x128xf32>, vector<32x128xf32> -> vector<32x128xf32>
    %c0_22 = arith.constant 0 : index
    %c0_23 = arith.constant 0 : index
    %c0_24 = arith.constant 0 : index
    %35 = vector.load %arg8[%c0_22, %c0_23, %c0_24] : memref<2x1x128xf32, #tpu.memory_space<vmem>>, vector<1x1x128xf32>
    %36 = vector.shape_cast %35 : vector<1x1x128xf32> to vector<1x128xf32>
    %37 = vector.broadcast %36 : vector<1x128xf32> to vector<32x128xf32>
    %38 = arith.addf %34, %37 : vector<32x128xf32>
    %c0_25 = arith.constant 0 : index
    %c0_26 = arith.constant 0 : index
    %c0_27 = arith.constant 0 : index
    %39 = vector.load %arg9[%c0_25, %c0_26, %c0_27] : memref<2x128x128xf32, #tpu.memory_space<vmem>>, vector<1x128x128xf32>
    %40 = vector.shape_cast %39 : vector<1x128x128xf32> to vector<128x128xf32>
    %cst_28 = arith.constant dense<0.000000e+00> : vector<32x128xf32>
    %41 = tpu.matmul %31, %40, %cst_28 {dimension_numbers = #tpu.dot_dimension_numbers<[1], [0], [0], [1], [0, 0, 1, 1], [], []>} : vector<32x128xf32>, vector<128x128xf32>, vector<32x128xf32> -> vector<32x128xf32>
    %c0_29 = arith.constant 0 : index
    %c0_30 = arith.constant 0 : index
    %c0_31 = arith.constant 0 : index
    %42 = vector.load %arg10[%c0_29, %c0_30, %c0_31] : memref<2x1x128xf32, #tpu.memory_space<vmem>>, vector<1x1x128xf32>
    %43 = vector.shape_cast %42 : vector<1x1x128xf32> to vector<1x128xf32>
    %44 = vector.broadcast %43 : vector<1x128xf32> to vector<32x128xf32>
    %45 = arith.addf %41, %44 : vector<32x128xf32>
    %c0_32 = arith.constant 0 : index
    %c0_33 = arith.constant 0 : index
    %c0_34 = arith.constant 0 : index
    %46 = vector.load %arg11[%c0_32, %c0_33, %c0_34] : memref<2x128x128xf32, #tpu.memory_space<vmem>>, vector<1x128x128xf32>
    %47 = vector.shape_cast %46 : vector<1x128x128xf32> to vector<128x128xf32>
    %cst_35 = arith.constant dense<0.000000e+00> : vector<32x128xf32>
    %48 = tpu.matmul %31, %47, %cst_35 {dimension_numbers = #tpu.dot_dimension_numbers<[1], [0], [0], [1], [0, 0, 1, 1], [], []>} : vector<32x128xf32>, vector<128x128xf32>, vector<32x128xf32> -> vector<32x128xf32>
    %c0_36 = arith.constant 0 : index
    %c0_37 = arith.constant 0 : index
    %c0_38 = arith.constant 0 : index
    %49 = vector.load %arg12[%c0_36, %c0_37, %c0_38] : memref<2x1x128xf32, #tpu.memory_space<vmem>>, vector<1x1x128xf32>
    %50 = vector.shape_cast %49 : vector<1x1x128xf32> to vector<1x128xf32>
    %51 = vector.broadcast %50 : vector<1x128xf32> to vector<32x128xf32>
    %52 = arith.addf %48, %51 : vector<32x128xf32>
    %53 = vector.extract_strided_slice %38 {offsets = [0, 0], sizes = [16, 128], strides = [1, 1]} : vector<32x128xf32> to vector<16x128xf32>
    %54 = vector.extract_strided_slice %45 {offsets = [0, 0], sizes = [16, 128], strides = [1, 1]} : vector<32x128xf32> to vector<16x128xf32>
    %55 = vector.extract_strided_slice %52 {offsets = [0, 0], sizes = [16, 128], strides = [1, 1]} : vector<32x128xf32> to vector<16x128xf32>
    %cst_39 = arith.constant 0.000000e+00 : f32
    %56 = vector.broadcast %cst_39 : f32 to vector<16x128xf32>
    %57 = vector.extract_strided_slice %53 {offsets = [0, 0], sizes = [16, 32], strides = [1, 1]} : vector<16x128xf32> to vector<16x32xf32>
    %58 = vector.extract_strided_slice %54 {offsets = [0, 0], sizes = [16, 32], strides = [1, 1]} : vector<16x128xf32> to vector<16x32xf32>
    %59 = vector.extract_strided_slice %55 {offsets = [0, 0], sizes = [16, 32], strides = [1, 1]} : vector<16x128xf32> to vector<16x32xf32>
    "tpu.trace_start"() <{level = 10 : i32, message = "qd,kd->qk"}> : () -> ()
    %cst_40 = arith.constant dense<0.000000e+00> : vector<16x16xf32>
    %60 = tpu.matmul %57, %58, %cst_40 {dimension_numbers = #tpu.dot_dimension_numbers<[1], [1], [0], [0], [0, 0, 1, 0], [], []>} : vector<16x32xf32>, vector<16x32xf32>, vector<16x16xf32> -> vector<16x16xf32>
    "tpu.trace_stop"() : () -> ()
    %cst_41 = arith.constant 0.176776692 : f32
    %61 = vector.broadcast %cst_41 : f32 to vector<16x16xf32>
    %62 = arith.mulf %60, %61 : vector<16x16xf32>
    %cst_42 = arith.constant dense<0xFF800000> : vector<16xf32>
    %63 = vector.multi_reduction <maximumf>, %62, %cst_42 [1] : vector<16x16xf32> to vector<16xf32>
    %64 = vector.shape_cast %63 : vector<16xf32> to vector<16x1xf32>
    %65 = vector.broadcast %64 : vector<16x1xf32> to vector<16x16xf32>
    %66 = arith.subf %62, %65 : vector<16x16xf32>
    %67 = math.exp %66 : vector<16x16xf32>
    %cst_43 = arith.constant dense<0.000000e+00> : vector<16xf32>
    %68 = vector.multi_reduction <add>, %67, %cst_43 [1] : vector<16x16xf32> to vector<16xf32>
    %69 = vector.shape_cast %68 : vector<16xf32> to vector<16x1xf32>
    %70 = vector.broadcast %69 : vector<16x1xf32> to vector<16x16xf32>
    %71 = arith.divf %67, %70 : vector<16x16xf32>
    %cst_44 = arith.constant dense<0.000000e+00> : vector<16x32xf32>
    %72 = tpu.matmul %71, %59, %cst_44 {dimension_numbers = #tpu.dot_dimension_numbers<[1], [0], [0], [1], [0, 0, 1, 1], [], []>} : vector<16x16xf32>, vector<16x32xf32>, vector<16x32xf32> -> vector<16x32xf32>
    %c0_45 = arith.constant 0 : index
    %c0_46 = arith.constant 0 : index
    %c0_47 = arith.constant 0 : index
    %73 = vector.load %arg13[%c0_45, %c0_46, %c0_47] : memref<2x128x128xf32, #tpu.memory_space<vmem>>, vector<1x32x128xf32>
    %74 = vector.shape_cast %73 : vector<1x32x128xf32> to vector<32x128xf32>
    %cst_48 = arith.constant dense<0.000000e+00> : vector<16x128xf32>
    %75 = tpu.matmul %72, %74, %cst_48 {dimension_numbers = #tpu.dot_dimension_numbers<[1], [0], [0], [1], [0, 0, 1, 1], [], []>} : vector<16x32xf32>, vector<32x128xf32>, vector<16x128xf32> -> vector<16x128xf32>
    %76 = arith.addf %56, %75 : vector<16x128xf32>
    %77 = vector.extract_strided_slice %53 {offsets = [0, 32], sizes = [16, 32], strides = [1, 1]} : vector<16x128xf32> to vector<16x32xf32>
    %78 = vector.extract_strided_slice %54 {offsets = [0, 32], sizes = [16, 32], strides = [1, 1]} : vector<16x128xf32> to vector<16x32xf32>
    %79 = vector.extract_strided_slice %55 {offsets = [0, 32], sizes = [16, 32], strides = [1, 1]} : vector<16x128xf32> to vector<16x32xf32>
    "tpu.trace_start"() <{level = 10 : i32, message = "qd,kd->qk"}> : () -> ()
    %cst_49 = arith.constant dense<0.000000e+00> : vector<16x16xf32>
    %80 = tpu.matmul %77, %78, %cst_49 {dimension_numbers = #tpu.dot_dimension_numbers<[1], [1], [0], [0], [0, 0, 1, 0], [], []>} : vector<16x32xf32>, vector<16x32xf32>, vector<16x16xf32> -> vector<16x16xf32>
    "tpu.trace_stop"() : () -> ()
    %cst_50 = arith.constant 0.176776692 : f32
    %81 = vector.broadcast %cst_50 : f32 to vector<16x16xf32>
    %82 = arith.mulf %80, %81 : vector<16x16xf32>
    %cst_51 = arith.constant dense<0xFF800000> : vector<16xf32>
    %83 = vector.multi_reduction <maximumf>, %82, %cst_51 [1] : vector<16x16xf32> to vector<16xf32>
    %84 = vector.shape_cast %83 : vector<16xf32> to vector<16x1xf32>
    %85 = vector.broadcast %84 : vector<16x1xf32> to vector<16x16xf32>
    %86 = arith.subf %82, %85 : vector<16x16xf32>
    %87 = math.exp %86 : vector<16x16xf32>
    %cst_52 = arith.constant dense<0.000000e+00> : vector<16xf32>
    %88 = vector.multi_reduction <add>, %87, %cst_52 [1] : vector<16x16xf32> to vector<16xf32>
    %89 = vector.shape_cast %88 : vector<16xf32> to vector<16x1xf32>
    %90 = vector.broadcast %89 : vector<16x1xf32> to vector<16x16xf32>
    %91 = arith.divf %87, %90 : vector<16x16xf32>
    %cst_53 = arith.constant dense<0.000000e+00> : vector<16x32xf32>
    %92 = tpu.matmul %91, %79, %cst_53 {dimension_numbers = #tpu.dot_dimension_numbers<[1], [0], [0], [1], [0, 0, 1, 1], [], []>} : vector<16x16xf32>, vector<16x32xf32>, vector<16x32xf32> -> vector<16x32xf32>
    %c0_54 = arith.constant 0 : index
    %c32 = arith.constant 32 : index
    %c0_55 = arith.constant 0 : index
    %93 = vector.load %arg13[%c0_54, %c32, %c0_55] : memref<2x128x128xf32, #tpu.memory_space<vmem>>, vector<1x32x128xf32>
    %94 = vector.shape_cast %93 : vector<1x32x128xf32> to vector<32x128xf32>
    %cst_56 = arith.constant dense<0.000000e+00> : vector<16x128xf32>
    %95 = tpu.matmul %92, %94, %cst_56 {dimension_numbers = #tpu.dot_dimension_numbers<[1], [0], [0], [1], [0, 0, 1, 1], [], []>} : vector<16x32xf32>, vector<32x128xf32>, vector<16x128xf32> -> vector<16x128xf32>
    %96 = arith.addf %76, %95 : vector<16x128xf32>
    %97 = vector.extract_strided_slice %53 {offsets = [0, 64], sizes = [16, 32], strides = [1, 1]} : vector<16x128xf32> to vector<16x32xf32>
    %98 = vector.extract_strided_slice %54 {offsets = [0, 64], sizes = [16, 32], strides = [1, 1]} : vector<16x128xf32> to vector<16x32xf32>
    %99 = vector.extract_strided_slice %55 {offsets = [0, 64], sizes = [16, 32], strides = [1, 1]} : vector<16x128xf32> to vector<16x32xf32>
    "tpu.trace_start"() <{level = 10 : i32, message = "qd,kd->qk"}> : () -> ()
    %cst_57 = arith.constant dense<0.000000e+00> : vector<16x16xf32>
    %100 = tpu.matmul %97, %98, %cst_57 {dimension_numbers = #tpu.dot_dimension_numbers<[1], [1], [0], [0], [0, 0, 1, 0], [], []>} : vector<16x32xf32>, vector<16x32xf32>, vector<16x16xf32> -> vector<16x16xf32>
    "tpu.trace_stop"() : () -> ()
    %cst_58 = arith.constant 0.176776692 : f32
    %101 = vector.broadcast %cst_58 : f32 to vector<16x16xf32>
    %102 = arith.mulf %100, %101 : vector<16x16xf32>
    %cst_59 = arith.constant dense<0xFF800000> : vector<16xf32>
    %103 = vector.multi_reduction <maximumf>, %102, %cst_59 [1] : vector<16x16xf32> to vector<16xf32>
    %104 = vector.shape_cast %103 : vector<16xf32> to vector<16x1xf32>
    %105 = vector.broadcast %104 : vector<16x1xf32> to vector<16x16xf32>
    %106 = arith.subf %102, %105 : vector<16x16xf32>
    %107 = math.exp %106 : vector<16x16xf32>
    %cst_60 = arith.constant dense<0.000000e+00> : vector<16xf32>
    %108 = vector.multi_reduction <add>, %107, %cst_60 [1] : vector<16x16xf32> to vector<16xf32>
    %109 = vector.shape_cast %108 : vector<16xf32> to vector<16x1xf32>
    %110 = vector.broadcast %109 : vector<16x1xf32> to vector<16x16xf32>
    %111 = arith.divf %107, %110 : vector<16x16xf32>
    %cst_61 = arith.constant dense<0.000000e+00> : vector<16x32xf32>
    %112 = tpu.matmul %111, %99, %cst_61 {dimension_numbers = #tpu.dot_dimension_numbers<[1], [0], [0], [1], [0, 0, 1, 1], [], []>} : vector<16x16xf32>, vector<16x32xf32>, vector<16x32xf32> -> vector<16x32xf32>
    %c0_62 = arith.constant 0 : index
    %c64 = arith.constant 64 : index
    %c0_63 = arith.constant 0 : index
    %113 = vector.load %arg13[%c0_62, %c64, %c0_63] : memref<2x128x128xf32, #tpu.memory_space<vmem>>, vector<1x32x128xf32>
    %114 = vector.shape_cast %113 : vector<1x32x128xf32> to vector<32x128xf32>
    %cst_64 = arith.constant dense<0.000000e+00> : vector<16x128xf32>
    %115 = tpu.matmul %112, %114, %cst_64 {dimension_numbers = #tpu.dot_dimension_numbers<[1], [0], [0], [1], [0, 0, 1, 1], [], []>} : vector<16x32xf32>, vector<32x128xf32>, vector<16x128xf32> -> vector<16x128xf32>
    %116 = arith.addf %96, %115 : vector<16x128xf32>
    %117 = vector.extract_strided_slice %53 {offsets = [0, 96], sizes = [16, 32], strides = [1, 1]} : vector<16x128xf32> to vector<16x32xf32>
    %118 = vector.extract_strided_slice %54 {offsets = [0, 96], sizes = [16, 32], strides = [1, 1]} : vector<16x128xf32> to vector<16x32xf32>
    %119 = vector.extract_strided_slice %55 {offsets = [0, 96], sizes = [16, 32], strides = [1, 1]} : vector<16x128xf32> to vector<16x32xf32>
    "tpu.trace_start"() <{level = 10 : i32, message = "qd,kd->qk"}> : () -> ()
    %cst_65 = arith.constant dense<0.000000e+00> : vector<16x16xf32>
    %120 = tpu.matmul %117, %118, %cst_65 {dimension_numbers = #tpu.dot_dimension_numbers<[1], [1], [0], [0], [0, 0, 1, 0], [], []>} : vector<16x32xf32>, vector<16x32xf32>, vector<16x16xf32> -> vector<16x16xf32>
    "tpu.trace_stop"() : () -> ()
    %cst_66 = arith.constant 0.176776692 : f32
    %121 = vector.broadcast %cst_66 : f32 to vector<16x16xf32>
    %122 = arith.mulf %120, %121 : vector<16x16xf32>
    %cst_67 = arith.constant dense<0xFF800000> : vector<16xf32>
    %123 = vector.multi_reduction <maximumf>, %122, %cst_67 [1] : vector<16x16xf32> to vector<16xf32>
    %124 = vector.shape_cast %123 : vector<16xf32> to vector<16x1xf32>
    %125 = vector.broadcast %124 : vector<16x1xf32> to vector<16x16xf32>
    %126 = arith.subf %122, %125 : vector<16x16xf32>
    %127 = math.exp %126 : vector<16x16xf32>
    %cst_68 = arith.constant dense<0.000000e+00> : vector<16xf32>
    %128 = vector.multi_reduction <add>, %127, %cst_68 [1] : vector<16x16xf32> to vector<16xf32>
    %129 = vector.shape_cast %128 : vector<16xf32> to vector<16x1xf32>
    %130 = vector.broadcast %129 : vector<16x1xf32> to vector<16x16xf32>
    %131 = arith.divf %127, %130 : vector<16x16xf32>
    %cst_69 = arith.constant dense<0.000000e+00> : vector<16x32xf32>
    %132 = tpu.matmul %131, %119, %cst_69 {dimension_numbers = #tpu.dot_dimension_numbers<[1], [0], [0], [1], [0, 0, 1, 1], [], []>} : vector<16x16xf32>, vector<16x32xf32>, vector<16x32xf32> -> vector<16x32xf32>
    %c0_70 = arith.constant 0 : index
    %c96 = arith.constant 96 : index
    %c0_71 = arith.constant 0 : index
    %133 = vector.load %arg13[%c0_70, %c96, %c0_71] : memref<2x128x128xf32, #tpu.memory_space<vmem>>, vector<1x32x128xf32>
    %134 = vector.shape_cast %133 : vector<1x32x128xf32> to vector<32x128xf32>
    %cst_72 = arith.constant dense<0.000000e+00> : vector<16x128xf32>
    %135 = tpu.matmul %132, %134, %cst_72 {dimension_numbers = #tpu.dot_dimension_numbers<[1], [0], [0], [1], [0, 0, 1, 1], [], []>} : vector<16x32xf32>, vector<32x128xf32>, vector<16x128xf32> -> vector<16x128xf32>
    %136 = arith.addf %116, %135 : vector<16x128xf32>
    %137 = vector.extract_strided_slice %38 {offsets = [16, 0], sizes = [16, 128], strides = [1, 1]} : vector<32x128xf32> to vector<16x128xf32>
    %138 = vector.extract_strided_slice %45 {offsets = [16, 0], sizes = [16, 128], strides = [1, 1]} : vector<32x128xf32> to vector<16x128xf32>
    %139 = vector.extract_strided_slice %52 {offsets = [16, 0], sizes = [16, 128], strides = [1, 1]} : vector<32x128xf32> to vector<16x128xf32>
    %cst_73 = arith.constant 0.000000e+00 : f32
    %140 = vector.broadcast %cst_73 : f32 to vector<16x128xf32>
    %141 = vector.extract_strided_slice %137 {offsets = [0, 0], sizes = [16, 32], strides = [1, 1]} : vector<16x128xf32> to vector<16x32xf32>
    %142 = vector.extract_strided_slice %138 {offsets = [0, 0], sizes = [16, 32], strides = [1, 1]} : vector<16x128xf32> to vector<16x32xf32>
    %143 = vector.extract_strided_slice %139 {offsets = [0, 0], sizes = [16, 32], strides = [1, 1]} : vector<16x128xf32> to vector<16x32xf32>
    "tpu.trace_start"() <{level = 10 : i32, message = "qd,kd->qk"}> : () -> ()
    %cst_74 = arith.constant dense<0.000000e+00> : vector<16x16xf32>
    %144 = tpu.matmul %141, %142, %cst_74 {dimension_numbers = #tpu.dot_dimension_numbers<[1], [1], [0], [0], [0, 0, 1, 0], [], []>} : vector<16x32xf32>, vector<16x32xf32>, vector<16x16xf32> -> vector<16x16xf32>
    "tpu.trace_stop"() : () -> ()
    %cst_75 = arith.constant 0.176776692 : f32
    %145 = vector.broadcast %cst_75 : f32 to vector<16x16xf32>
    %146 = arith.mulf %144, %145 : vector<16x16xf32>
    %cst_76 = arith.constant dense<0xFF800000> : vector<16xf32>
    %147 = vector.multi_reduction <maximumf>, %146, %cst_76 [1] : vector<16x16xf32> to vector<16xf32>
    %148 = vector.shape_cast %147 : vector<16xf32> to vector<16x1xf32>
    %149 = vector.broadcast %148 : vector<16x1xf32> to vector<16x16xf32>
    %150 = arith.subf %146, %149 : vector<16x16xf32>
    %151 = math.exp %150 : vector<16x16xf32>
    %cst_77 = arith.constant dense<0.000000e+00> : vector<16xf32>
    %152 = vector.multi_reduction <add>, %151, %cst_77 [1] : vector<16x16xf32> to vector<16xf32>
    %153 = vector.shape_cast %152 : vector<16xf32> to vector<16x1xf32>
    %154 = vector.broadcast %153 : vector<16x1xf32> to vector<16x16xf32>
    %155 = arith.divf %151, %154 : vector<16x16xf32>
    %cst_78 = arith.constant dense<0.000000e+00> : vector<16x32xf32>
    %156 = tpu.matmul %155, %143, %cst_78 {dimension_numbers = #tpu.dot_dimension_numbers<[1], [0], [0], [1], [0, 0, 1, 1], [], []>} : vector<16x16xf32>, vector<16x32xf32>, vector<16x32xf32> -> vector<16x32xf32>
    %c0_79 = arith.constant 0 : index
    %c0_80 = arith.constant 0 : index
    %c0_81 = arith.constant 0 : index
    %157 = vector.load %arg13[%c0_79, %c0_80, %c0_81] : memref<2x128x128xf32, #tpu.memory_space<vmem>>, vector<1x32x128xf32>
    %158 = vector.shape_cast %157 : vector<1x32x128xf32> to vector<32x128xf32>
    %cst_82 = arith.constant dense<0.000000e+00> : vector<16x128xf32>
    %159 = tpu.matmul %156, %158, %cst_82 {dimension_numbers = #tpu.dot_dimension_numbers<[1], [0], [0], [1], [0, 0, 1, 1], [], []>} : vector<16x32xf32>, vector<32x128xf32>, vector<16x128xf32> -> vector<16x128xf32>
    %160 = arith.addf %140, %159 : vector<16x128xf32>
    %161 = vector.extract_strided_slice %137 {offsets = [0, 32], sizes = [16, 32], strides = [1, 1]} : vector<16x128xf32> to vector<16x32xf32>
    %162 = vector.extract_strided_slice %138 {offsets = [0, 32], sizes = [16, 32], strides = [1, 1]} : vector<16x128xf32> to vector<16x32xf32>
    %163 = vector.extract_strided_slice %139 {offsets = [0, 32], sizes = [16, 32], strides = [1, 1]} : vector<16x128xf32> to vector<16x32xf32>
    "tpu.trace_start"() <{level = 10 : i32, message = "qd,kd->qk"}> : () -> ()
    %cst_83 = arith.constant dense<0.000000e+00> : vector<16x16xf32>
    %164 = tpu.matmul %161, %162, %cst_83 {dimension_numbers = #tpu.dot_dimension_numbers<[1], [1], [0], [0], [0, 0, 1, 0], [], []>} : vector<16x32xf32>, vector<16x32xf32>, vector<16x16xf32> -> vector<16x16xf32>
    "tpu.trace_stop"() : () -> ()
    %cst_84 = arith.constant 0.176776692 : f32
    %165 = vector.broadcast %cst_84 : f32 to vector<16x16xf32>
    %166 = arith.mulf %164, %165 : vector<16x16xf32>
    %cst_85 = arith.constant dense<0xFF800000> : vector<16xf32>
    %167 = vector.multi_reduction <maximumf>, %166, %cst_85 [1] : vector<16x16xf32> to vector<16xf32>
    %168 = vector.shape_cast %167 : vector<16xf32> to vector<16x1xf32>
    %169 = vector.broadcast %168 : vector<16x1xf32> to vector<16x16xf32>
    %170 = arith.subf %166, %169 : vector<16x16xf32>
    %171 = math.exp %170 : vector<16x16xf32>
    %cst_86 = arith.constant dense<0.000000e+00> : vector<16xf32>
    %172 = vector.multi_reduction <add>, %171, %cst_86 [1] : vector<16x16xf32> to vector<16xf32>
    %173 = vector.shape_cast %172 : vector<16xf32> to vector<16x1xf32>
    %174 = vector.broadcast %173 : vector<16x1xf32> to vector<16x16xf32>
    %175 = arith.divf %171, %174 : vector<16x16xf32>
    %cst_87 = arith.constant dense<0.000000e+00> : vector<16x32xf32>
    %176 = tpu.matmul %175, %163, %cst_87 {dimension_numbers = #tpu.dot_dimension_numbers<[1], [0], [0], [1], [0, 0, 1, 1], [], []>} : vector<16x16xf32>, vector<16x32xf32>, vector<16x32xf32> -> vector<16x32xf32>
    %c0_88 = arith.constant 0 : index
    %c32_89 = arith.constant 32 : index
    %c0_90 = arith.constant 0 : index
    %177 = vector.load %arg13[%c0_88, %c32_89, %c0_90] : memref<2x128x128xf32, #tpu.memory_space<vmem>>, vector<1x32x128xf32>
    %178 = vector.shape_cast %177 : vector<1x32x128xf32> to vector<32x128xf32>
    %cst_91 = arith.constant dense<0.000000e+00> : vector<16x128xf32>
    %179 = tpu.matmul %176, %178, %cst_91 {dimension_numbers = #tpu.dot_dimension_numbers<[1], [0], [0], [1], [0, 0, 1, 1], [], []>} : vector<16x32xf32>, vector<32x128xf32>, vector<16x128xf32> -> vector<16x128xf32>
    %180 = arith.addf %160, %179 : vector<16x128xf32>
    %181 = vector.extract_strided_slice %137 {offsets = [0, 64], sizes = [16, 32], strides = [1, 1]} : vector<16x128xf32> to vector<16x32xf32>
    %182 = vector.extract_strided_slice %138 {offsets = [0, 64], sizes = [16, 32], strides = [1, 1]} : vector<16x128xf32> to vector<16x32xf32>
    %183 = vector.extract_strided_slice %139 {offsets = [0, 64], sizes = [16, 32], strides = [1, 1]} : vector<16x128xf32> to vector<16x32xf32>
    "tpu.trace_start"() <{level = 10 : i32, message = "qd,kd->qk"}> : () -> ()
    %cst_92 = arith.constant dense<0.000000e+00> : vector<16x16xf32>
    %184 = tpu.matmul %181, %182, %cst_92 {dimension_numbers = #tpu.dot_dimension_numbers<[1], [1], [0], [0], [0, 0, 1, 0], [], []>} : vector<16x32xf32>, vector<16x32xf32>, vector<16x16xf32> -> vector<16x16xf32>
    "tpu.trace_stop"() : () -> ()
    %cst_93 = arith.constant 0.176776692 : f32
    %185 = vector.broadcast %cst_93 : f32 to vector<16x16xf32>
    %186 = arith.mulf %184, %185 : vector<16x16xf32>
    %cst_94 = arith.constant dense<0xFF800000> : vector<16xf32>
    %187 = vector.multi_reduction <maximumf>, %186, %cst_94 [1] : vector<16x16xf32> to vector<16xf32>
    %188 = vector.shape_cast %187 : vector<16xf32> to vector<16x1xf32>
    %189 = vector.broadcast %188 : vector<16x1xf32> to vector<16x16xf32>
    %190 = arith.subf %186, %189 : vector<16x16xf32>
    %191 = math.exp %190 : vector<16x16xf32>
    %cst_95 = arith.constant dense<0.000000e+00> : vector<16xf32>
    %192 = vector.multi_reduction <add>, %191, %cst_95 [1] : vector<16x16xf32> to vector<16xf32>
    %193 = vector.shape_cast %192 : vector<16xf32> to vector<16x1xf32>
    %194 = vector.broadcast %193 : vector<16x1xf32> to vector<16x16xf32>
    %195 = arith.divf %191, %194 : vector<16x16xf32>
    %cst_96 = arith.constant dense<0.000000e+00> : vector<16x32xf32>
    %196 = tpu.matmul %195, %183, %cst_96 {dimension_numbers = #tpu.dot_dimension_numbers<[1], [0], [0], [1], [0, 0, 1, 1], [], []>} : vector<16x16xf32>, vector<16x32xf32>, vector<16x32xf32> -> vector<16x32xf32>
    %c0_97 = arith.constant 0 : index
    %c64_98 = arith.constant 64 : index
    %c0_99 = arith.constant 0 : index
    %197 = vector.load %arg13[%c0_97, %c64_98, %c0_99] : memref<2x128x128xf32, #tpu.memory_space<vmem>>, vector<1x32x128xf32>
    %198 = vector.shape_cast %197 : vector<1x32x128xf32> to vector<32x128xf32>
    %cst_100 = arith.constant dense<0.000000e+00> : vector<16x128xf32>
    %199 = tpu.matmul %196, %198, %cst_100 {dimension_numbers = #tpu.dot_dimension_numbers<[1], [0], [0], [1], [0, 0, 1, 1], [], []>} : vector<16x32xf32>, vector<32x128xf32>, vector<16x128xf32> -> vector<16x128xf32>
    %200 = arith.addf %180, %199 : vector<16x128xf32>
    %201 = vector.extract_strided_slice %137 {offsets = [0, 96], sizes = [16, 32], strides = [1, 1]} : vector<16x128xf32> to vector<16x32xf32>
    %202 = vector.extract_strided_slice %138 {offsets = [0, 96], sizes = [16, 32], strides = [1, 1]} : vector<16x128xf32> to vector<16x32xf32>
    %203 = vector.extract_strided_slice %139 {offsets = [0, 96], sizes = [16, 32], strides = [1, 1]} : vector<16x128xf32> to vector<16x32xf32>
    "tpu.trace_start"() <{level = 10 : i32, message = "qd,kd->qk"}> : () -> ()
    %cst_101 = arith.constant dense<0.000000e+00> : vector<16x16xf32>
    %204 = tpu.matmul %201, %202, %cst_101 {dimension_numbers = #tpu.dot_dimension_numbers<[1], [1], [0], [0], [0, 0, 1, 0], [], []>} : vector<16x32xf32>, vector<16x32xf32>, vector<16x16xf32> -> vector<16x16xf32>
    "tpu.trace_stop"() : () -> ()
    %cst_102 = arith.constant 0.176776692 : f32
    %205 = vector.broadcast %cst_102 : f32 to vector<16x16xf32>
    %206 = arith.mulf %204, %205 : vector<16x16xf32>
    %cst_103 = arith.constant dense<0xFF800000> : vector<16xf32>
    %207 = vector.multi_reduction <maximumf>, %206, %cst_103 [1] : vector<16x16xf32> to vector<16xf32>
    %208 = vector.shape_cast %207 : vector<16xf32> to vector<16x1xf32>
    %209 = vector.broadcast %208 : vector<16x1xf32> to vector<16x16xf32>
    %210 = arith.subf %206, %209 : vector<16x16xf32>
    %211 = math.exp %210 : vector<16x16xf32>
    %cst_104 = arith.constant dense<0.000000e+00> : vector<16xf32>
    %212 = vector.multi_reduction <add>, %211, %cst_104 [1] : vector<16x16xf32> to vector<16xf32>
    %213 = vector.shape_cast %212 : vector<16xf32> to vector<16x1xf32>
    %214 = vector.broadcast %213 : vector<16x1xf32> to vector<16x16xf32>
    %215 = arith.divf %211, %214 : vector<16x16xf32>
    %cst_105 = arith.constant dense<0.000000e+00> : vector<16x32xf32>
    %216 = tpu.matmul %215, %203, %cst_105 {dimension_numbers = #tpu.dot_dimension_numbers<[1], [0], [0], [1], [0, 0, 1, 1], [], []>} : vector<16x16xf32>, vector<16x32xf32>, vector<16x32xf32> -> vector<16x32xf32>
    %c0_106 = arith.constant 0 : index
    %c96_107 = arith.constant 96 : index
    %c0_108 = arith.constant 0 : index
    %217 = vector.load %arg13[%c0_106, %c96_107, %c0_108] : memref<2x128x128xf32, #tpu.memory_space<vmem>>, vector<1x32x128xf32>
    %218 = vector.shape_cast %217 : vector<1x32x128xf32> to vector<32x128xf32>
    %cst_109 = arith.constant dense<0.000000e+00> : vector<16x128xf32>
    %219 = tpu.matmul %216, %218, %cst_109 {dimension_numbers = #tpu.dot_dimension_numbers<[1], [0], [0], [1], [0, 0, 1, 1], [], []>} : vector<16x32xf32>, vector<32x128xf32>, vector<16x128xf32> -> vector<16x128xf32>
    %220 = arith.addf %200, %219 : vector<16x128xf32>
    %221 = tpu.concatenate %136, %220 in 0 : vector<16x128xf32>, vector<16x128xf32> -> vector<32x128xf32>
    %c0_110 = arith.constant 0 : index
    %c0_111 = arith.constant 0 : index
    %c0_112 = arith.constant 0 : index
    %222 = vector.load %arg14[%c0_110, %c0_111, %c0_112] : memref<2x1x128xf32, #tpu.memory_space<vmem>>, vector<1x1x128xf32>
    %223 = vector.shape_cast %222 : vector<1x1x128xf32> to vector<1x128xf32>
    %224 = vector.broadcast %223 : vector<1x128xf32> to vector<32x128xf32>
    %225 = arith.addf %221, %224 : vector<32x128xf32>
    %226 = arith.addf %225, %7 : vector<32x128xf32>
    %c0_113 = arith.constant 0 : index
    %c0_114 = arith.constant 0 : index
    %c0_115 = arith.constant 0 : index
    %227 = vector.load %arg15[%c0_113, %c0_114, %c0_115] : memref<2x1x128xf32, #tpu.memory_space<vmem>>, vector<1x1x128xf32>
    %228 = vector.shape_cast %227 : vector<1x1x128xf32> to vector<1x128xf32>
    %c0_116 = arith.constant 0 : index
    %c0_117 = arith.constant 0 : index
    %c0_118 = arith.constant 0 : index
    %229 = vector.load %arg16[%c0_116, %c0_117, %c0_118] : memref<2x1x128xf32, #tpu.memory_space<vmem>>, vector<1x1x128xf32>
    %230 = vector.shape_cast %229 : vector<1x1x128xf32> to vector<1x128xf32>
    %cst_119 = arith.constant dense<0.000000e+00> : vector<32xf32>
    %231 = vector.multi_reduction <add>, %226, %cst_119 [1] : vector<32x128xf32> to vector<32xf32>
    %232 = vector.shape_cast %231 : vector<32xf32> to vector<32x1xf32>
    %cst_120 = arith.constant 1.280000e+02 : f32
    %233 = vector.broadcast %cst_120 : f32 to vector<32x1xf32>
    %234 = arith.divf %232, %233 : vector<32x1xf32>
    %235 = vector.broadcast %234 : vector<32x1xf32> to vector<32x128xf32>
    %236 = arith.subf %226, %235 : vector<32x128xf32>
    %237 = arith.mulf %236, %236 : vector<32x128xf32>
    %cst_121 = arith.constant dense<0.000000e+00> : vector<32xf32>
    %238 = vector.multi_reduction <add>, %237, %cst_121 [1] : vector<32x128xf32> to vector<32xf32>
    %239 = vector.shape_cast %238 : vector<32xf32> to vector<32x1xf32>
    %cst_122 = arith.constant 1.280000e+02 : f32
    %240 = vector.broadcast %cst_122 : f32 to vector<32x1xf32>
    %241 = arith.divf %239, %240 : vector<32x1xf32>
    %cst_123 = arith.constant 9.99999997E-7 : f32
    %242 = vector.broadcast %cst_123 : f32 to vector<32x1xf32>
    %243 = arith.addf %241, %242 : vector<32x1xf32>
    %244 = math.rsqrt %243 : vector<32x1xf32>
    %245 = vector.broadcast %244 : vector<32x1xf32> to vector<32x128xf32>
    %246 = arith.mulf %236, %245 : vector<32x128xf32>
    %247 = vector.broadcast %228 : vector<1x128xf32> to vector<32x128xf32>
    %248 = arith.mulf %246, %247 : vector<32x128xf32>
    %249 = vector.broadcast %230 : vector<1x128xf32> to vector<32x128xf32>
    %250 = arith.addf %248, %249 : vector<32x128xf32>
    %c0_124 = arith.constant 0 : index
    %c0_125 = arith.constant 0 : index
    %c0_126 = arith.constant 0 : index
    %251 = vector.load %arg17[%c0_124, %c0_125, %c0_126] : memref<2x128x256xf32, #tpu.memory_space<vmem>>, vector<1x128x256xf32>
    %252 = vector.shape_cast %251 : vector<1x128x256xf32> to vector<128x256xf32>
    %cst_127 = arith.constant dense<0.000000e+00> : vector<32x256xf32>
    %253 = tpu.matmul %250, %252, %cst_127 {dimension_numbers = #tpu.dot_dimension_numbers<[1], [0], [0], [1], [0, 0, 1, 1], [], []>} : vector<32x128xf32>, vector<128x256xf32>, vector<32x256xf32> -> vector<32x256xf32>
    %c0_128 = arith.constant 0 : index
    %c0_129 = arith.constant 0 : index
    %c0_130 = arith.constant 0 : index
    %254 = vector.load %arg18[%c0_128, %c0_129, %c0_130] : memref<2x1x256xf32, #tpu.memory_space<vmem>>, vector<1x1x256xf32>
    %255 = vector.shape_cast %254 : vector<1x1x256xf32> to vector<1x256xf32>
    %256 = vector.broadcast %255 : vector<1x256xf32> to vector<32x256xf32>
    %257 = arith.addf %253, %256 : vector<32x256xf32>
    %cst_131 = arith.constant 5.000000e-01 : f32
    %258 = vector.broadcast %cst_131 : f32 to vector<32x256xf32>
    %259 = arith.mulf %258, %257 : vector<32x256xf32>
    %cst_132 = arith.constant 4.471500e-02 : f32
    %260 = vector.broadcast %cst_132 : f32 to vector<32x256xf32>
    %261 = arith.mulf %260, %257 : vector<32x256xf32>
    %262 = arith.mulf %261, %257 : vector<32x256xf32>
    %263 = arith.mulf %262, %257 : vector<32x256xf32>
    %264 = arith.addf %257, %263 : vector<32x256xf32>
    %cst_133 = arith.constant 0.797884583 : f32
    %265 = vector.broadcast %cst_133 : f32 to vector<32x256xf32>
    %266 = arith.mulf %265, %264 : vector<32x256xf32>
    %267 = math.tanh %266 : vector<32x256xf32>
    %cst_134 = arith.constant 1.000000e+00 : f32
    %268 = vector.broadcast %cst_134 : f32 to vector<32x256xf32>
    %269 = arith.addf %268, %267 : vector<32x256xf32>
    %270 = arith.mulf %259, %269 : vector<32x256xf32>
    %c0_135 = arith.constant 0 : index
    %c0_136 = arith.constant 0 : index
    %c0_137 = arith.constant 0 : index
    %271 = vector.load %arg19[%c0_135, %c0_136, %c0_137] : memref<2x256x128xf32, #tpu.memory_space<vmem>>, vector<1x256x128xf32>
    %272 = vector.shape_cast %271 : vector<1x256x128xf32> to vector<256x128xf32>
    %cst_138 = arith.constant dense<0.000000e+00> : vector<32x128xf32>
    %273 = tpu.matmul %270, %272, %cst_138 {dimension_numbers = #tpu.dot_dimension_numbers<[1], [0], [0], [1], [0, 0, 1, 1], [], []>} : vector<32x256xf32>, vector<256x128xf32>, vector<32x128xf32> -> vector<32x128xf32>
    %c0_139 = arith.constant 0 : index
    %c0_140 = arith.constant 0 : index
    %c0_141 = arith.constant 0 : index
    %274 = vector.load %arg20[%c0_139, %c0_140, %c0_141] : memref<2x1x128xf32, #tpu.memory_space<vmem>>, vector<1x1x128xf32>
    %275 = vector.shape_cast %274 : vector<1x1x128xf32> to vector<1x128xf32>
    %276 = vector.broadcast %275 : vector<1x128xf32> to vector<32x128xf32>
    %277 = arith.addf %273, %276 : vector<32x128xf32>
    %278 = arith.addf %277, %226 : vector<32x128xf32>
    %c1 = arith.constant 1 : index
    %c0_142 = arith.constant 0 : index
    %c0_143 = arith.constant 0 : index
    %279 = vector.load %arg5[%c1, %c0_142, %c0_143] : memref<2x1x128xf32, #tpu.memory_space<vmem>>, vector<1x1x128xf32>
    %280 = vector.shape_cast %279 : vector<1x1x128xf32> to vector<1x128xf32>
    %c1_144 = arith.constant 1 : index
    %c0_145 = arith.constant 0 : index
    %c0_146 = arith.constant 0 : index
    %281 = vector.load %arg6[%c1_144, %c0_145, %c0_146] : memref<2x1x128xf32, #tpu.memory_space<vmem>>, vector<1x1x128xf32>
    %282 = vector.shape_cast %281 : vector<1x1x128xf32> to vector<1x128xf32>
    %cst_147 = arith.constant dense<0.000000e+00> : vector<32xf32>
    %283 = vector.multi_reduction <add>, %278, %cst_147 [1] : vector<32x128xf32> to vector<32xf32>
    %284 = vector.shape_cast %283 : vector<32xf32> to vector<32x1xf32>
    %cst_148 = arith.constant 1.280000e+02 : f32
    %285 = vector.broadcast %cst_148 : f32 to vector<32x1xf32>
    %286 = arith.divf %284, %285 : vector<32x1xf32>
    %287 = vector.broadcast %286 : vector<32x1xf32> to vector<32x128xf32>
    %288 = arith.subf %278, %287 : vector<32x128xf32>
    %289 = arith.mulf %288, %288 : vector<32x128xf32>
    %cst_149 = arith.constant dense<0.000000e+00> : vector<32xf32>
    %290 = vector.multi_reduction <add>, %289, %cst_149 [1] : vector<32x128xf32> to vector<32xf32>
    %291 = vector.shape_cast %290 : vector<32xf32> to vector<32x1xf32>
    %cst_150 = arith.constant 1.280000e+02 : f32
    %292 = vector.broadcast %cst_150 : f32 to vector<32x1xf32>
    %293 = arith.divf %291, %292 : vector<32x1xf32>
    %cst_151 = arith.constant 9.99999997E-7 : f32
    %294 = vector.broadcast %cst_151 : f32 to vector<32x1xf32>
    %295 = arith.addf %293, %294 : vector<32x1xf32>
    %296 = math.rsqrt %295 : vector<32x1xf32>
    %297 = vector.broadcast %296 : vector<32x1xf32> to vector<32x128xf32>
    %298 = arith.mulf %288, %297 : vector<32x128xf32>
    %299 = vector.broadcast %280 : vector<1x128xf32> to vector<32x128xf32>
    %300 = arith.mulf %298, %299 : vector<32x128xf32>
    %301 = vector.broadcast %282 : vector<1x128xf32> to vector<32x128xf32>
    %302 = arith.addf %300, %301 : vector<32x128xf32>
    %c1_152 = arith.constant 1 : index
    %c0_153 = arith.constant 0 : index
    %c0_154 = arith.constant 0 : index
    %303 = vector.load %arg7[%c1_152, %c0_153, %c0_154] : memref<2x128x128xf32, #tpu.memory_space<vmem>>, vector<1x128x128xf32>
    %304 = vector.shape_cast %303 : vector<1x128x128xf32> to vector<128x128xf32>
    %cst_155 = arith.constant dense<0.000000e+00> : vector<32x128xf32>
    %305 = tpu.matmul %302, %304, %cst_155 {dimension_numbers = #tpu.dot_dimension_numbers<[1], [0], [0], [1], [0, 0, 1, 1], [], []>} : vector<32x128xf32>, vector<128x128xf32>, vector<32x128xf32> -> vector<32x128xf32>
    %c1_156 = arith.constant 1 : index
    %c0_157 = arith.constant 0 : index
    %c0_158 = arith.constant 0 : index
    %306 = vector.load %arg8[%c1_156, %c0_157, %c0_158] : memref<2x1x128xf32, #tpu.memory_space<vmem>>, vector<1x1x128xf32>
    %307 = vector.shape_cast %306 : vector<1x1x128xf32> to vector<1x128xf32>
    %308 = vector.broadcast %307 : vector<1x128xf32> to vector<32x128xf32>
    %309 = arith.addf %305, %308 : vector<32x128xf32>
    %c1_159 = arith.constant 1 : index
    %c0_160 = arith.constant 0 : index
    %c0_161 = arith.constant 0 : index
    %310 = vector.load %arg9[%c1_159, %c0_160, %c0_161] : memref<2x128x128xf32, #tpu.memory_space<vmem>>, vector<1x128x128xf32>
    %311 = vector.shape_cast %310 : vector<1x128x128xf32> to vector<128x128xf32>
    %cst_162 = arith.constant dense<0.000000e+00> : vector<32x128xf32>
    %312 = tpu.matmul %302, %311, %cst_162 {dimension_numbers = #tpu.dot_dimension_numbers<[1], [0], [0], [1], [0, 0, 1, 1], [], []>} : vector<32x128xf32>, vector<128x128xf32>, vector<32x128xf32> -> vector<32x128xf32>
    %c1_163 = arith.constant 1 : index
    %c0_164 = arith.constant 0 : index
    %c0_165 = arith.constant 0 : index
    %313 = vector.load %arg10[%c1_163, %c0_164, %c0_165] : memref<2x1x128xf32, #tpu.memory_space<vmem>>, vector<1x1x128xf32>
    %314 = vector.shape_cast %313 : vector<1x1x128xf32> to vector<1x128xf32>
    %315 = vector.broadcast %314 : vector<1x128xf32> to vector<32x128xf32>
    %316 = arith.addf %312, %315 : vector<32x128xf32>
    %c1_166 = arith.constant 1 : index
    %c0_167 = arith.constant 0 : index
    %c0_168 = arith.constant 0 : index
    %317 = vector.load %arg11[%c1_166, %c0_167, %c0_168] : memref<2x128x128xf32, #tpu.memory_space<vmem>>, vector<1x128x128xf32>
    %318 = vector.shape_cast %317 : vector<1x128x128xf32> to vector<128x128xf32>
    %cst_169 = arith.constant dense<0.000000e+00> : vector<32x128xf32>
    %319 = tpu.matmul %302, %318, %cst_169 {dimension_numbers = #tpu.dot_dimension_numbers<[1], [0], [0], [1], [0, 0, 1, 1], [], []>} : vector<32x128xf32>, vector<128x128xf32>, vector<32x128xf32> -> vector<32x128xf32>
    %c1_170 = arith.constant 1 : index
    %c0_171 = arith.constant 0 : index
    %c0_172 = arith.constant 0 : index
    %320 = vector.load %arg12[%c1_170, %c0_171, %c0_172] : memref<2x1x128xf32, #tpu.memory_space<vmem>>, vector<1x1x128xf32>
    %321 = vector.shape_cast %320 : vector<1x1x128xf32> to vector<1x128xf32>
    %322 = vector.broadcast %321 : vector<1x128xf32> to vector<32x128xf32>
    %323 = arith.addf %319, %322 : vector<32x128xf32>
    %324 = vector.extract_strided_slice %309 {offsets = [0, 0], sizes = [16, 128], strides = [1, 1]} : vector<32x128xf32> to vector<16x128xf32>
    %325 = vector.extract_strided_slice %316 {offsets = [0, 0], sizes = [16, 128], strides = [1, 1]} : vector<32x128xf32> to vector<16x128xf32>
    %326 = vector.extract_strided_slice %323 {offsets = [0, 0], sizes = [16, 128], strides = [1, 1]} : vector<32x128xf32> to vector<16x128xf32>
    %cst_173 = arith.constant 0.000000e+00 : f32
    %327 = vector.broadcast %cst_173 : f32 to vector<16x128xf32>
    %328 = vector.extract_strided_slice %324 {offsets = [0, 0], sizes = [16, 32], strides = [1, 1]} : vector<16x128xf32> to vector<16x32xf32>
    %329 = vector.extract_strided_slice %325 {offsets = [0, 0], sizes = [16, 32], strides = [1, 1]} : vector<16x128xf32> to vector<16x32xf32>
    %330 = vector.extract_strided_slice %326 {offsets = [0, 0], sizes = [16, 32], strides = [1, 1]} : vector<16x128xf32> to vector<16x32xf32>
    "tpu.trace_start"() <{level = 10 : i32, message = "qd,kd->qk"}> : () -> ()
    %cst_174 = arith.constant dense<0.000000e+00> : vector<16x16xf32>
    %331 = tpu.matmul %328, %329, %cst_174 {dimension_numbers = #tpu.dot_dimension_numbers<[1], [1], [0], [0], [0, 0, 1, 0], [], []>} : vector<16x32xf32>, vector<16x32xf32>, vector<16x16xf32> -> vector<16x16xf32>
    "tpu.trace_stop"() : () -> ()
    %cst_175 = arith.constant 0.176776692 : f32
    %332 = vector.broadcast %cst_175 : f32 to vector<16x16xf32>
    %333 = arith.mulf %331, %332 : vector<16x16xf32>
    %cst_176 = arith.constant dense<0xFF800000> : vector<16xf32>
    %334 = vector.multi_reduction <maximumf>, %333, %cst_176 [1] : vector<16x16xf32> to vector<16xf32>
    %335 = vector.shape_cast %334 : vector<16xf32> to vector<16x1xf32>
    %336 = vector.broadcast %335 : vector<16x1xf32> to vector<16x16xf32>
    %337 = arith.subf %333, %336 : vector<16x16xf32>
    %338 = math.exp %337 : vector<16x16xf32>
    %cst_177 = arith.constant dense<0.000000e+00> : vector<16xf32>
    %339 = vector.multi_reduction <add>, %338, %cst_177 [1] : vector<16x16xf32> to vector<16xf32>
    %340 = vector.shape_cast %339 : vector<16xf32> to vector<16x1xf32>
    %341 = vector.broadcast %340 : vector<16x1xf32> to vector<16x16xf32>
    %342 = arith.divf %338, %341 : vector<16x16xf32>
    %cst_178 = arith.constant dense<0.000000e+00> : vector<16x32xf32>
    %343 = tpu.matmul %342, %330, %cst_178 {dimension_numbers = #tpu.dot_dimension_numbers<[1], [0], [0], [1], [0, 0, 1, 1], [], []>} : vector<16x16xf32>, vector<16x32xf32>, vector<16x32xf32> -> vector<16x32xf32>
    %c1_179 = arith.constant 1 : index
    %c0_180 = arith.constant 0 : index
    %c0_181 = arith.constant 0 : index
    %344 = vector.load %arg13[%c1_179, %c0_180, %c0_181] : memref<2x128x128xf32, #tpu.memory_space<vmem>>, vector<1x32x128xf32>
    %345 = vector.shape_cast %344 : vector<1x32x128xf32> to vector<32x128xf32>
    %cst_182 = arith.constant dense<0.000000e+00> : vector<16x128xf32>
    %346 = tpu.matmul %343, %345, %cst_182 {dimension_numbers = #tpu.dot_dimension_numbers<[1], [0], [0], [1], [0, 0, 1, 1], [], []>} : vector<16x32xf32>, vector<32x128xf32>, vector<16x128xf32> -> vector<16x128xf32>
    %347 = arith.addf %327, %346 : vector<16x128xf32>
    %348 = vector.extract_strided_slice %324 {offsets = [0, 32], sizes = [16, 32], strides = [1, 1]} : vector<16x128xf32> to vector<16x32xf32>
    %349 = vector.extract_strided_slice %325 {offsets = [0, 32], sizes = [16, 32], strides = [1, 1]} : vector<16x128xf32> to vector<16x32xf32>
    %350 = vector.extract_strided_slice %326 {offsets = [0, 32], sizes = [16, 32], strides = [1, 1]} : vector<16x128xf32> to vector<16x32xf32>
    "tpu.trace_start"() <{level = 10 : i32, message = "qd,kd->qk"}> : () -> ()
    %cst_183 = arith.constant dense<0.000000e+00> : vector<16x16xf32>
    %351 = tpu.matmul %348, %349, %cst_183 {dimension_numbers = #tpu.dot_dimension_numbers<[1], [1], [0], [0], [0, 0, 1, 0], [], []>} : vector<16x32xf32>, vector<16x32xf32>, vector<16x16xf32> -> vector<16x16xf32>
    "tpu.trace_stop"() : () -> ()
    %cst_184 = arith.constant 0.176776692 : f32
    %352 = vector.broadcast %cst_184 : f32 to vector<16x16xf32>
    %353 = arith.mulf %351, %352 : vector<16x16xf32>
    %cst_185 = arith.constant dense<0xFF800000> : vector<16xf32>
    %354 = vector.multi_reduction <maximumf>, %353, %cst_185 [1] : vector<16x16xf32> to vector<16xf32>
    %355 = vector.shape_cast %354 : vector<16xf32> to vector<16x1xf32>
    %356 = vector.broadcast %355 : vector<16x1xf32> to vector<16x16xf32>
    %357 = arith.subf %353, %356 : vector<16x16xf32>
    %358 = math.exp %357 : vector<16x16xf32>
    %cst_186 = arith.constant dense<0.000000e+00> : vector<16xf32>
    %359 = vector.multi_reduction <add>, %358, %cst_186 [1] : vector<16x16xf32> to vector<16xf32>
    %360 = vector.shape_cast %359 : vector<16xf32> to vector<16x1xf32>
    %361 = vector.broadcast %360 : vector<16x1xf32> to vector<16x16xf32>
    %362 = arith.divf %358, %361 : vector<16x16xf32>
    %cst_187 = arith.constant dense<0.000000e+00> : vector<16x32xf32>
    %363 = tpu.matmul %362, %350, %cst_187 {dimension_numbers = #tpu.dot_dimension_numbers<[1], [0], [0], [1], [0, 0, 1, 1], [], []>} : vector<16x16xf32>, vector<16x32xf32>, vector<16x32xf32> -> vector<16x32xf32>
    %c1_188 = arith.constant 1 : index
    %c32_189 = arith.constant 32 : index
    %c0_190 = arith.constant 0 : index
    %364 = vector.load %arg13[%c1_188, %c32_189, %c0_190] : memref<2x128x128xf32, #tpu.memory_space<vmem>>, vector<1x32x128xf32>
    %365 = vector.shape_cast %364 : vector<1x32x128xf32> to vector<32x128xf32>
    %cst_191 = arith.constant dense<0.000000e+00> : vector<16x128xf32>
    %366 = tpu.matmul %363, %365, %cst_191 {dimension_numbers = #tpu.dot_dimension_numbers<[1], [0], [0], [1], [0, 0, 1, 1], [], []>} : vector<16x32xf32>, vector<32x128xf32>, vector<16x128xf32> -> vector<16x128xf32>
    %367 = arith.addf %347, %366 : vector<16x128xf32>
    %368 = vector.extract_strided_slice %324 {offsets = [0, 64], sizes = [16, 32], strides = [1, 1]} : vector<16x128xf32> to vector<16x32xf32>
    %369 = vector.extract_strided_slice %325 {offsets = [0, 64], sizes = [16, 32], strides = [1, 1]} : vector<16x128xf32> to vector<16x32xf32>
    %370 = vector.extract_strided_slice %326 {offsets = [0, 64], sizes = [16, 32], strides = [1, 1]} : vector<16x128xf32> to vector<16x32xf32>
    "tpu.trace_start"() <{level = 10 : i32, message = "qd,kd->qk"}> : () -> ()
    %cst_192 = arith.constant dense<0.000000e+00> : vector<16x16xf32>
    %371 = tpu.matmul %368, %369, %cst_192 {dimension_numbers = #tpu.dot_dimension_numbers<[1], [1], [0], [0], [0, 0, 1, 0], [], []>} : vector<16x32xf32>, vector<16x32xf32>, vector<16x16xf32> -> vector<16x16xf32>
    "tpu.trace_stop"() : () -> ()
    %cst_193 = arith.constant 0.176776692 : f32
    %372 = vector.broadcast %cst_193 : f32 to vector<16x16xf32>
    %373 = arith.mulf %371, %372 : vector<16x16xf32>
    %cst_194 = arith.constant dense<0xFF800000> : vector<16xf32>
    %374 = vector.multi_reduction <maximumf>, %373, %cst_194 [1] : vector<16x16xf32> to vector<16xf32>
    %375 = vector.shape_cast %374 : vector<16xf32> to vector<16x1xf32>
    %376 = vector.broadcast %375 : vector<16x1xf32> to vector<16x16xf32>
    %377 = arith.subf %373, %376 : vector<16x16xf32>
    %378 = math.exp %377 : vector<16x16xf32>
    %cst_195 = arith.constant dense<0.000000e+00> : vector<16xf32>
    %379 = vector.multi_reduction <add>, %378, %cst_195 [1] : vector<16x16xf32> to vector<16xf32>
    %380 = vector.shape_cast %379 : vector<16xf32> to vector<16x1xf32>
    %381 = vector.broadcast %380 : vector<16x1xf32> to vector<16x16xf32>
    %382 = arith.divf %378, %381 : vector<16x16xf32>
    %cst_196 = arith.constant dense<0.000000e+00> : vector<16x32xf32>
    %383 = tpu.matmul %382, %370, %cst_196 {dimension_numbers = #tpu.dot_dimension_numbers<[1], [0], [0], [1], [0, 0, 1, 1], [], []>} : vector<16x16xf32>, vector<16x32xf32>, vector<16x32xf32> -> vector<16x32xf32>
    %c1_197 = arith.constant 1 : index
    %c64_198 = arith.constant 64 : index
    %c0_199 = arith.constant 0 : index
    %384 = vector.load %arg13[%c1_197, %c64_198, %c0_199] : memref<2x128x128xf32, #tpu.memory_space<vmem>>, vector<1x32x128xf32>
    %385 = vector.shape_cast %384 : vector<1x32x128xf32> to vector<32x128xf32>
    %cst_200 = arith.constant dense<0.000000e+00> : vector<16x128xf32>
    %386 = tpu.matmul %383, %385, %cst_200 {dimension_numbers = #tpu.dot_dimension_numbers<[1], [0], [0], [1], [0, 0, 1, 1], [], []>} : vector<16x32xf32>, vector<32x128xf32>, vector<16x128xf32> -> vector<16x128xf32>
    %387 = arith.addf %367, %386 : vector<16x128xf32>
    %388 = vector.extract_strided_slice %324 {offsets = [0, 96], sizes = [16, 32], strides = [1, 1]} : vector<16x128xf32> to vector<16x32xf32>
    %389 = vector.extract_strided_slice %325 {offsets = [0, 96], sizes = [16, 32], strides = [1, 1]} : vector<16x128xf32> to vector<16x32xf32>
    %390 = vector.extract_strided_slice %326 {offsets = [0, 96], sizes = [16, 32], strides = [1, 1]} : vector<16x128xf32> to vector<16x32xf32>
    "tpu.trace_start"() <{level = 10 : i32, message = "qd,kd->qk"}> : () -> ()
    %cst_201 = arith.constant dense<0.000000e+00> : vector<16x16xf32>
    %391 = tpu.matmul %388, %389, %cst_201 {dimension_numbers = #tpu.dot_dimension_numbers<[1], [1], [0], [0], [0, 0, 1, 0], [], []>} : vector<16x32xf32>, vector<16x32xf32>, vector<16x16xf32> -> vector<16x16xf32>
    "tpu.trace_stop"() : () -> ()
    %cst_202 = arith.constant 0.176776692 : f32
    %392 = vector.broadcast %cst_202 : f32 to vector<16x16xf32>
    %393 = arith.mulf %391, %392 : vector<16x16xf32>
    %cst_203 = arith.constant dense<0xFF800000> : vector<16xf32>
    %394 = vector.multi_reduction <maximumf>, %393, %cst_203 [1] : vector<16x16xf32> to vector<16xf32>
    %395 = vector.shape_cast %394 : vector<16xf32> to vector<16x1xf32>
    %396 = vector.broadcast %395 : vector<16x1xf32> to vector<16x16xf32>
    %397 = arith.subf %393, %396 : vector<16x16xf32>
    %398 = math.exp %397 : vector<16x16xf32>
    %cst_204 = arith.constant dense<0.000000e+00> : vector<16xf32>
    %399 = vector.multi_reduction <add>, %398, %cst_204 [1] : vector<16x16xf32> to vector<16xf32>
    %400 = vector.shape_cast %399 : vector<16xf32> to vector<16x1xf32>
    %401 = vector.broadcast %400 : vector<16x1xf32> to vector<16x16xf32>
    %402 = arith.divf %398, %401 : vector<16x16xf32>
    %cst_205 = arith.constant dense<0.000000e+00> : vector<16x32xf32>
    %403 = tpu.matmul %402, %390, %cst_205 {dimension_numbers = #tpu.dot_dimension_numbers<[1], [0], [0], [1], [0, 0, 1, 1], [], []>} : vector<16x16xf32>, vector<16x32xf32>, vector<16x32xf32> -> vector<16x32xf32>
    %c1_206 = arith.constant 1 : index
    %c96_207 = arith.constant 96 : index
    %c0_208 = arith.constant 0 : index
    %404 = vector.load %arg13[%c1_206, %c96_207, %c0_208] : memref<2x128x128xf32, #tpu.memory_space<vmem>>, vector<1x32x128xf32>
    %405 = vector.shape_cast %404 : vector<1x32x128xf32> to vector<32x128xf32>
    %cst_209 = arith.constant dense<0.000000e+00> : vector<16x128xf32>
    %406 = tpu.matmul %403, %405, %cst_209 {dimension_numbers = #tpu.dot_dimension_numbers<[1], [0], [0], [1], [0, 0, 1, 1], [], []>} : vector<16x32xf32>, vector<32x128xf32>, vector<16x128xf32> -> vector<16x128xf32>
    %407 = arith.addf %387, %406 : vector<16x128xf32>
    %408 = vector.extract_strided_slice %309 {offsets = [16, 0], sizes = [16, 128], strides = [1, 1]} : vector<32x128xf32> to vector<16x128xf32>
    %409 = vector.extract_strided_slice %316 {offsets = [16, 0], sizes = [16, 128], strides = [1, 1]} : vector<32x128xf32> to vector<16x128xf32>
    %410 = vector.extract_strided_slice %323 {offsets = [16, 0], sizes = [16, 128], strides = [1, 1]} : vector<32x128xf32> to vector<16x128xf32>
    %cst_210 = arith.constant 0.000000e+00 : f32
    %411 = vector.broadcast %cst_210 : f32 to vector<16x128xf32>
    %412 = vector.extract_strided_slice %408 {offsets = [0, 0], sizes = [16, 32], strides = [1, 1]} : vector<16x128xf32> to vector<16x32xf32>
    %413 = vector.extract_strided_slice %409 {offsets = [0, 0], sizes = [16, 32], strides = [1, 1]} : vector<16x128xf32> to vector<16x32xf32>
    %414 = vector.extract_strided_slice %410 {offsets = [0, 0], sizes = [16, 32], strides = [1, 1]} : vector<16x128xf32> to vector<16x32xf32>
    "tpu.trace_start"() <{level = 10 : i32, message = "qd,kd->qk"}> : () -> ()
    %cst_211 = arith.constant dense<0.000000e+00> : vector<16x16xf32>
    %415 = tpu.matmul %412, %413, %cst_211 {dimension_numbers = #tpu.dot_dimension_numbers<[1], [1], [0], [0], [0, 0, 1, 0], [], []>} : vector<16x32xf32>, vector<16x32xf32>, vector<16x16xf32> -> vector<16x16xf32>
    "tpu.trace_stop"() : () -> ()
    %cst_212 = arith.constant 0.176776692 : f32
    %416 = vector.broadcast %cst_212 : f32 to vector<16x16xf32>
    %417 = arith.mulf %415, %416 : vector<16x16xf32>
    %cst_213 = arith.constant dense<0xFF800000> : vector<16xf32>
    %418 = vector.multi_reduction <maximumf>, %417, %cst_213 [1] : vector<16x16xf32> to vector<16xf32>
    %419 = vector.shape_cast %418 : vector<16xf32> to vector<16x1xf32>
    %420 = vector.broadcast %419 : vector<16x1xf32> to vector<16x16xf32>
    %421 = arith.subf %417, %420 : vector<16x16xf32>
    %422 = math.exp %421 : vector<16x16xf32>
    %cst_214 = arith.constant dense<0.000000e+00> : vector<16xf32>
    %423 = vector.multi_reduction <add>, %422, %cst_214 [1] : vector<16x16xf32> to vector<16xf32>
    %424 = vector.shape_cast %423 : vector<16xf32> to vector<16x1xf32>
    %425 = vector.broadcast %424 : vector<16x1xf32> to vector<16x16xf32>
    %426 = arith.divf %422, %425 : vector<16x16xf32>
    %cst_215 = arith.constant dense<0.000000e+00> : vector<16x32xf32>
    %427 = tpu.matmul %426, %414, %cst_215 {dimension_numbers = #tpu.dot_dimension_numbers<[1], [0], [0], [1], [0, 0, 1, 1], [], []>} : vector<16x16xf32>, vector<16x32xf32>, vector<16x32xf32> -> vector<16x32xf32>
    %c1_216 = arith.constant 1 : index
    %c0_217 = arith.constant 0 : index
    %c0_218 = arith.constant 0 : index
    %428 = vector.load %arg13[%c1_216, %c0_217, %c0_218] : memref<2x128x128xf32, #tpu.memory_space<vmem>>, vector<1x32x128xf32>
    %429 = vector.shape_cast %428 : vector<1x32x128xf32> to vector<32x128xf32>
    %cst_219 = arith.constant dense<0.000000e+00> : vector<16x128xf32>
    %430 = tpu.matmul %427, %429, %cst_219 {dimension_numbers = #tpu.dot_dimension_numbers<[1], [0], [0], [1], [0, 0, 1, 1], [], []>} : vector<16x32xf32>, vector<32x128xf32>, vector<16x128xf32> -> vector<16x128xf32>
    %431 = arith.addf %411, %430 : vector<16x128xf32>
    %432 = vector.extract_strided_slice %408 {offsets = [0, 32], sizes = [16, 32], strides = [1, 1]} : vector<16x128xf32> to vector<16x32xf32>
    %433 = vector.extract_strided_slice %409 {offsets = [0, 32], sizes = [16, 32], strides = [1, 1]} : vector<16x128xf32> to vector<16x32xf32>
    %434 = vector.extract_strided_slice %410 {offsets = [0, 32], sizes = [16, 32], strides = [1, 1]} : vector<16x128xf32> to vector<16x32xf32>
    "tpu.trace_start"() <{level = 10 : i32, message = "qd,kd->qk"}> : () -> ()
    %cst_220 = arith.constant dense<0.000000e+00> : vector<16x16xf32>
    %435 = tpu.matmul %432, %433, %cst_220 {dimension_numbers = #tpu.dot_dimension_numbers<[1], [1], [0], [0], [0, 0, 1, 0], [], []>} : vector<16x32xf32>, vector<16x32xf32>, vector<16x16xf32> -> vector<16x16xf32>
    "tpu.trace_stop"() : () -> ()
    %cst_221 = arith.constant 0.176776692 : f32
    %436 = vector.broadcast %cst_221 : f32 to vector<16x16xf32>
    %437 = arith.mulf %435, %436 : vector<16x16xf32>
    %cst_222 = arith.constant dense<0xFF800000> : vector<16xf32>
    %438 = vector.multi_reduction <maximumf>, %437, %cst_222 [1] : vector<16x16xf32> to vector<16xf32>
    %439 = vector.shape_cast %438 : vector<16xf32> to vector<16x1xf32>
    %440 = vector.broadcast %439 : vector<16x1xf32> to vector<16x16xf32>
    %441 = arith.subf %437, %440 : vector<16x16xf32>
    %442 = math.exp %441 : vector<16x16xf32>
    %cst_223 = arith.constant dense<0.000000e+00> : vector<16xf32>
    %443 = vector.multi_reduction <add>, %442, %cst_223 [1] : vector<16x16xf32> to vector<16xf32>
    %444 = vector.shape_cast %443 : vector<16xf32> to vector<16x1xf32>
    %445 = vector.broadcast %444 : vector<16x1xf32> to vector<16x16xf32>
    %446 = arith.divf %442, %445 : vector<16x16xf32>
    %cst_224 = arith.constant dense<0.000000e+00> : vector<16x32xf32>
    %447 = tpu.matmul %446, %434, %cst_224 {dimension_numbers = #tpu.dot_dimension_numbers<[1], [0], [0], [1], [0, 0, 1, 1], [], []>} : vector<16x16xf32>, vector<16x32xf32>, vector<16x32xf32> -> vector<16x32xf32>
    %c1_225 = arith.constant 1 : index
    %c32_226 = arith.constant 32 : index
    %c0_227 = arith.constant 0 : index
    %448 = vector.load %arg13[%c1_225, %c32_226, %c0_227] : memref<2x128x128xf32, #tpu.memory_space<vmem>>, vector<1x32x128xf32>
    %449 = vector.shape_cast %448 : vector<1x32x128xf32> to vector<32x128xf32>
    %cst_228 = arith.constant dense<0.000000e+00> : vector<16x128xf32>
    %450 = tpu.matmul %447, %449, %cst_228 {dimension_numbers = #tpu.dot_dimension_numbers<[1], [0], [0], [1], [0, 0, 1, 1], [], []>} : vector<16x32xf32>, vector<32x128xf32>, vector<16x128xf32> -> vector<16x128xf32>
    %451 = arith.addf %431, %450 : vector<16x128xf32>
    %452 = vector.extract_strided_slice %408 {offsets = [0, 64], sizes = [16, 32], strides = [1, 1]} : vector<16x128xf32> to vector<16x32xf32>
    %453 = vector.extract_strided_slice %409 {offsets = [0, 64], sizes = [16, 32], strides = [1, 1]} : vector<16x128xf32> to vector<16x32xf32>
    %454 = vector.extract_strided_slice %410 {offsets = [0, 64], sizes = [16, 32], strides = [1, 1]} : vector<16x128xf32> to vector<16x32xf32>
    "tpu.trace_start"() <{level = 10 : i32, message = "qd,kd->qk"}> : () -> ()
    %cst_229 = arith.constant dense<0.000000e+00> : vector<16x16xf32>
    %455 = tpu.matmul %452, %453, %cst_229 {dimension_numbers = #tpu.dot_dimension_numbers<[1], [1], [0], [0], [0, 0, 1, 0], [], []>} : vector<16x32xf32>, vector<16x32xf32>, vector<16x16xf32> -> vector<16x16xf32>
    "tpu.trace_stop"() : () -> ()
    %cst_230 = arith.constant 0.176776692 : f32
    %456 = vector.broadcast %cst_230 : f32 to vector<16x16xf32>
    %457 = arith.mulf %455, %456 : vector<16x16xf32>
    %cst_231 = arith.constant dense<0xFF800000> : vector<16xf32>
    %458 = vector.multi_reduction <maximumf>, %457, %cst_231 [1] : vector<16x16xf32> to vector<16xf32>
    %459 = vector.shape_cast %458 : vector<16xf32> to vector<16x1xf32>
    %460 = vector.broadcast %459 : vector<16x1xf32> to vector<16x16xf32>
    %461 = arith.subf %457, %460 : vector<16x16xf32>
    %462 = math.exp %461 : vector<16x16xf32>
    %cst_232 = arith.constant dense<0.000000e+00> : vector<16xf32>
    %463 = vector.multi_reduction <add>, %462, %cst_232 [1] : vector<16x16xf32> to vector<16xf32>
    %464 = vector.shape_cast %463 : vector<16xf32> to vector<16x1xf32>
    %465 = vector.broadcast %464 : vector<16x1xf32> to vector<16x16xf32>
    %466 = arith.divf %462, %465 : vector<16x16xf32>
    %cst_233 = arith.constant dense<0.000000e+00> : vector<16x32xf32>
    %467 = tpu.matmul %466, %454, %cst_233 {dimension_numbers = #tpu.dot_dimension_numbers<[1], [0], [0], [1], [0, 0, 1, 1], [], []>} : vector<16x16xf32>, vector<16x32xf32>, vector<16x32xf32> -> vector<16x32xf32>
    %c1_234 = arith.constant 1 : index
    %c64_235 = arith.constant 64 : index
    %c0_236 = arith.constant 0 : index
    %468 = vector.load %arg13[%c1_234, %c64_235, %c0_236] : memref<2x128x128xf32, #tpu.memory_space<vmem>>, vector<1x32x128xf32>
    %469 = vector.shape_cast %468 : vector<1x32x128xf32> to vector<32x128xf32>
    %cst_237 = arith.constant dense<0.000000e+00> : vector<16x128xf32>
    %470 = tpu.matmul %467, %469, %cst_237 {dimension_numbers = #tpu.dot_dimension_numbers<[1], [0], [0], [1], [0, 0, 1, 1], [], []>} : vector<16x32xf32>, vector<32x128xf32>, vector<16x128xf32> -> vector<16x128xf32>
    %471 = arith.addf %451, %470 : vector<16x128xf32>
    %472 = vector.extract_strided_slice %408 {offsets = [0, 96], sizes = [16, 32], strides = [1, 1]} : vector<16x128xf32> to vector<16x32xf32>
    %473 = vector.extract_strided_slice %409 {offsets = [0, 96], sizes = [16, 32], strides = [1, 1]} : vector<16x128xf32> to vector<16x32xf32>
    %474 = vector.extract_strided_slice %410 {offsets = [0, 96], sizes = [16, 32], strides = [1, 1]} : vector<16x128xf32> to vector<16x32xf32>
    "tpu.trace_start"() <{level = 10 : i32, message = "qd,kd->qk"}> : () -> ()
    %cst_238 = arith.constant dense<0.000000e+00> : vector<16x16xf32>
    %475 = tpu.matmul %472, %473, %cst_238 {dimension_numbers = #tpu.dot_dimension_numbers<[1], [1], [0], [0], [0, 0, 1, 0], [], []>} : vector<16x32xf32>, vector<16x32xf32>, vector<16x16xf32> -> vector<16x16xf32>
    "tpu.trace_stop"() : () -> ()
    %cst_239 = arith.constant 0.176776692 : f32
    %476 = vector.broadcast %cst_239 : f32 to vector<16x16xf32>
    %477 = arith.mulf %475, %476 : vector<16x16xf32>
    %cst_240 = arith.constant dense<0xFF800000> : vector<16xf32>
    %478 = vector.multi_reduction <maximumf>, %477, %cst_240 [1] : vector<16x16xf32> to vector<16xf32>
    %479 = vector.shape_cast %478 : vector<16xf32> to vector<16x1xf32>
    %480 = vector.broadcast %479 : vector<16x1xf32> to vector<16x16xf32>
    %481 = arith.subf %477, %480 : vector<16x16xf32>
    %482 = math.exp %481 : vector<16x16xf32>
    %cst_241 = arith.constant dense<0.000000e+00> : vector<16xf32>
    %483 = vector.multi_reduction <add>, %482, %cst_241 [1] : vector<16x16xf32> to vector<16xf32>
    %484 = vector.shape_cast %483 : vector<16xf32> to vector<16x1xf32>
    %485 = vector.broadcast %484 : vector<16x1xf32> to vector<16x16xf32>
    %486 = arith.divf %482, %485 : vector<16x16xf32>
    %cst_242 = arith.constant dense<0.000000e+00> : vector<16x32xf32>
    %487 = tpu.matmul %486, %474, %cst_242 {dimension_numbers = #tpu.dot_dimension_numbers<[1], [0], [0], [1], [0, 0, 1, 1], [], []>} : vector<16x16xf32>, vector<16x32xf32>, vector<16x32xf32> -> vector<16x32xf32>
    %c1_243 = arith.constant 1 : index
    %c96_244 = arith.constant 96 : index
    %c0_245 = arith.constant 0 : index
    %488 = vector.load %arg13[%c1_243, %c96_244, %c0_245] : memref<2x128x128xf32, #tpu.memory_space<vmem>>, vector<1x32x128xf32>
    %489 = vector.shape_cast %488 : vector<1x32x128xf32> to vector<32x128xf32>
    %cst_246 = arith.constant dense<0.000000e+00> : vector<16x128xf32>
    %490 = tpu.matmul %487, %489, %cst_246 {dimension_numbers = #tpu.dot_dimension_numbers<[1], [0], [0], [1], [0, 0, 1, 1], [], []>} : vector<16x32xf32>, vector<32x128xf32>, vector<16x128xf32> -> vector<16x128xf32>
    %491 = arith.addf %471, %490 : vector<16x128xf32>
    %492 = tpu.concatenate %407, %491 in 0 : vector<16x128xf32>, vector<16x128xf32> -> vector<32x128xf32>
    %c1_247 = arith.constant 1 : index
    %c0_248 = arith.constant 0 : index
    %c0_249 = arith.constant 0 : index
    %493 = vector.load %arg14[%c1_247, %c0_248, %c0_249] : memref<2x1x128xf32, #tpu.memory_space<vmem>>, vector<1x1x128xf32>
    %494 = vector.shape_cast %493 : vector<1x1x128xf32> to vector<1x128xf32>
    %495 = vector.broadcast %494 : vector<1x128xf32> to vector<32x128xf32>
    %496 = arith.addf %492, %495 : vector<32x128xf32>
    %497 = arith.addf %496, %278 : vector<32x128xf32>
    %c1_250 = arith.constant 1 : index
    %c0_251 = arith.constant 0 : index
    %c0_252 = arith.constant 0 : index
    %498 = vector.load %arg15[%c1_250, %c0_251, %c0_252] : memref<2x1x128xf32, #tpu.memory_space<vmem>>, vector<1x1x128xf32>
    %499 = vector.shape_cast %498 : vector<1x1x128xf32> to vector<1x128xf32>
    %c1_253 = arith.constant 1 : index
    %c0_254 = arith.constant 0 : index
    %c0_255 = arith.constant 0 : index
    %500 = vector.load %arg16[%c1_253, %c0_254, %c0_255] : memref<2x1x128xf32, #tpu.memory_space<vmem>>, vector<1x1x128xf32>
    %501 = vector.shape_cast %500 : vector<1x1x128xf32> to vector<1x128xf32>
    %cst_256 = arith.constant dense<0.000000e+00> : vector<32xf32>
    %502 = vector.multi_reduction <add>, %497, %cst_256 [1] : vector<32x128xf32> to vector<32xf32>
    %503 = vector.shape_cast %502 : vector<32xf32> to vector<32x1xf32>
    %cst_257 = arith.constant 1.280000e+02 : f32
    %504 = vector.broadcast %cst_257 : f32 to vector<32x1xf32>
    %505 = arith.divf %503, %504 : vector<32x1xf32>
    %506 = vector.broadcast %505 : vector<32x1xf32> to vector<32x128xf32>
    %507 = arith.subf %497, %506 : vector<32x128xf32>
    %508 = arith.mulf %507, %507 : vector<32x128xf32>
    %cst_258 = arith.constant dense<0.000000e+00> : vector<32xf32>
    %509 = vector.multi_reduction <add>, %508, %cst_258 [1] : vector<32x128xf32> to vector<32xf32>
    %510 = vector.shape_cast %509 : vector<32xf32> to vector<32x1xf32>
    %cst_259 = arith.constant 1.280000e+02 : f32
    %511 = vector.broadcast %cst_259 : f32 to vector<32x1xf32>
    %512 = arith.divf %510, %511 : vector<32x1xf32>
    %cst_260 = arith.constant 9.99999997E-7 : f32
    %513 = vector.broadcast %cst_260 : f32 to vector<32x1xf32>
    %514 = arith.addf %512, %513 : vector<32x1xf32>
    %515 = math.rsqrt %514 : vector<32x1xf32>
    %516 = vector.broadcast %515 : vector<32x1xf32> to vector<32x128xf32>
    %517 = arith.mulf %507, %516 : vector<32x128xf32>
    %518 = vector.broadcast %499 : vector<1x128xf32> to vector<32x128xf32>
    %519 = arith.mulf %517, %518 : vector<32x128xf32>
    %520 = vector.broadcast %501 : vector<1x128xf32> to vector<32x128xf32>
    %521 = arith.addf %519, %520 : vector<32x128xf32>
    %c1_261 = arith.constant 1 : index
    %c0_262 = arith.constant 0 : index
    %c0_263 = arith.constant 0 : index
    %522 = vector.load %arg17[%c1_261, %c0_262, %c0_263] : memref<2x128x256xf32, #tpu.memory_space<vmem>>, vector<1x128x256xf32>
    %523 = vector.shape_cast %522 : vector<1x128x256xf32> to vector<128x256xf32>
    %cst_264 = arith.constant dense<0.000000e+00> : vector<32x256xf32>
    %524 = tpu.matmul %521, %523, %cst_264 {dimension_numbers = #tpu.dot_dimension_numbers<[1], [0], [0], [1], [0, 0, 1, 1], [], []>} : vector<32x128xf32>, vector<128x256xf32>, vector<32x256xf32> -> vector<32x256xf32>
    %c1_265 = arith.constant 1 : index
    %c0_266 = arith.constant 0 : index
    %c0_267 = arith.constant 0 : index
    %525 = vector.load %arg18[%c1_265, %c0_266, %c0_267] : memref<2x1x256xf32, #tpu.memory_space<vmem>>, vector<1x1x256xf32>
    %526 = vector.shape_cast %525 : vector<1x1x256xf32> to vector<1x256xf32>
    %527 = vector.broadcast %526 : vector<1x256xf32> to vector<32x256xf32>
    %528 = arith.addf %524, %527 : vector<32x256xf32>
    %cst_268 = arith.constant 5.000000e-01 : f32
    %529 = vector.broadcast %cst_268 : f32 to vector<32x256xf32>
    %530 = arith.mulf %529, %528 : vector<32x256xf32>
    %cst_269 = arith.constant 4.471500e-02 : f32
    %531 = vector.broadcast %cst_269 : f32 to vector<32x256xf32>
    %532 = arith.mulf %531, %528 : vector<32x256xf32>
    %533 = arith.mulf %532, %528 : vector<32x256xf32>
    %534 = arith.mulf %533, %528 : vector<32x256xf32>
    %535 = arith.addf %528, %534 : vector<32x256xf32>
    %cst_270 = arith.constant 0.797884583 : f32
    %536 = vector.broadcast %cst_270 : f32 to vector<32x256xf32>
    %537 = arith.mulf %536, %535 : vector<32x256xf32>
    %538 = math.tanh %537 : vector<32x256xf32>
    %cst_271 = arith.constant 1.000000e+00 : f32
    %539 = vector.broadcast %cst_271 : f32 to vector<32x256xf32>
    %540 = arith.addf %539, %538 : vector<32x256xf32>
    %541 = arith.mulf %530, %540 : vector<32x256xf32>
    %c1_272 = arith.constant 1 : index
    %c0_273 = arith.constant 0 : index
    %c0_274 = arith.constant 0 : index
    %542 = vector.load %arg19[%c1_272, %c0_273, %c0_274] : memref<2x256x128xf32, #tpu.memory_space<vmem>>, vector<1x256x128xf32>
    %543 = vector.shape_cast %542 : vector<1x256x128xf32> to vector<256x128xf32>
    %cst_275 = arith.constant dense<0.000000e+00> : vector<32x128xf32>
    %544 = tpu.matmul %541, %543, %cst_275 {dimension_numbers = #tpu.dot_dimension_numbers<[1], [0], [0], [1], [0, 0, 1, 1], [], []>} : vector<32x256xf32>, vector<256x128xf32>, vector<32x128xf32> -> vector<32x128xf32>
    %c1_276 = arith.constant 1 : index
    %c0_277 = arith.constant 0 : index
    %c0_278 = arith.constant 0 : index
    %545 = vector.load %arg20[%c1_276, %c0_277, %c0_278] : memref<2x1x128xf32, #tpu.memory_space<vmem>>, vector<1x1x128xf32>
    %546 = vector.shape_cast %545 : vector<1x1x128xf32> to vector<1x128xf32>
    %547 = vector.broadcast %546 : vector<1x128xf32> to vector<32x128xf32>
    %548 = arith.addf %544, %547 : vector<32x128xf32>
    %549 = arith.addf %548, %497 : vector<32x128xf32>
    %c0_279 = arith.constant 0 : index
    %c0_280 = arith.constant 0 : index
    %550 = vector.load %arg21[%c0_279, %c0_280] : memref<1x128xf32, #tpu.memory_space<vmem>>, vector<1x128xf32>
    %c0_281 = arith.constant 0 : index
    %c0_282 = arith.constant 0 : index
    %551 = vector.load %arg22[%c0_281, %c0_282] : memref<1x128xf32, #tpu.memory_space<vmem>>, vector<1x128xf32>
    %cst_283 = arith.constant dense<0.000000e+00> : vector<32xf32>
    %552 = vector.multi_reduction <add>, %549, %cst_283 [1] : vector<32x128xf32> to vector<32xf32>
    %553 = vector.shape_cast %552 : vector<32xf32> to vector<32x1xf32>
    %cst_284 = arith.constant 1.280000e+02 : f32
    %554 = vector.broadcast %cst_284 : f32 to vector<32x1xf32>
    %555 = arith.divf %553, %554 : vector<32x1xf32>
    %556 = vector.broadcast %555 : vector<32x1xf32> to vector<32x128xf32>
    %557 = arith.subf %549, %556 : vector<32x128xf32>
    %558 = arith.mulf %557, %557 : vector<32x128xf32>
    %cst_285 = arith.constant dense<0.000000e+00> : vector<32xf32>
    %559 = vector.multi_reduction <add>, %558, %cst_285 [1] : vector<32x128xf32> to vector<32xf32>
    %560 = vector.shape_cast %559 : vector<32xf32> to vector<32x1xf32>
    %cst_286 = arith.constant 1.280000e+02 : f32
    %561 = vector.broadcast %cst_286 : f32 to vector<32x1xf32>
    %562 = arith.divf %560, %561 : vector<32x1xf32>
    %cst_287 = arith.constant 9.99999997E-7 : f32
    %563 = vector.broadcast %cst_287 : f32 to vector<32x1xf32>
    %564 = arith.addf %562, %563 : vector<32x1xf32>
    %565 = math.rsqrt %564 : vector<32x1xf32>
    %566 = vector.broadcast %565 : vector<32x1xf32> to vector<32x128xf32>
    %567 = arith.mulf %557, %566 : vector<32x128xf32>
    %568 = vector.broadcast %550 : vector<1x128xf32> to vector<32x128xf32>
    %569 = arith.mulf %567, %568 : vector<32x128xf32>
    %570 = vector.broadcast %551 : vector<1x128xf32> to vector<32x128xf32>
    %571 = arith.addf %569, %570 : vector<32x128xf32>
    %c0_288 = arith.constant 0 : index
    %c0_289 = arith.constant 0 : index
    %572 = vector.load %arg23[%c0_288, %c0_289] : memref<32x128xf32, #tpu.memory_space<vmem>>, vector<32x128xf32>
    tpu.vector_store %arg23[%c0_288, %c0_289], %571 {strides = array<i32>} : memref<32x128xf32, #tpu.memory_space<vmem>>, vector<32x128xf32>,
    return
  }
  func.func @transform_0(%arg0: i32) -> (i32, i32) {
    %c0_i32 = arith.constant 0 : i32
    %c0_i32_0 = arith.constant 0 : i32
    %c0_i32_1 = arith.constant 0 : i32
    return %c0_i32, %c0_i32_0 : i32, i32
  }
  func.func @transform_1(%arg0: i32) -> (i32, i32) {
    %c0_i32 = arith.constant 0 : i32
    %c0_i32_0 = arith.constant 0 : i32
    %c0_i32_1 = arith.constant 0 : i32
    return %c0_i32, %c0_i32_0 : i32, i32
  }
  func.func @transform_2(%arg0: i32) -> (i32, i32) {
    %c0_i32 = arith.constant 0 : i32
    %c0_i32_0 = arith.constant 0 : i32
    %c0_i32_1 = arith.constant 0 : i32
    return %c0_i32, %c0_i32_0 : i32, i32
  }
  func.func @transform_3(%arg0: i32) -> (i32, i32) {
    %c0_i32 = arith.constant 0 : i32
    %c0_i32_0 = arith.constant 0 : i32
    %c0_i32_1 = arith.constant 0 : i32
    return %c0_i32, %c0_i32_0 : i32, i32
  }
  func.func @transform_4(%arg0: i32) -> (i32, i32, i32) {
    %c0_i32 = arith.constant 0 : i32
    %c0_i32_0 = arith.constant 0 : i32
    %c0_i32_1 = arith.constant 0 : i32
    %c0_i32_2 = arith.constant 0 : i32
    return %c0_i32, %c0_i32_0, %c0_i32_1 : i32, i32, i32
  }
  func.func @transform_5(%arg0: i32) -> (i32, i32, i32) {
    %c0_i32 = arith.constant 0 : i32
    %c0_i32_0 = arith.constant 0 : i32
    %c0_i32_1 = arith.constant 0 : i32
    %c0_i32_2 = arith.constant 0 : i32
    return %c0_i32, %c0_i32_0, %c0_i32_1 : i32, i32, i32
  }
  func.func @transform_6(%arg0: i32) -> (i32, i32, i32) {
    %c0_i32 = arith.constant 0 : i32
    %c0_i32_0 = arith.constant 0 : i32
    %c0_i32_1 = arith.constant 0 : i32
    %c0_i32_2 = arith.constant 0 : i32
    return %c0_i32, %c0_i32_0, %c0_i32_1 : i32, i32, i32
  }
  func.func @transform_7(%arg0: i32) -> (i32, i32, i32) {
    %c0_i32 = arith.constant 0 : i32
    %c0_i32_0 = arith.constant 0 : i32
    %c0_i32_1 = arith.constant 0 : i32
    %c0_i32_2 = arith.constant 0 : i32
    return %c0_i32, %c0_i32_0, %c0_i32_1 : i32, i32, i32
  }
  func.func @transform_8(%arg0: i32) -> (i32, i32, i32) {
    %c0_i32 = arith.constant 0 : i32
    %c0_i32_0 = arith.constant 0 : i32
    %c0_i32_1 = arith.constant 0 : i32
    %c0_i32_2 = arith.constant 0 : i32
    return %c0_i32, %c0_i32_0, %c0_i32_1 : i32, i32, i32
  }
  func.func @transform_9(%arg0: i32) -> (i32, i32, i32) {
    %c0_i32 = arith.constant 0 : i32
    %c0_i32_0 = arith.constant 0 : i32
    %c0_i32_1 = arith.constant 0 : i32
    %c0_i32_2 = arith.constant 0 : i32
    return %c0_i32, %c0_i32_0, %c0_i32_1 : i32, i32, i32
  }
  func.func @transform_10(%arg0: i32) -> (i32, i32, i32) {
    %c0_i32 = arith.constant 0 : i32
    %c0_i32_0 = arith.constant 0 : i32
    %c0_i32_1 = arith.constant 0 : i32
    %c0_i32_2 = arith.constant 0 : i32
    return %c0_i32, %c0_i32_0, %c0_i32_1 : i32, i32, i32
  }
  func.func @transform_11(%arg0: i32) -> (i32, i32, i32) {
    %c0_i32 = arith.constant 0 : i32
    %c0_i32_0 = arith.constant 0 : i32
    %c0_i32_1 = arith.constant 0 : i32
    %c0_i32_2 = arith.constant 0 : i32
    return %c0_i32, %c0_i32_0, %c0_i32_1 : i32, i32, i32
  }
  func.func @transform_12(%arg0: i32) -> (i32, i32, i32) {
    %c0_i32 = arith.constant 0 : i32
    %c0_i32_0 = arith.constant 0 : i32
    %c0_i32_1 = arith.constant 0 : i32
    %c0_i32_2 = arith.constant 0 : i32
    return %c0_i32, %c0_i32_0, %c0_i32_1 : i32, i32, i32
  }
  func.func @transform_13(%arg0: i32) -> (i32, i32, i32) {
    %c0_i32 = arith.constant 0 : i32
    %c0_i32_0 = arith.constant 0 : i32
    %c0_i32_1 = arith.constant 0 : i32
    %c0_i32_2 = arith.constant 0 : i32
    return %c0_i32, %c0_i32_0, %c0_i32_1 : i32, i32, i32
  }
  func.func @transform_14(%arg0: i32) -> (i32, i32, i32) {
    %c0_i32 = arith.constant 0 : i32
    %c0_i32_0 = arith.constant 0 : i32
    %c0_i32_1 = arith.constant 0 : i32
    %c0_i32_2 = arith.constant 0 : i32
    return %c0_i32, %c0_i32_0, %c0_i32_1 : i32, i32, i32
  }
  func.func @transform_15(%arg0: i32) -> (i32, i32, i32) {
    %c0_i32 = arith.constant 0 : i32
    %c0_i32_0 = arith.constant 0 : i32
    %c0_i32_1 = arith.constant 0 : i32
    %c0_i32_2 = arith.constant 0 : i32
    return %c0_i32, %c0_i32_0, %c0_i32_1 : i32, i32, i32
  }
  func.func @transform_16(%arg0: i32) -> (i32, i32, i32) {
    %c0_i32 = arith.constant 0 : i32
    %c0_i32_0 = arith.constant 0 : i32
    %c0_i32_1 = arith.constant 0 : i32
    %c0_i32_2 = arith.constant 0 : i32
    return %c0_i32, %c0_i32_0, %c0_i32_1 : i32, i32, i32
  }
  func.func @transform_17(%arg0: i32) -> (i32, i32, i32) {
    %c0_i32 = arith.constant 0 : i32
    %c0_i32_0 = arith.constant 0 : i32
    %c0_i32_1 = arith.constant 0 : i32
    %c0_i32_2 = arith.constant 0 : i32
    return %c0_i32, %c0_i32_0, %c0_i32_1 : i32, i32, i32
  }
  func.func @transform_18(%arg0: i32) -> (i32, i32, i32) {
    %c0_i32 = arith.constant 0 : i32
    %c0_i32_0 = arith.constant 0 : i32
    %c0_i32_1 = arith.constant 0 : i32
    %c0_i32_2 = arith.constant 0 : i32
    return %c0_i32, %c0_i32_0, %c0_i32_1 : i32, i32, i32
  }
  func.func @transform_19(%arg0: i32) -> (i32, i32, i32) {
    %c0_i32 = arith.constant 0 : i32
    %c0_i32_0 = arith.constant 0 : i32
    %c0_i32_1 = arith.constant 0 : i32
    %c0_i32_2 = arith.constant 0 : i32
    return %c0_i32, %c0_i32_0, %c0_i32_1 : i32, i32, i32
  }
  func.func @transform_20(%arg0: i32) -> (i32, i32) {
    %c0_i32 = arith.constant 0 : i32
    %c0_i32_0 = arith.constant 0 : i32
    %c0_i32_1 = arith.constant 0 : i32
    return %c0_i32, %c0_i32_0 : i32, i32
  }
  func.func @transform_21(%arg0: i32) -> (i32, i32) {
    %c0_i32 = arith.constant 0 : i32
    %c0_i32_0 = arith.constant 0 : i32
    %c0_i32_1 = arith.constant 0 : i32
    return %c0_i32, %c0_i32_0 : i32, i32
  }
  func.func @transform_22(%arg0: i32) -> (i32, i32) {
    %c0_i32 = arith.constant 0 : i32
    %c0_i32_0 = arith.constant 0 : i32
    %c0_i32_1 = arith.constant 0 : i32
    return %c0_i32, %c0_i32_0 : i32, i32
  }
}

</mosaic_0001>

<bundles_post_ra>
// kernel: tpu_custom_call.1
= control target key start
LH: loop header
LB: loop body
LE: loop exit
PB: predicated region body
PF: predicated region fallthrough
CT: control target
= control target key end

     0   :  { %s6345_s0 = inlined_call_operand.hbm [shape: f32[32,48], index: 0, kind: input, shape index: {}]   ;;  %s6346_s1 = inlined_call_operand.hbm [shape: f32[32,128], index: 1, kind: input, shape index: {}]   ;;  %s6347_s2 = inlined_call_operand.hbm [shape: f32[48,128], index: 2, kind: input, shape index: {}]   ;;  %s6348_s3 = inlined_call_operand.hbm [shape: f32[1,128], index: 3, kind: input, shape index: {}]   ;;  %s6349_s4 = inlined_call_operand.vmem [shape: f32[2,1,128], index: 4, kind: input, shape index: {}]   ;;  %s6350_s5 = inlined_call_operand.hbm [shape: f32[2,1,128], index: 5, kind: input, shape index: {}]   ;;  %s6351_s6 = inlined_call_operand.hbm [shape: f32[2,128,128], index: 6, kind: input, shape index: {}]   ;;  %s6352_s7 = inlined_call_operand.hbm [shape: f32[2,1,128], index: 7, kind: input, shape index: {}]   ;;  %s6353_s8 = inlined_call_operand.hbm [shape: f32[2,128,128], index: 8, kind: input, shape index: {}]   ;;  %s6354_s9 = inlined_call_operand.vmem [shape: f32[2,1,128], index: 9, kind: input, shape index: {}]   ;;  %s6355_s10 = inlined_call_operand.hbm [shape: f32[2,128,128], index: 10, kind: input, shape index: {}]   ;;  %s6356_s11 = inlined_call_operand.vmem [shape: f32[2,1,128], index: 11, kind: input, shape index: {}]   ;;  %s6357_s12 = inlined_call_operand.hbm [shape: f32[2,128,128], index: 12, kind: input, shape index: {}]   ;;  %s6358_s13 = inlined_call_operand.vmem [shape: f32[2,1,128], index: 13, kind: input, shape index: {}]   ;;  %s6359_s14 = inlined_call_operand.hbm [shape: f32[2,1,128], index: 14, kind: input, shape index: {}]   ;;  %s6360_s15 = inlined_call_operand.vmem [shape: f32[2,1,128], index: 15, kind: input, shape index: {}]   ;;  %s6361_s16 = inlined_call_operand.hbm [shape: f32[2,128,256], index: 16, kind: input, shape index: {}]   ;;  %s6362_s17 = inlined_call_operand.vmem [shape: f32[2,1,256], index: 17, kind: input, shape index: {}]   ;;  %s6363_s18 = inlined_call_operand.hbm [shape: f32[2,256,128], index: 18, kind: input, shape index: {}]   ;;  %s6364_s19 = inlined_call_operand.vmem [shape: f32[2,1,128], index: 19, kind: input, shape index: {}]   ;;  %s6365_s20 = inlined_call_operand.vmem [shape: f32[1,128], index: 20, kind: input, shape index: {}]   ;;  %s6366_s21 = inlined_call_operand.vmem [shape: f32[1,128], index: 21, kind: input, shape index: {}]   ;;  %s6367_s22 = inlined_call_operand.hbm [shape: f32[32,128], index: 22, kind: output, shape index: {}]  }
   0x1   :  { %6369 = sst [smem:[#allocation32_spill]] %s6345_s0 }
   0x2   :  { %6370 = sst [smem:[#allocation33_spill]] %s6346_s1 }
   0x3   :  { %6371 = sst [smem:[#allocation34_spill]] %s6347_s2 }
   0x4   :  { %6372 = sst [smem:[#allocation35_spill]] %s6348_s3 }
   0x5   :  { %6373 = sst [smem:[#allocation36_spill]] %s6349_s4 }
   0x6   :  { %6374 = sst [smem:[#allocation37_spill]] %s6350_s5 }
   0x7   :  { %6375 = sst [smem:[#allocation38_spill]] %s6351_s6 }
   0x8   :  { %6376 = sst [smem:[#allocation39_spill]] %s6367_s22 }
   0x9   :  { %27 = vsyncpa [#allocation3], 0 }
   0xa   :  { %28 = vsyncpa [#allocation6], 0 }
   0xb   :  { %29 = vsyncpa [#allocation9], 0 }
   0xc   :  { %30 = vsyncpa [#allocation12], 0 }
   0xd   :  { %31 = vsyncpa [#allocation15], 0 }
   0xe   :  { %32 = vsyncpa [#allocation18], 0 }
   0xf   :  { %33 = vsyncpa [#allocation21], 0 }
  0x10   :  { %34 = vsyncpa [#allocation4], 0  ;;  %s6377_s29 = sld [smem:[#allocation33_spill]]  ;;  %s5015_s4 = smov [#allocation5]  }
  0x11   :  { %s54_s0 = sshll.u32 %s5015_s4, 4  ;;  %s6378_s5 = sld [smem:[#allocation35_spill]]  ;;  %s55_s0 = int_to_ptr.vmem [resolvable:$true] %s54_s0 }
  0x12   :  { %s5016_s6 = smov 128   ;;  %s5017_s25 = smov 8  }
  0x13   :  { %s5018_s26 = smov [#allocation8]   ;;  %s6379_s28 = sld [smem:[#allocation38_spill]] }
  0x14   :  { %s81_s2 = sshll.u32 %s5018_s26, 4  ;;  %s130_s23 = sshll.u32 %s6353_s8, 4  ;;  %s82_s2 = int_to_ptr.vmem [resolvable:$true] %s81_s2  ;;  %s131_s23 = int_to_ptr.hbm [resolvable:$true] %s130_s23 }
  0x15   :  { %s5019_s1 = smov [#allocation11]   ;;  %s160_s3 = sshll.u32 %s6357_s12, 4  ;;  %s161_s3 = int_to_ptr.hbm [resolvable:$true] %s160_s3 }
  0x16   :  { %s52_s30 = sshll.u32 %s6377_s29, 4  ;;  %s5021_s8 = smov [#allocation17]   ;;  %s53_s30 = int_to_ptr.hbm [resolvable:$true] %s52_s30 }
  0x17   :  { %s79_s24 = sshll.u32 %s6378_s5, 4  ;;  %s106_s5 = sshll.u32 %s5019_s1, 4  ;;  %s80_s24 = int_to_ptr.hbm [resolvable:$true] %s79_s24  ;;  %s107_s5 = int_to_ptr.vmem [resolvable:$true] %s106_s5 }
  0x18   :  { %60 = dma.hbm_to_vmem [thread:$0]  %s53_s30, 512, %s55_s0, [#allocation6], %s5016_s6, %s5016_s6, %s5017_s25  }
  0x19   :  { %s104_s29 = sshll.u32 %s6379_s28, 4  ;;  %s5020_s30 = smov [#allocation14]   ;;  %s105_s29 = int_to_ptr.hbm [resolvable:$true] %s104_s29 }
  0x1a   :  { %84 = dma.hbm_to_vmem [thread:$0]  %s80_s24, 16, %s82_s2, [#allocation9]  }
  0x1b   :  { %112 = dma.hbm_to_vmem [thread:$0]  %s105_s29, 4096, %s107_s5, [#allocation12], %s5016_s6, %s5016_s6, %s5017_s25  }
  0x1c   :  { %s132_s0 = sshll.u32 %s5020_s30, 4  ;;  %s162_s22 = sshll.u32 %s5021_s8, 4  ;;  %s133_s0 = int_to_ptr.vmem [resolvable:$true] %s132_s0  ;;  %s163_s22 = int_to_ptr.vmem [resolvable:$true] %s162_s22 }
  0x1d   :  { %138 = dma.hbm_to_vmem [thread:$0]  %s131_s23, 4096, %s133_s0, [#allocation15], %s5016_s6, %s5016_s6, %s5017_s25  }
  0x1e   :  { %s190_s28 = sshll.u32 %s6361_s16, 4  ;;  %s5022_s29 = smov [#allocation20]   ;;  %s191_s28 = int_to_ptr.hbm [resolvable:$true] %s190_s28 }
  0x1f   :  { %168 = dma.hbm_to_vmem [thread:$0]  %s161_s3, 4096, %s163_s22, [#allocation18], %s5016_s6, %s5016_s6, %s5017_s25  }
  0x20   :  { %s192_s12 = sshll.u32 %s5022_s29, 4  ;;  %s6380_s5 = sld [smem:[#allocation32_spill]]  ;;  %s193_s12 = int_to_ptr.vmem [resolvable:$true] %s192_s12 }
  0x21   :  { %s5023_s23 = smov 256   ;;  %s5024_s0 = smov 16  }
  0x22   :  { %198 = dma.hbm_to_vmem [thread:$0]  %s191_s28, 8192, %s193_s12, [#allocation21], %s5023_s23, %s5023_s23, %s5024_s0  }
  0x23   :  { %s6381_s27 = sld [smem:[#allocation34_spill]]  ;;  %s5025_s24 = smov [#allocation2]  }
  0x24   :  { %s41_s2 = sshll.u32 %s5025_s24, 4  ;;  %s5026_s3 = smov [#allocation7]   ;;  %s42_s2 = int_to_ptr.vmem [resolvable:$true] %s41_s2 }
  0x25   :  { %s67_s22 = sshll.u32 %s5026_s3, 4  ;;  %s6382_s1 = sld [smem:[#allocation37_spill]]  ;;  %s68_s22 = int_to_ptr.vmem [resolvable:$true] %s67_s22 }
  0x26   :  { %s39_s30 = sshll.u32 %s6380_s5, 4  ;;  %s5027_s28 = smov [#allocation10]   ;;  %s40_s30 = int_to_ptr.hbm [resolvable:$true] %s39_s30 }
  0x27   :  { %47 = dma.hbm_to_vmem [thread:$0]  %s40_s30, 512, %s42_s2, [#allocation3], %s5016_s6, %s5016_s6, %s5017_s25  }
  0x28   :  { %s93_s12 = sshll.u32 %s5027_s28, 4  ;;  %s117_s16 = sshll.u32 %s6352_s7, 4  ;;  %s94_s12 = int_to_ptr.vmem [resolvable:$true] %s93_s12  ;;  %s118_s16 = int_to_ptr.hbm [resolvable:$true] %s117_s16 }
  0x29   :  { %s65_s8 = sshll.u32 %s6381_s27, 4  ;;  %s5028_s30 = smov 1   ;;  %s66_s8 = int_to_ptr.hbm [resolvable:$true] %s65_s8 }
  0x2a   :  { %73 = dma.hbm_to_vmem [thread:$0]  %s66_s8, 768, %s68_s22, [#allocation6], %s5016_s6, %s5016_s6, %s5017_s25  }
  0x2b   :  { %s91_s5 = sshll.u32 %s6382_s1, 4  ;;  %s145_s2 = sshll.u32 %s6355_s10, 4  ;;  %s92_s5 = int_to_ptr.hbm [resolvable:$true] %s91_s5  ;;  %s146_s2 = int_to_ptr.hbm [resolvable:$true] %s145_s2 }
  0x2c   :  { %99 = dma.hbm_to_vmem [thread:$0]  %s92_s5, 32, %s94_s12, [#allocation9], %s5024_s0, %s5024_s0, %s5028_s30  }
  0x2d   :  { %s5029_s3 = smov [#allocation13]   ;;  %s5030_s8 = smov [#allocation16]  }
  0x2e   :  { %s119_s29 = sshll.u32 %s5029_s3, 4  ;;  %s147_s22 = sshll.u32 %s5030_s8, 4  ;;  %s120_s29 = int_to_ptr.vmem [resolvable:$true] %s119_s29  ;;  %s148_s22 = int_to_ptr.vmem [resolvable:$true] %s147_s22 }
  0x2f   :  { %125 = dma.hbm_to_vmem [thread:$0]  %s118_s16, 32, %s120_s29, [#allocation12], %s5024_s0, %s5024_s0, %s5028_s30  }
  0x30   :  { %s175_s1 = sshll.u32 %s6359_s14, 4  ;;  %s205_s28 = sshll.u32 %s6363_s18, 4  ;;  %s176_s1 = int_to_ptr.hbm [resolvable:$true] %s175_s1  ;;  %s206_s28 = int_to_ptr.hbm [resolvable:$true] %s205_s28 }
  0x31   :  { %153 = dma.hbm_to_vmem [thread:$0]  %s146_s2, 4096, %s148_s22, [#allocation15], %s5016_s6, %s5016_s6, %s5017_s25  }
  0x32   :  { %s5031_s12 = smov [#allocation19]   ;;  %s5032_s26 = smov [#allocation22]  }
  0x33   :  { %s177_s23 = sshll.u32 %s5031_s12, 4  ;;  %s207_s16 = sshll.u32 %s5032_s26, 4  ;;  %s178_s23 = int_to_ptr.vmem [resolvable:$true] %s177_s23  ;;  %s208_s16 = int_to_ptr.vmem [resolvable:$true] %s207_s16 }
  0x34   :  { %183 = dma.hbm_to_vmem [thread:$0]  %s176_s1, 32, %s178_s23, [#allocation18], %s5024_s0, %s5024_s0, %s5028_s30  }
  0x35   :  { %213 = dma.hbm_to_vmem [thread:$0]  %s206_s28, 8192, %s208_s16, [#allocation21], %s5016_s6, %s5016_s6, %s5017_s25  }
  0x36   :  { %4999 = dma.done.wait [#allocation3], 512  }
  0x37   :  { %5000 = vsyncadd [#allocation3], 4294966784 }
  0x38   :  { %5001 = dma.done.wait [#allocation6], 1280  }
  0x39   :  { %5002 = vsyncadd [#allocation6], 4294966016 }
  0x3a   :  { %5003 = dma.done.wait [#allocation9], 48  }
  0x3b   :  { %5004 = vsyncadd [#allocation9], 4294967248 }
  0x3c   :  { %5005 = dma.done.wait [#allocation12], 4128  }
  0x3d   :  { %5006 = vsyncadd [#allocation12], 4294963168 }
  0x3e   :  { %5007 = dma.done.wait [#allocation15], 8192  }
  0x3f   :  { %5008 = vsyncadd [#allocation15], 4294959104 }
  0x40   :  { %5009 = dma.done.wait [#allocation18], 4128  }
  0x41   :  { %5010 = vsyncadd [#allocation18], 4294963168 }
  0x42   :  { %5011 = dma.done.wait [#allocation21], 16384  }
  0x43   :  { %5012 = vsyncadd [#allocation21], 4294950912  ;;  %v281_v0 = vld [vmem:[#allocation7 + $0x28] sm:$0xff]  ;;  %v280_v1 = vld [vmem:[#allocation7 + $0x20] sm:$0xff]  ;;  %vm286_vm0 = vcmask 392192   ;;  %v5033_v27 = vmov 128.0  }
  0x44   :  { %309 = vmatpush.msra.mxu0 %v281_v0  ;;  %v279_v2 = vld [vmem:[#allocation7 + $0x18] sm:$0xff]  ;;  %v278_v3 = vld [vmem:[#allocation7 + $0x10] sm:$0xff]  ;;  %v277_v4 = vld [vmem:[#allocation7 + $0x8] sm:$0xff]  ;;  %4461 = vrcp.f32 %v5033_v27  ;;  %s6383_s0 = sld [smem:[#allocation36_spill]]  ;;  %s5034_s30 = smov 96   ;;  %vm586_vm14 = vcmask 261120  }
  0x45   :  { %v276_v5 = vld [vmem:[#allocation7] sm:$0xff]  ;;  %v273_v7 = vld [vmem:[#allocation2 + $0x8] sm:$0xff]  ;;  %v274_v8 = vld [vmem:[#allocation2 + $0x10] sm:$0xff]  ;;  %s5035_s2 = smov 64   ;;  %vm624_vm15 = vcmask 130048   ;;  %s5036_s8 = smov 32  }
  0x46   :  { %310 = vmatpush.msra.mxu0 %v280_v1  ;;  %v272_v6 = vld [vmem:[#allocation2] sm:$0xff]  ;;  %v275_v9 = vld [vmem:[#allocation2 + $0x18] sm:$0xff]  ;;  %v4440_v10 = vld [vmem:[#allocation8] ss:$0 sm:$0xff]  ;;  %s6388_s7 = sld [smem:[#allocation39_spill]] }
  0x47   :  { %v328_v12 = vld [vmem:[#allocation5] sm:$0xff]  ;;  %v329_v16 = vld [vmem:[#allocation5 + $0x8] sm:$0xff]  ;;  %v330_v20 = vld [vmem:[#allocation5 + $0x10] sm:$0xff] }
  0x48   :  { %311 = vmatpush.msra.mxu0 %v279_v2  ;;  %v331_v24 = vld [vmem:[#allocation5 + $0x18] sm:$0xff]  ;;  %v454_v34 = vld [vmem:[#allocation11 + $0x78] sm:$0xff]  ;;  %v453_v38 = vld [vmem:[#allocation11 + $0x70] sm:$0xff] }
  0x49   :  { %v503_v35 = vld [vmem:[#allocation14 + $0x78] sm:$0xff]  ;;  %459 = vmatpush.msra.mxu1 %v454_v34  ;;  %v502_v39 = vld [vmem:[#allocation14 + $0x70] sm:$0xff]  ;;  %v452_v56 = vld [vmem:[#allocation11 + $0x68] sm:$0xff] }
  0x4a   :  { %312 = vmatpush.msra.mxu0 %v278_v3  ;;  %v4462_v28 = vpop.eup %4461  ;;  %v552_v36 = vld [vmem:[#allocation16 + $0x78] sm:$0xff]  ;;  %508 = vmatpush.msra.mxu2 %v503_v35  ;;  %v551_v40 = vld [vmem:[#allocation16 + $0x70] sm:$0xff]  ;;  %v501_v57 = vld [vmem:[#allocation14 + $0x68] sm:$0xff] }
  0x4b   :  { %v347_v29 = vmul.f32 128.0, %v4462_v28  ;;  %vm351_vm1 = vweird.f32 %v4462_v28  ;;  %557 = vmatpush.msra.mxu3 %v552_v36  ;;  %460 = vmatpush.msra.mxu1 %v453_v38  ;;  %v550_v58 = vld [vmem:[#allocation16 + $0x68] sm:$0xff]  ;;  %v451_v59 = vld [vmem:[#allocation11 + $0x60] sm:$0xff]  ;;  %v450_v62 = vld [vmem:[#allocation11 + $0x58] sm:$0xff] }
  0x4c   :  { %313 = vmatpush.msra.mxu0 %v277_v4  ;;  %509 = vmatpush.msra.mxu2 %v502_v39  ;;  %v500_v60 = vld [vmem:[#allocation14 + $0x60] sm:$0xff]  ;;  %v499_v63 = vld [vmem:[#allocation14 + $0x58] sm:$0xff]  ;;  %v449_v1 = vld [vmem:[#allocation11 + $0x50] sm:$0xff]  ;;  %s4197_s4 = sshll.u32 %s6388_s7, 4  ;;  %s4198_s4 = int_to_ptr.hbm [resolvable:$true] %s4197_s4 }
  0x4d   :  { %v348_v30 = vsub.f32 1.0, %v347_v29  ;;  %558 = vmatpush.msra.mxu3 %v551_v40  ;;  %461 = vmatpush.msra.mxu1 %v452_v56  ;;  %v549_v61 = vld [vmem:[#allocation16 + $0x60] sm:$0xff]  ;;  %v548_v0 = vld [vmem:[#allocation16 + $0x58] sm:$0xff]  ;;  %v498_v2 = vld [vmem:[#allocation14 + $0x50] sm:$0xff] }
  0x4e   :  { %314 = vmatpush.msra.mxu0 %v276_v5  ;;  %510 = vmatpush.msra.mxu2 %v501_v57  ;;  %v547_v3 = vld [vmem:[#allocation16 + $0x50] sm:$0xff]  ;;  %v448_v4 = vld [vmem:[#allocation11 + $0x48] sm:$0xff]  ;;  %v491_v27 = vld [vmem:[#allocation14 + $0x18] sm:$0xff] }
  0x4f   :  { %4216 = vmatmul.msk.f32.vlgmr.msra.gmra.mxu0 %vm286_vm0, %v272_v6  ;;  %v349_v31 = vmul.f32 %v4462_v28, %v348_v30  ;;  %559 = vmatpush.msra.mxu3 %v550_v58  ;;  %v497_v5 = vld [vmem:[#allocation14 + $0x48] sm:$0xff]  ;;  %v490_v30 = vld [vmem:[#allocation14 + $0x10] sm:$0xff]  ;;  %v439_v36 = vld [vmem:[#allocation11] sm:$0xff] }
  0x50   :  { %462 = vmatpush.msra.mxu1 %v451_v59  ;;  %511 = vmatpush.msra.mxu2 %v500_v60  ;;  %v546_v6 = vld [vmem:[#allocation16 + $0x48] sm:$0xff]  ;;  %v537_v38 = vld [vmem:[#allocation16] sm:$0xff] }
  0x51   :  { %v350_v32 = vadd.f32 %v4462_v28, %v349_v31  ;;  %560 = vmatpush.msra.mxu3 %v549_v61  ;;  %v441_v29 = vld [vmem:[#allocation11 + $0x10] sm:$0xff]  ;;  %v4441_v60 = vld [vmem:[%s6383_s0] ss:$0 sm:$0xff] }
  0x52   :  { %463 = vmatpush.msra.mxu1 %v450_v62  ;;  %512 = vmatpush.msra.mxu2 %v499_v63  ;;  %v539_v31 = vld [vmem:[#allocation16 + $0x10] sm:$0xff]  ;;  %v489_v34 = vld [vmem:[#allocation14 + $0x8] sm:$0xff] }
  0x53   :  { %v5235_v33 = vsel %vm351_vm1, %v4462_v28, %v350_v32  ;;  %561 = vmatpush.msra.mxu3 %v548_v0  ;;  %v540_v28 = vld [vmem:[#allocation16 + $0x18] sm:$0xff]  ;;  %v440_v32 = vld [vmem:[#allocation11 + $0x8] sm:$0xff] }
  0x54   :  { %464 = vmatpush.msra.mxu1 %v449_v1  ;;  %513 = vmatpush.msra.mxu2 %v498_v2  ;;  %v538_v35 = vld [vmem:[#allocation16 + $0x8] sm:$0xff]  ;;  %v4442_v0 = vld [vmem:[#allocation10] ss:$0 sm:$0xff] }
  0x55   :  { %562 = vmatpush.msra.mxu3 %v547_v3 }
  0x56   :  { %465 = vmatpush.msra.mxu1 %v448_v4  ;;  %514 = vmatpush.msra.mxu2 %v497_v5 }
  0x57   :  { %4217 = vmatmul.msk.f32.gmra.mxu0 %vm286_vm0, %v273_v7  ;;  %563 = vmatpush.msra.mxu3 %v546_v6  ;;  %v447_v7 = vld [vmem:[#allocation11 + $0x40] sm:$0xff] }
  0x58   :  { %466 = vmatpush.msra.mxu1 %v447_v7 }
  0x5f   :  { %4218 = vmatmul.msk.f32.gmra.mxu0 %vm286_vm0, %v274_v8  ;;  %v496_v8 = vld [vmem:[#allocation14 + $0x40] sm:$0xff] }
  0x60   :  { %515 = vmatpush.msra.mxu2 %v496_v8 }
  0x67   :  { %4219 = vmatmul.msk.f32.gmra.mxu0 %vm286_vm0, %v275_v9  ;;  %v545_v9 = vld [vmem:[#allocation16 + $0x40] sm:$0xff] }
  0x68   :  { %564 = vmatpush.msra.mxu3 %v545_v9 }
  0xcc   :  { %v316_v11 = vpop.f32.mrf.mxu0 }
  0xcd   :  { %v317_v13 = vadd.f32 %v4440_v10, %v316_v11  ;;  %v495_v11 = vld [vmem:[#allocation14 + $0x38] sm:$0xff] }
  0xce   :  { %516 = vmatpush.msra.mxu2 %v495_v11 }
  0xcf   :  { %v5223_v14 = vadd.f32 %v328_v12, %v317_v13  ;;  %v544_v12 = vld [vmem:[#allocation16 + $0x38] sm:$0xff]  ;;  %v445_v13 = vld [vmem:[#allocation11 + $0x30] sm:$0xff] }
  0xd0   :  { %565 = vmatpush.msra.mxu3 %v544_v12 }
  0xd1   :  { %338 = vadd.xlane.f32.xlu0 %v5223_v14 }
  0xd4   :  { %v319_v15 = vpop.f32.mrf.mxu0 }
  0xd5   :  { %v320_v17 = vadd.f32 %v4440_v10, %v319_v15  ;;  %v494_v15 = vld [vmem:[#allocation14 + $0x30] sm:$0xff] }
  0xd6   :  { %517 = vmatpush.msra.mxu2 %v494_v15 }
  0xd7   :  { %v5226_v18 = vadd.f32 %v329_v16, %v320_v17  ;;  %v543_v16 = vld [vmem:[#allocation16 + $0x30] sm:$0xff]  ;;  %v444_v17 = vld [vmem:[#allocation11 + $0x28] sm:$0xff] }
  0xd8   :  { %566 = vmatpush.msra.mxu3 %v543_v16 }
  0xd9   :  { %340 = vadd.xlane.f32.xlu0 %v5226_v18 }
  0xdc   :  { %v322_v19 = vpop.f32.mrf.mxu0 }
  0xdd   :  { %v323_v21 = vadd.f32 %v4440_v10, %v322_v19  ;;  %v493_v19 = vld [vmem:[#allocation14 + $0x28] sm:$0xff] }
  0xde   :  { %518 = vmatpush.msra.mxu2 %v493_v19 }
  0xdf   :  { %v5229_v22 = vadd.f32 %v330_v20, %v323_v21  ;;  %v542_v20 = vld [vmem:[#allocation16 + $0x28] sm:$0xff]  ;;  %v443_v21 = vld [vmem:[#allocation11 + $0x20] sm:$0xff] }
  0xe0   :  { %567 = vmatpush.msra.mxu3 %v542_v20 }
  0xe1   :  { %342 = vadd.xlane.f32.xlu2 %v5229_v22 }
  0xe4   :  { %v325_v23 = vpop.f32.mrf.mxu0 }
  0xe5   :  { %v326_v25 = vadd.f32 %v4440_v10, %v325_v23  ;;  %v446_v10 = vld [vmem:[#allocation11 + $0x38] sm:$0xff]  ;;  %v492_v23 = vld [vmem:[#allocation14 + $0x20] sm:$0xff] }
  0xe6   :  { %467 = vmatpush.msra.mxu1 %v446_v10  ;;  %519 = vmatpush.msra.mxu2 %v492_v23 }
  0xe7   :  { %v5232_v26 = vadd.f32 %v331_v24, %v326_v25  ;;  %v541_v24 = vld [vmem:[#allocation16 + $0x20] sm:$0xff]  ;;  %v442_v25 = vld [vmem:[#allocation11 + $0x18] sm:$0xff] }
  0xe8   :  { %468 = vmatpush.msra.mxu1 %v445_v13  ;;  %568 = vmatpush.msra.mxu3 %v541_v24 }
  0xe9   :  { %344 = vadd.xlane.f32.xlu2 %v5232_v26  ;;  %520 = vmatpush.msra.mxu2 %v491_v27 }
  0xea   :  { %469 = vmatpush.msra.mxu1 %v444_v17  ;;  %569 = vmatpush.msra.mxu3 %v540_v28 }
  0xeb   :  { %521 = vmatpush.msra.mxu2 %v490_v30 }
  0xec   :  { %470 = vmatpush.msra.mxu1 %v443_v21  ;;  %570 = vmatpush.msra.mxu3 %v539_v31 }
  0xed   :  { %522 = vmatpush.msra.mxu2 %v489_v34 }
  0xee   :  { %471 = vmatpush.msra.mxu1 %v442_v25  ;;  %571 = vmatpush.msra.mxu3 %v538_v35 }
  0xf0   :  { %472 = vmatpush.msra.mxu1 %v441_v29  ;;  %572 = vmatpush.msra.mxu3 %v537_v38  ;;  %v5282_v38 = vld [vmem:[%s6354_s9] ss:$0 sm:$0xff] }
  0xf2   :  { %473 = vmatpush.msra.mxu1 %v440_v32 }
  0xf4   :  { %474 = vmatpush.msra.mxu1 %v439_v36 }
 0x144   :  { %v339_v37 = vpop.xlane.xlu0 %338 }
 0x145   :  { %v353_v41 = vmul.f32 %v5235_v33, %v339_v37  ;;  %v488_v37 = vld [vmem:[#allocation14] sm:$0xff] }
 0x146   :  { %523 = vmatpush.msra.mxu2 %v488_v37 }
 0x147   :  { %v5239_v42 = vsub.f32 %v5223_v14, %v353_v41 }
 0x149   :  { %v361_v43 = vmul.f32 %v5239_v42, %v5239_v42 }
 0x14b   :  { %365 = vadd.xlane.f32.xlu1 %v361_v43 }
 0x14c   :  { %v341_v44 = vpop.xlane.xlu0 %340 }
 0x14d   :  { %v354_v45 = vmul.f32 %v5235_v33, %v341_v44 }
 0x14f   :  { %v5245_v46 = vsub.f32 %v5226_v18, %v354_v45 }
 0x151   :  { %v362_v47 = vmul.f32 %v5245_v46, %v5245_v46 }
 0x153   :  { %367 = vadd.xlane.f32.xlu1 %v362_v47 }
 0x154   :  { %v343_v48 = vpop.xlane.xlu2 %342 }
 0x155   :  { %v355_v49 = vmul.f32 %v5235_v33, %v343_v48 }
 0x157   :  { %v5251_v50 = vsub.f32 %v5229_v22, %v355_v49 }
 0x159   :  { %v363_v51 = vmul.f32 %v5251_v50, %v5251_v50 }
 0x15b   :  { %369 = vadd.xlane.f32.xlu0 %v363_v51 }
 0x15c   :  { %v345_v52 = vpop.xlane.xlu2 %344 }
 0x15d   :  { %v356_v53 = vmul.f32 %v5235_v33, %v345_v52 }
 0x15f   :  { %v5257_v54 = vsub.f32 %v5232_v26, %v356_v53 }
 0x161   :  { %v364_v55 = vmul.f32 %v5257_v54, %v5257_v54 }
 0x163   :  { %371 = vadd.xlane.f32.xlu1 %v364_v55 }
 0x1be   :  { %v366_v39 = vpop.xlane.xlu1 %365 }
 0x1bf   :  { %v373_v40 = vmul.f32 %v366_v39, %v5235_v33 }
 0x1c1   :  { %v377_v41 = vadd.f32 1e-06, %v373_v40 }
 0x1c3   :  { %4463 = vrsqrt.f32 %v377_v41  ;;  %vm387_vm3 = vweird.f32 %v377_v41 }
 0x1c6   :  { %v368_v43 = vpop.xlane.xlu1 %367 }
 0x1c7   :  { %v374_v44 = vmul.f32 %v368_v43, %v5235_v33 }
 0x1c9   :  { %v4464_v45 = vpop.eup %4463  ;;  %v378_v47 = vadd.f32 1e-06, %v374_v44 }
 0x1ca   :  { %v382_v48 = vmul.f32 %v4464_v45, %v377_v41  ;;  %vm388_vm2 = vweird.f32 %v4464_v45  ;;  %v5294_v41 = vld [vmem:[%s6356_s11] ss:$0 sm:$0xff] }
 0x1cb   :  { %4465 = vrsqrt.f32 %v378_v47  ;;  %vm389_vm4 = vmor %vm387_vm3, %vm388_vm2  ;;  %vm397_vm6 = vweird.f32 %v378_v47 }
 0x1cc   :  { %v383_v49 = vmul.f32 %v4464_v45, %v382_v48 }
 0x1ce   :  { %v384_v51 = vmul.f32 0.5, %v383_v49  ;;  %v370_v52 = vpop.xlane.xlu0 %369 }
 0x1cf   :  { %v375_v53 = vmul.f32 %v370_v52, %v5235_v33 }
 0x1d0   :  { %v385_v55 = vsub.f32 1.5, %v384_v51 }
 0x1d1   :  { %v4466_v56 = vpop.eup %4465  ;;  %v379_v57 = vadd.f32 1e-06, %v375_v53 }
 0x1d2   :  { %v386_v58 = vmul.f32 %v4464_v45, %v385_v55  ;;  %v392_v59 = vmul.f32 %v4466_v56, %v378_v47  ;;  %vm398_vm5 = vweird.f32 %v4466_v56 }
 0x1d3   :  { %4467 = vrsqrt.f32 %v379_v57  ;;  %vm399_vm7 = vmor %vm397_vm6, %vm398_vm5  ;;  %vm407_vm8 = vweird.f32 %v379_v57 }
 0x1d4   :  { %v393_v61 = vmul.f32 %v4466_v56, %v392_v59  ;;  %v390_v62 = vsel %vm389_vm4, %v4464_v45, %v386_v58 }
 0x1d5   :  { %v421_v63 = vmul.f32 %v390_v62, %v5239_v42 }
 0x1d6   :  { %v394_v1 = vmul.f32 0.5, %v393_v61  ;;  %v372_v2 = vpop.xlane.xlu1 %371 }
 0x1d7   :  { %v376_v3 = vmul.f32 %v372_v2, %v5235_v33  ;;  %v428_v4 = vmul.f32 %v4441_v60, %v421_v63 }
 0x1d8   :  { %v395_v5 = vsub.f32 1.5, %v394_v1 }
 0x1d9   :  { %v4468_v6 = vpop.eup %4467  ;;  %v380_v7 = vadd.f32 1e-06, %v376_v3  ;;  %v435_v8 = vadd.f32 %v4442_v0, %v428_v4 }
 0x1da   :  { %v396_v9 = vmul.f32 %v4466_v56, %v395_v5  ;;  %v402_v10 = vmul.f32 %v4468_v6, %v379_v57  ;;  %vm408_vm9 = vweird.f32 %v4468_v6 }
 0x1db   :  { %4469 = vrsqrt.f32 %v380_v7  ;;  %475 = vmatmul.f32.vlgmr.msra.gmra.mxu1 %v435_v8  ;;  %524 = vmatmul.f32.vlgmr.msra.gmra.mxu2 %v435_v8  ;;  %vm409_vm10 = vmor %vm407_vm8, %vm408_vm9  ;;  %vm417_vm11 = vweird.f32 %v380_v7 }
 0x1dc   :  { %v403_v11 = vmul.f32 %v4468_v6, %v402_v10  ;;  %573 = vmatmul.f32.vlgmr.msra.gmra.mxu3 %v435_v8  ;;  %v400_v42 = vsel %vm399_vm7, %v4466_v56, %v396_v9 }
 0x1dd   :  { %v422_v12 = vmul.f32 %v400_v42, %v5245_v46 }
 0x1de   :  { %v404_v13 = vmul.f32 0.5, %v403_v11 }
 0x1df   :  { %v429_v15 = vmul.f32 %v4441_v60, %v422_v12 }
 0x1e0   :  { %v405_v16 = vsub.f32 1.5, %v404_v13 }
 0x1e1   :  { %v4470_v17 = vpop.eup %4469  ;;  %v436_v19 = vadd.f32 %v4442_v0, %v429_v15 }
 0x1e2   :  { %v406_v20 = vmul.f32 %v4468_v6, %v405_v16  ;;  %v412_v21 = vmul.f32 %v4470_v17, %v380_v7  ;;  %vm418_vm12 = vweird.f32 %v4470_v17 }
 0x1e3   :  { %478 = vmatmul.f32.gmra.mxu1 %v436_v19  ;;  %527 = vmatmul.f32.gmra.mxu2 %v436_v19  ;;  %vm419_vm13 = vmor %vm417_vm11, %vm418_vm12 }
 0x1e4   :  { %v413_v23 = vmul.f32 %v4470_v17, %v412_v21  ;;  %576 = vmatmul.f32.gmra.mxu3 %v436_v19  ;;  %v410_v24 = vsel %vm409_vm10, %v4468_v6, %v406_v20 }
 0x1e5   :  { %v423_v25 = vmul.f32 %v410_v24, %v5251_v50  ;;  %v5272_v50 = vld [vmem:[#allocation13] ss:$0 sm:$0xff] }
 0x1e6   :  { %v414_v27 = vmul.f32 0.5, %v413_v23 }
 0x1e7   :  { %v430_v46 = vmul.f32 %v4441_v60, %v423_v25 }
 0x1e8   :  { %v415_v28 = vsub.f32 1.5, %v414_v27 }
 0x1e9   :  { %v437_v29 = vadd.f32 %v4442_v0, %v430_v46 }
 0x1ea   :  { %v416_v30 = vmul.f32 %v4470_v17, %v415_v28 }
 0x1eb   :  { %481 = vmatmul.f32.gmra.mxu1 %v437_v29  ;;  %530 = vmatmul.f32.gmra.mxu2 %v437_v29 }
 0x1ec   :  { %579 = vmatmul.f32.gmra.mxu3 %v437_v29  ;;  %v420_v31 = vsel %vm419_vm13, %v4470_v17, %v416_v30 }
 0x1ed   :  { %v424_v32 = vmul.f32 %v420_v31, %v5257_v54 }
 0x1ef   :  { %v431_v34 = vmul.f32 %v4441_v60, %v424_v32 }
 0x1f1   :  { %v438_v35 = vadd.f32 %v4442_v0, %v431_v34 }
 0x1f3   :  { %484 = vmatmul.f32.gmra.mxu1 %v438_v35  ;;  %533 = vmatmul.f32.gmra.mxu2 %v438_v35 }
 0x1f4   :  { %582 = vmatmul.f32.gmra.mxu3 %v438_v35 }
 0x258   :  { %v476_v36 = vpop.f32.mrf.mxu1 }
 0x259   :  { %v5275_v37 = vadd.f32 %v5272_v50, %v476_v36 }
 0x25b   :  { %706 = vrot.lane.b32.xlu1 %v5275_v37, %s5034_s30 }
 0x25e   :  { %v525_v54 = vpop.f32.mrf.mxu2 }
 0x25f   :  { %v5285_v39 = vadd.f32 %v5282_v38, %v525_v54  ;;  %v574_v40 = vpop.f32.mrf.mxu3 }
 0x260   :  { %v575_v47 = vadd.f32 %v5294_v41, %v574_v40  ;;  %v479_v51 = vpop.f32.mrf.mxu1 }
 0x261   :  { %710 = vrot.lane.b32.xlu0 %v5285_v39, %s5034_s30  ;;  %v5316_v52 = vadd.f32 %v5272_v50, %v479_v51 }
 0x263   :  { %894 = vrot.lane.b32.xlu1 %v5275_v37, %s5035_s2 }
 0x266   :  { %v528_v43 = vpop.f32.mrf.mxu2 }
 0x267   :  { %v5297_v44 = vadd.f32 %v5282_v38, %v528_v43  ;;  %v577_v45 = vpop.f32.mrf.mxu3 }
 0x268   :  { %v578_v48 = vadd.f32 %v5294_v41, %v577_v45  ;;  %v5336_v62 = vpop.f32.mrf.mxu1 }
 0x269   :  { %900 = vrot.lane.b32.xlu0 %v5297_v44, %s5035_s2  ;;  %712 = vrot.lane.b32.xlu2 %v5297_v44, %s5034_s30 }
 0x26a   :  { %4220 = vmatpush.xpose.msk.msrb.mxu0 %vm586_vm14, %v5297_v44  ;;  %4355 = vmatpush.xpose.msk.msrb.mxu1 %vm586_vm14, %v5297_v44  ;;  %v5309_v49 = vpack.i.bf16 %v575_v47, %v578_v48 }
 0x26e   :  { %4221 = vmatpush.xpose.msk.msrb.mxu0 %vm586_vm14, %v5285_v39  ;;  %4356 = vmatpush.xpose.msk.msrb.mxu1 %vm586_vm14, %v5285_v39 }
 0x270   :  { %v5338_v63 = vpop.f32.mrf.mxu1 }
 0x271   :  { %4222 = vmatmul.msk.f32.vlgmr.msrb.gmra.mxu0 %vm586_vm14, %v5275_v37  ;;  %4223 = vmatmul.msk.f32.vlgmr.msrb.gmra.mxu1 %vm586_vm14, %v5316_v52 }
 0x272   :  { %693 = vmatpush.msra.mxu0 %v578_v48  ;;  %896 = vrot.lane.b32.xlu0 %v5316_v52, %s5035_s2 }
 0x273   :  { %708 = vrot.lane.b32.xlu2 %v5316_v52, %s5034_s30 }
 0x274   :  { %694 = vmatpush.msra.mxu0 %v575_v47 }
 0x27b   :  { %898 = vrot.lane.b32.xlu2 %v5285_v39, %s5035_s2 }
 0x2c3   :  { %v713_v53 = vpop.permute.xlu2 %712 }
 0x2c4   :  { %4226 = vmatpush.xpose.msk.msra.mxu1 %vm586_vm14, %v713_v53 }
 0x2cd   :  { %v709_v56 = vpop.permute.xlu2 %708  ;;  %v707_v57 = vpop.permute.xlu1 %706 }
 0x2d3   :  { %v711_v55 = vpop.permute.xlu0 %710 }
 0x2d4   :  { %4227 = vmatpush.xpose.msk.msra.mxu1 %vm586_vm14, %v711_v55 }
 0x2d5   :  { %v899_v59 = vpop.permute.xlu2 %898  ;;  %v895_v60 = vpop.permute.xlu1 %894 }
 0x2d7   :  { %4228 = vmatmul.msk.f32.vlgmr.msra.gmra.mxu1 %vm586_vm14, %v707_v57 }
 0x2db   :  { %v901_v58 = vpop.permute.xlu0 %900 }
 0x2dc   :  { %4236 = vmatpush.xpose.msk.msrb.mxu1 %vm586_vm14, %v901_v58 }
 0x2df   :  { %4229 = vmatmul.msk.f32.gmra.mxu1 %vm586_vm14, %v709_v56 }
 0x2e0   :  { %4237 = vmatpush.xpose.msk.msrb.mxu1 %vm586_vm14, %v899_v59 }
 0x2e4   :  { %v897_v61 = vpop.permute.xlu0 %896 }
 0x2e7   :  { %4238 = vmatmul.msk.f32.vlgmr.msrb.gmra.mxu1 %vm586_vm14, %v895_v60 }
 0x2ee   :  { %v619_v0 = vpop.f32.mrf.mxu1  ;;  %v616_v36 = vpop.f32.mrf.mxu0 }
 0x2ef   :  { %4239 = vmatmul.msk.f32.gmra.mxu1 %vm586_vm14, %v897_v61  ;;  %v5362_v54 = vmul.f32 0.17677669, %v616_v36  ;;  %v5366_v43 = vmul.f32 0.17677669, %v619_v0 }
 0x2f1   :  { %v625_v40 = vsel %vm624_vm15, %v5362_v54, -inf  ;;  %v628_v45 = vsel %vm624_vm15, %v5366_v43, -inf }
 0x354   :  { %v739_v1 = vpop.f32.mrf.mxu1 }
 0x355   :  { %v745_v2 = vmul.f32 0.17677669, %v739_v1 }
 0x357   :  { %v747_v3 = vsel %vm624_vm15, %v745_v2, -inf }
 0x358   :  { %748 = vmax.xlane.f32.xlu2 %v747_v3 }
 0x35c   :  { %v742_v4 = vpop.f32.mrf.mxu1 }
 0x35d   :  { %v746_v5 = vmul.f32 0.17677669, %v742_v4 }
 0x35f   :  { %v750_v6 = vsel %vm624_vm15, %v746_v5, -inf }
 0x360   :  { %751 = vmax.xlane.f32.xlu1 %v750_v6 }
 0x364   :  { %v927_v7 = vpop.f32.mrf.mxu1 }
 0x365   :  { %v933_v8 = vmul.f32 0.17677669, %v927_v7 }
 0x367   :  { %v935_v9 = vsel %vm624_vm15, %v933_v8, -inf }
 0x368   :  { %936 = vmax.xlane.f32.xlu0 %v935_v9 }
 0x36c   :  { %v930_v10 = vpop.f32.mrf.mxu1 }
 0x36d   :  { %v934_v11 = vmul.f32 0.17677669, %v930_v10 }
 0x36f   :  { %v938_v42 = vsel %vm624_vm15, %v934_v11, -inf }
 0x370   :  { %939 = vmax.xlane.f32.xlu2 %v938_v42 }
 0x3cb   :  { %v749_v12 = vpop.xlane.xlu2 %748 }
 0x3cc   :  { %v753_v13 = vsub.f32 %v745_v2, %v749_v12 }
 0x3ce   :  { %v755_v15 = vmul.f32 1.442695, %v753_v13 }
 0x3d0   :  { %4471 = vpow2.f32 %v755_v15 }
 0x3d3   :  { %v752_v16 = vpop.xlane.xlu1 %751 }
 0x3d4   :  { %v754_v17 = vsub.f32 %v746_v5, %v752_v16 }
 0x3d6   :  { %v5344_v19 = vpop.eup %4471  ;;  %v757_v20 = vmul.f32 1.442695, %v754_v17 }
 0x3d7   :  { %v759_v21 = vsel %vm624_vm15, %v5344_v19, 0.0 }
 0x3d8   :  { %4473 = vpow2.f32 %v757_v20  ;;  %760 = vadd.xlane.f32.xlu1 %v759_v21 }
 0x3db   :  { %v937_v23 = vpop.xlane.xlu0 %936 }
 0x3dc   :  { %v941_v24 = vsub.f32 %v933_v8, %v937_v23 }
 0x3de   :  { %v5348_v25 = vpop.eup %4473  ;;  %v943_v27 = vmul.f32 1.442695, %v941_v24 }
 0x3df   :  { %v762_v46 = vsel %vm624_vm15, %v5348_v25, 0.0 }
 0x3e0   :  { %4475 = vpow2.f32 %v943_v27  ;;  %763 = vadd.xlane.f32.xlu0 %v762_v46 }
 0x3e3   :  { %v940_v28 = vpop.xlane.xlu2 %939 }
 0x3e4   :  { %v942_v29 = vsub.f32 %v934_v11, %v940_v28 }
 0x3e6   :  { %v5352_v30 = vpop.eup %4475  ;;  %v945_v31 = vmul.f32 1.442695, %v942_v29 }
 0x3e7   :  { %v947_v32 = vsel %vm624_vm15, %v5352_v30, 0.0 }
 0x3e8   :  { %4477 = vpow2.f32 %v945_v31  ;;  %948 = vadd.xlane.f32.xlu2 %v947_v32 }
 0x3ee   :  { %v5356_v34 = vpop.eup %4477 }
 0x3ef   :  { %v950_v35 = vsel %vm624_vm15, %v5356_v34, 0.0 }
 0x3f0   :  { %951 = vadd.xlane.f32.xlu0 %v950_v35 }
 0x3f1   :  { %4381 = vrot.lane.b32.xlu1 %v5309_v49, %s5034_s30 }
 0x3f8   :  { %626 = vmax.xlane.f32.xlu0 %v625_v40 }
 0x400   :  { %629 = vmax.xlane.f32.xlu0 %v628_v45  ;;  %4386 = vrot.lane.b32.xlu2 %v5309_v49, %s5035_s2 }
 0x408   :  { %1059 = vrot.lane.b32.xlu2 %v5297_v44, %s5036_s8 }
 0x410   :  { %1053 = vrot.lane.b32.xlu2 %v5275_v37, %s5036_s8 }
 0x418   :  { %1055 = vrot.lane.b32.xlu2 %v5316_v52, %s5036_s8 }
 0x44b   :  { %v761_v47 = vpop.xlane.xlu1 %760 }
 0x44c   :  { %4479 = vrcp.f32 %v761_v47  ;;  %v776_v61 = vand.u32 2147483648, %v761_v47  ;;  %vm770_vm1 = vweird.f32 %v761_v47  ;;  %v774_v37 = vand.u32 2147483647, %v761_v47 }
 0x44e   :  { %v777_v2 = vor.u32 1.1754944e-38, %v776_v61  ;;  %vm775_vm3 = vcmp.eq.f32.partialorder %v774_v37, 8.507059e+37  ;;  %v5405_v37 = vld [vmem:[#allocation17 + $0x20] sm:$0xff] }
 0x452   :  { %v4480_v48 = vpop.eup %4479 }
 0x453   :  { %v766_v51 = vmul.f32 %v4480_v48, %v761_v47  ;;  %v764_v53 = vpop.xlane.xlu0 %763  ;;  %vm771_vm0 = vweird.f32 %v4480_v48 }
 0x454   :  { %4481 = vrcp.f32 %v764_v53  ;;  %vm772_vm2 = vmor %vm770_vm1, %vm771_vm0  ;;  %v791_v42 = vand.u32 2147483648, %v764_v53  ;;  %vm785_vm5 = vweird.f32 %v764_v53  ;;  %v789_v13 = vand.u32 2147483647, %v764_v53 }
 0x455   :  { %v767_v55 = vsub.f32 1.0, %v766_v51 }
 0x456   :  { %v792_v21 = vor.u32 1.1754944e-38, %v791_v42  ;;  %vm790_vm7 = vcmp.eq.f32.partialorder %v789_v13, 8.507059e+37 }
 0x457   :  { %v768_v56 = vmul.f32 %v4480_v48, %v767_v55  ;;  %v5388_v55 = vld [vmem:[#allocation17 + $0x38] sm:$0xff] }
 0x458   :  { %854 = vmatpush.msrb.mxu3 %v5388_v55 }
 0x459   :  { %v769_v60 = vadd.f32 %v4480_v48, %v768_v56  ;;  %v5390_v56 = vld [vmem:[#allocation17 + $0x30] sm:$0xff] }
 0x45a   :  { %v4482_v57 = vpop.eup %4481  ;;  %855 = vmatpush.msrb.mxu3 %v5390_v56 }
 0x45b   :  { %v781_v58 = vmul.f32 %v4482_v57, %v764_v53  ;;  %v949_v59 = vpop.xlane.xlu2 %948  ;;  %v773_v52 = vsel %vm772_vm2, %v4480_v48, %v769_v60  ;;  %vm786_vm4 = vweird.f32 %v4482_v57 }
 0x45c   :  { %4483 = vrcp.f32 %v949_v59  ;;  %v778_v7 = vsel %vm775_vm3, %v777_v2, %v773_v52  ;;  %vm787_vm6 = vmor %vm785_vm5, %vm786_vm4  ;;  %v964_v29 = vand.u32 2147483648, %v949_v59  ;;  %vm958_vm9 = vweird.f32 %v949_v59  ;;  %v5408_v52 = vld [vmem:[#allocation17 + $0x58] sm:$0xff] }
 0x45d   :  { %v782_v44 = vsub.f32 1.0, %v781_v58  ;;  %v779_v12 = vmul.f32 %v5344_v19, %v778_v7  ;;  %v962_v32 = vand.u32 2147483647, %v949_v59  ;;  %v531_v7 = vpop.f32.mrf.mxu2 }
 0x45e   :  { %v965_v47 = vor.u32 1.1754944e-38, %v964_v29  ;;  %v5448_v13 = vadd.f32 %v5282_v38, %v531_v7 }
 0x45f   :  { %v783_v0 = vmul.f32 %v4482_v57, %v782_v44  ;;  %vm963_vm11 = vcmp.eq.f32.partialorder %v962_v32, 8.507059e+37 }
 0x461   :  { %v784_v10 = vadd.f32 %v4482_v57, %v783_v0 }
 0x462   :  { %v4484_v1 = vpop.eup %4483 }
 0x463   :  { %v954_v3 = vmul.f32 %v4484_v1, %v949_v59  ;;  %v4382_v4 = vpop.permute.xlu1 %4381  ;;  %v5378_v5 = vpop.xlane.xlu0 %951  ;;  %v788_v17 = vsel %vm787_vm6, %v4482_v57, %v784_v10  ;;  %vm959_vm8 = vweird.f32 %v4484_v1  ;;  %v5438_v10 = vld [vmem:[#allocation17] sm:$0xff] }
 0x464   :  { %v4383_v6 = vunpack.i.l.bf16 %v4382_v4  ;;  %v4387_v9 = vpop.permute.xlu2 %4386  ;;  %4485 = vrcp.f32 %v5378_v5  ;;  %v4384_v11 = vunpack.i.h.bf16 %v4382_v4  ;;  %v793_v46 = vsel %vm790_vm7, %v792_v21, %v788_v17  ;;  %vm960_vm10 = vmor %vm958_vm9, %vm959_vm8  ;;  %v5418_v4 = vld [vmem:[#allocation17 + $0x48] sm:$0xff] }
 0x465   :  { %v955_v8 = vsub.f32 1.0, %v954_v3  ;;  %v4388_v15 = vunpack.i.l.bf16 %v4387_v9  ;;  %v4389_v20 = vunpack.i.h.bf16 %v4387_v9  ;;  %v794_v36 = vmul.f32 %v5348_v25, %v793_v46  ;;  %v5435_v9 = vld [vmem:[#allocation17 + $0x8] sm:$0xff] }
 0x466   :  { %823 = vmatpush.msrb.mxu2 %v4383_v6  ;;  %v979_v25 = vand.u32 2147483648, %v5378_v5  ;;  %vm973_vm13 = vweird.f32 %v5378_v5  ;;  %v977_v60 = vand.u32 2147483647, %v5378_v5  ;;  %v5426_v6 = vld [vmem:[#allocation17 + $0x40] sm:$0xff] }
 0x467   :  { %v956_v16 = vmul.f32 %v4484_v1, %v955_v8  ;;  %v5432_v8 = vld [vmem:[#allocation17 + $0x10] sm:$0xff] }
 0x468   :  { %824 = vmatpush.msrb.mxu2 %v4384_v11  ;;  %vm978_vm1 = vcmp.eq.f32.partialorder %v977_v60, 8.507059e+37 }
 0x469   :  { %4230 = vmatmul.msk.f32.vlgmr.msrb.gmra.mxu2 %vm624_vm15, %v779_v12  ;;  %v957_v19 = vadd.f32 %v4484_v1, %v956_v16 }
 0x46a   :  { %1009 = vmatpush.msra.mxu2 %v4388_v15  ;;  %v4486_v23 = vpop.eup %4485 }
 0x46b   :  { %v969_v24 = vmul.f32 %v4486_v23, %v5378_v5  ;;  %v627_v27 = vpop.xlane.xlu0 %626  ;;  %v961_v40 = vsel %vm960_vm10, %v4484_v1, %v957_v19  ;;  %vm974_vm12 = vweird.f32 %v4486_v23  ;;  %v5411_v1 = vld [vmem:[#allocation17 + $0x50] sm:$0xff] }
 0x46c   :  { %1010 = vmatpush.msra.mxu2 %v4389_v20  ;;  %v631_v28 = vsub.f32 %v5362_v54, %v627_v27  ;;  %v966_v48 = vsel %vm963_vm11, %v965_v47, %v961_v40  ;;  %vm975_vm0 = vmor %vm973_vm13, %vm974_vm12 }
 0x46d   :  { %v970_v31 = vsub.f32 1.0, %v969_v24  ;;  %v967_v59 = vmul.f32 %v5352_v30, %v966_v48  ;;  %v980_v30 = vor.u32 1.1754944e-38, %v979_v25 }
 0x46e   :  { %v633_v35 = vmul.f32 1.442695, %v631_v28 }
 0x46f   :  { %v971_v45 = vmul.f32 %v4486_v23, %v970_v31 }
 0x470   :  { %4487 = vpow2.f32 %v633_v35 }
 0x471   :  { %4231 = vmatmul.msk.f32.gmra.mxu2 %vm624_vm15, %v794_v36  ;;  %v972_v54 = vadd.f32 %v4486_v23, %v971_v45  ;;  %v1060_v45 = vpop.permute.xlu2 %1059 }
 0x473   :  { %v630_v51 = vpop.xlane.xlu0 %629  ;;  %v976_v61 = vsel %vm975_vm0, %v4486_v23, %v972_v54 }
 0x474   :  { %v632_v53 = vsub.f32 %v5366_v43, %v630_v51  ;;  %v5399_v43 = vld [vmem:[#allocation17 + $0x28] sm:$0xff]  ;;  %v981_v0 = vsel %vm978_vm1, %v980_v30, %v976_v61 }
 0x475   :  { %856 = vmatpush.msrb.mxu3 %v5399_v43  ;;  %v982_v3 = vmul.f32 %v5356_v34, %v981_v0  ;;  %v5429_v34 = vld [vmem:[#allocation17 + $0x18] sm:$0xff] }
 0x476   :  { %v5394_v57 = vpop.eup %4487  ;;  %v635_v58 = vmul.f32 1.442695, %v632_v53  ;;  %883 = vmatpush.msrb.mxu0 %v5429_v34 }
 0x477   :  { %v637_v44 = vsel %vm624_vm15, %v5394_v57, 0.0  ;;  %857 = vmatpush.msrb.mxu3 %v5405_v37 }
 0x478   :  { %4489 = vpow2.f32 %v635_v58  ;;  %638 = vadd.xlane.f32.xlu1 %v637_v44  ;;  %884 = vmatpush.msrb.mxu0 %v5432_v8 }
 0x479   :  { %4240 = vmatmul.msk.f32.vlgmr.msra.gmra.mxu2 %vm624_vm15, %v967_v59  ;;  %1040 = vmatpush.msra.mxu3 %v5408_v52  ;;  %v5476_v59 = vadd.f32 %v5272_v50, %v5338_v63  ;;  %v1054_v0 = vpop.permute.xlu2 %1053 }
 0x47a   :  { %885 = vmatpush.msrb.mxu0 %v5435_v9 }
 0x47b   :  { %1041 = vmatpush.msra.mxu3 %v5411_v1 }
 0x47c   :  { %886 = vmatpush.msrb.mxu0 %v5438_v10 }
 0x47d   :  { %1042 = vmatpush.msra.mxu3 %v5418_v4 }
 0x47e   :  { %v5414_v2 = vpop.eup %4489 }
 0x47f   :  { %v640_v5 = vsel %vm624_vm15, %v5414_v2, 0.0  ;;  %1043 = vmatpush.msra.mxu3 %v5426_v6 }
 0x480   :  { %641 = vadd.xlane.f32.xlu0 %v640_v5 }
 0x481   :  { %4241 = vmatmul.msk.f32.gmra.mxu2 %vm624_vm15, %v982_v3  ;;  %v1056_v3 = vpop.permute.xlu2 %1055 }
 0x494   :  { %1057 = vrot.lane.b32.xlu0 %v5285_v39, %s5036_s8  ;;  %v534_v39 = vpop.f32.mrf.mxu2 }
 0x495   :  { %v5442_v11 = vadd.f32 %v5282_v38, %v534_v39 }
 0x4eb   :  { %v639_v42 = vpop.xlane.xlu1 %638 }
 0x4ec   :  { %v826_v12 = vpop.f32.mrf.mxu2  ;;  %4491 = vrcp.f32 %v639_v42  ;;  %v654_v23 = vand.u32 2147483648, %v639_v42  ;;  %v652_v27 = vand.u32 2147483647, %v639_v42  ;;  %vm648_vm3 = vweird.f32 %v639_v42 }
 0x4ed   :  { %4232 = vmatmul.msk.f32.vlgmr.msrb.gmra.mxu3 %vm586_vm14, %v826_v12 }
 0x4ee   :  { %4252 = vmatpush.xpose.msk.msrb.mxu3 %vm586_vm14, %v5442_v11  ;;  %v655_v38 = vor.u32 1.1754944e-38, %v654_v23  ;;  %vm653_vm5 = vcmp.eq.f32.partialorder %v652_v27, 8.507059e+37 }
 0x4f2   :  { %4253 = vmatpush.xpose.msk.msrb.mxu3 %vm586_vm14, %v5448_v13  ;;  %v4492_v15 = vpop.eup %4491 }
 0x4f3   :  { %v644_v16 = vmul.f32 %v4492_v15, %v639_v42  ;;  %v642_v17 = vpop.xlane.xlu0 %641  ;;  %vm649_vm2 = vweird.f32 %v4492_v15 }
 0x4f4   :  { %v829_v20 = vpop.f32.mrf.mxu2  ;;  %4493 = vrcp.f32 %v642_v17  ;;  %vm650_vm4 = vmor %vm648_vm3, %vm649_vm2  ;;  %v669_v40 = vand.u32 2147483648, %v642_v17  ;;  %v667_v48 = vand.u32 2147483647, %v642_v17  ;;  %vm663_vm7 = vweird.f32 %v642_v17 }
 0x4f5   :  { %4233 = vmatmul.msk.f32.gmra.mxu3 %vm586_vm14, %v829_v20  ;;  %v645_v21 = vsub.f32 1.0, %v644_v16 }
 0x4f6   :  { %v670_v53 = vor.u32 1.1754944e-38, %v669_v40  ;;  %vm668_vm9 = vcmp.eq.f32.partialorder %v667_v48, 8.507059e+37 }
 0x4f7   :  { %v646_v24 = vmul.f32 %v4492_v15, %v645_v21 }
 0x4f9   :  { %v647_v46 = vadd.f32 %v4492_v15, %v646_v24 }
 0x4fa   :  { %v4494_v19 = vpop.eup %4493 }
 0x4fb   :  { %v651_v28 = vsel %vm650_vm4, %v4492_v15, %v647_v46  ;;  %v659_v29 = vmul.f32 %v4494_v19, %v642_v17  ;;  %vm664_vm6 = vweird.f32 %v4494_v19 }
 0x4fc   :  { %v1012_v31 = vpop.f32.mrf.mxu2  ;;  %v656_v32 = vsel %vm653_vm5, %v655_v38, %v651_v28  ;;  %vm665_vm8 = vmor %vm663_vm7, %vm664_vm6 }
 0x4fd   :  { %4242 = vmatmul.msk.f32.vlgmr.msra.gmra.mxu3 %vm586_vm14, %v1012_v31  ;;  %v660_v35 = vsub.f32 1.0, %v659_v29  ;;  %v657_v36 = vmul.f32 %v5394_v57, %v656_v32 }
 0x4fe   :  { %1478 = vmatpush.msra.mxu3 %v5388_v55 }
 0x4ff   :  { %v661_v47 = vmul.f32 %v4494_v19, %v660_v35  ;;  %4224 = vmatmul.msk.f32.vlgmr.msra.gmra.mxu0 %vm624_vm15, %v657_v36 }
 0x500   :  { %1479 = vmatpush.msra.mxu3 %v5390_v56  ;;  %4244 = vmatpush.xpose.msk.msra.mxu0 %vm586_vm14, %v1060_v45  ;;  %v5467_v56 = vadd.f32 %v5272_v50, %v5336_v62  ;;  %v580_v62 = vpop.f32.mrf.mxu3 }
 0x501   :  { %v662_v51 = vadd.f32 %v4494_v19, %v661_v47  ;;  %v5490_v50 = vadd.f32 %v5294_v41, %v580_v62 }
 0x502   :  { %1480 = vmatpush.msra.mxu3 %v5399_v43 }
 0x503   :  { %v666_v25 = vsel %vm665_vm8, %v4494_v19, %v662_v51 }
 0x504   :  { %v1015_v54 = vpop.f32.mrf.mxu2  ;;  %1481 = vmatpush.msra.mxu3 %v5405_v37  ;;  %v671_v55 = vsel %vm668_vm9, %v670_v53, %v666_v25 }
 0x505   :  { %4243 = vmatmul.msk.f32.gmra.mxu3 %vm586_vm14, %v1015_v54  ;;  %v672_v57 = vmul.f32 %v5414_v2, %v671_v55 }
 0x506   :  { %v1058_v58 = vpop.permute.xlu0 %1057 }
 0x507   :  { %4225 = vmatmul.msk.f32.gmra.mxu0 %vm624_vm15, %v672_v57 }
 0x508   :  { %4245 = vmatpush.xpose.msk.msra.mxu0 %vm586_vm14, %v1058_v58  ;;  %v583_v60 = vpop.f32.mrf.mxu3 }
 0x509   :  { %v5486_v61 = vadd.f32 %v5294_v41, %v583_v60 }
 0x50d   :  { %4254 = vmatmul.msk.f32.vlgmr.msrb.gmra.mxu3 %vm586_vm14, %v5467_v56 }
 0x50e   :  { %1664 = vmatpush.msrb.mxu3 %v5408_v52 }
 0x510   :  { %1665 = vmatpush.msrb.mxu3 %v5411_v1 }
 0x512   :  { %1666 = vmatpush.msrb.mxu3 %v5418_v4 }
 0x514   :  { %1667 = vmatpush.msrb.mxu3 %v5426_v6 }
 0x515   :  { %4255 = vmatmul.msk.f32.gmra.mxu3 %vm586_vm14, %v5476_v59 }
 0x570   :  { %v5481_v43 = vpop.f32.mrf.mxu3 }
 0x578   :  { %v5483_v44 = vpop.f32.mrf.mxu3 }
 0x57c   :  { %v696_v37 = vpop.f32.mrf.mxu0 }
 0x57d   :  { %4234 = vmatmul.msk.f32.vlgmr.msrb.gmra.mxu0 %vm586_vm14, %v696_v37 }
 0x57e   :  { %1317 = vmatpush.msrb.mxu0 %v5486_v61 }
 0x580   :  { %v5493_v63 = vpop.f32.mrf.mxu3  ;;  %1318 = vmatpush.msrb.mxu0 %v5490_v50 }
 0x584   :  { %v699_v30 = vpop.f32.mrf.mxu0 }
 0x585   :  { %4235 = vmatmul.msk.f32.gmra.mxu0 %vm586_vm14, %v699_v30 }
 0x588   :  { %v5497_v52 = vpop.f32.mrf.mxu3 }
 0x58d   :  { %4246 = vmatmul.msk.f32.vlgmr.msra.gmra.mxu0 %vm586_vm14, %v1054_v0 }
 0x58e   :  { %1507 = vmatpush.msra.mxu0 %v5429_v34 }
 0x590   :  { %v1241_v1 = vpop.f32.mrf.mxu3  ;;  %1508 = vmatpush.msra.mxu0 %v5432_v8 }
 0x591   :  { %v1247_v2 = vmul.f32 0.17677669, %v1241_v1 }
 0x592   :  { %1509 = vmatpush.msra.mxu0 %v5435_v9 }
 0x593   :  { %v1249_v41 = vsel %vm624_vm15, %v1247_v2, -inf }
 0x594   :  { %1250 = vmax.xlane.f32.xlu2 %v1249_v41  ;;  %1510 = vmatpush.msra.mxu0 %v5438_v10 }
 0x595   :  { %4247 = vmatmul.msk.f32.gmra.mxu0 %vm586_vm14, %v1056_v3 }
 0x598   :  { %v1244_v4 = vpop.f32.mrf.mxu3 }
 0x599   :  { %v1248_v5 = vmul.f32 0.17677669, %v1244_v4 }
 0x59b   :  { %v1252_v6 = vsel %vm624_vm15, %v1248_v5, -inf }
 0x59c   :  { %1253 = vmax.xlane.f32.xlu0 %v1252_v6 }
 0x5fa   :  { %v5507_v34 = vpop.f32.mrf.mxu0 }
 0x602   :  { %v5509_v12 = vpop.f32.mrf.mxu0 }
 0x607   :  { %v1251_v7 = vpop.xlane.xlu2 %1250 }
 0x608   :  { %v1255_v39 = vsub.f32 %v1247_v2, %v1251_v7 }
 0x60a   :  { %v1257_v8 = vmul.f32 1.442695, %v1255_v39  ;;  %v1086_v20 = vpop.f32.mrf.mxu0 }
 0x60b   :  { %v1092_v23 = vmul.f32 0.17677669, %v1086_v20 }
 0x60c   :  { %4495 = vpow2.f32 %v1257_v8 }
 0x60d   :  { %v1094_v24 = vsel %vm624_vm15, %v1092_v23, -inf }
 0x60f   :  { %v1254_v42 = vpop.xlane.xlu0 %1253 }
 0x610   :  { %v1256_v9 = vsub.f32 %v1248_v5, %v1254_v42 }
 0x612   :  { %v4496_v15 = vpop.eup %4495  ;;  %v1259_v16 = vmul.f32 1.442695, %v1256_v9  ;;  %v1089_v27 = vpop.f32.mrf.mxu0 }
 0x613   :  { %v1261_v10 = vsel %vm624_vm15, %v4496_v15, 0.0  ;;  %v1093_v46 = vmul.f32 0.17677669, %v1089_v27 }
 0x614   :  { %4497 = vpow2.f32 %v1259_v16  ;;  %1262 = vadd.xlane.f32.xlu1 %v1261_v10 }
 0x615   :  { %v1097_v19 = vsel %vm624_vm15, %v1093_v46, -inf }
 0x61a   :  { %v4498_v17 = vpop.eup %4497 }
 0x61b   :  { %v1264_v21 = vsel %vm624_vm15, %v4498_v17, 0.0 }
 0x61c   :  { %1265 = vadd.xlane.f32.xlu1 %v1264_v21 }
 0x624   :  { %1095 = vmax.xlane.f32.xlu1 %v1094_v24 }
 0x62c   :  { %1098 = vmax.xlane.f32.xlu1 %v1097_v19 }
 0x645   :  { %4391 = vrot.lane.b32.xlu1 %v5309_v49, %s5036_s8 }
 0x64d   :  { %1330 = vrot.lane.b32.xlu1 %v5467_v56, %s5034_s30 }
 0x655   :  { %1522 = vrot.lane.b32.xlu1 %v5448_v13, %s5035_s2 }
 0x65d   :  { %1681 = vrot.lane.b32.xlu1 %v5448_v13, %s5036_s8 }
 0x665   :  { %1679 = vrot.lane.b32.xlu1 %v5476_v59, %s5036_s8 }
 0x687   :  { %v1263_v38 = vpop.xlane.xlu1 %1262 }
 0x688   :  { %4499 = vrcp.f32 %v1263_v38  ;;  %v1278_v49 = vand.u32 2147483648, %v1263_v38  ;;  %v1276_v36 = vand.u32 2147483647, %v1263_v38  ;;  %vm1272_vm11 = vweird.f32 %v1263_v38 }
 0x68a   :  { %v1279_v47 = vor.u32 1.1754944e-38, %v1278_v49  ;;  %vm1277_vm13 = vcmp.eq.f32.partialorder %v1276_v36, 8.507059e+37 }
 0x68e   :  { %v4500_v28 = vpop.eup %4499 }
 0x68f   :  { %v1268_v29 = vmul.f32 %v4500_v28, %v1263_v38  ;;  %v1266_v31 = vpop.xlane.xlu1 %1265  ;;  %vm1273_vm10 = vweird.f32 %v4500_v28 }
 0x690   :  { %4501 = vrcp.f32 %v1266_v31  ;;  %vm1274_vm12 = vmor %vm1272_vm11, %vm1273_vm10  ;;  %v1293_v58 = vand.u32 2147483648, %v1266_v31  ;;  %v1291_v37 = vand.u32 2147483647, %v1266_v31  ;;  %vm1287_vm1 = vweird.f32 %v1266_v31 }
 0x691   :  { %v1269_v32 = vsub.f32 1.0, %v1268_v29 }
 0x692   :  { %v1294_v0 = vor.u32 1.1754944e-38, %v1293_v58  ;;  %vm1292_vm3 = vcmp.eq.f32.partialorder %v1291_v37, 8.507059e+37 }
 0x693   :  { %v1270_v35 = vmul.f32 %v4500_v28, %v1269_v32 }
 0x695   :  { %v1271_v40 = vadd.f32 %v4500_v28, %v1270_v35 }
 0x696   :  { %v4502_v45 = vpop.eup %4501 }
 0x697   :  { %v1275_v48 = vsel %vm1274_vm12, %v4500_v28, %v1271_v40  ;;  %v1283_v51 = vmul.f32 %v4502_v45, %v1266_v31  ;;  %v1096_v53 = vpop.xlane.xlu1 %1095  ;;  %vm1288_vm0 = vweird.f32 %v4502_v45 }
 0x698   :  { %v1280_v54 = vsel %vm1277_vm13, %v1279_v47, %v1275_v48  ;;  %v1100_v25 = vsub.f32 %v1092_v23, %v1096_v53  ;;  %vm1289_vm2 = vmor %vm1287_vm1, %vm1288_vm0 }
 0x699   :  { %v1284_v55 = vsub.f32 1.0, %v1283_v51  ;;  %v1281_v57 = vmul.f32 %v4496_v15, %v1280_v54 }
 0x69a   :  { %v1102_v62 = vmul.f32 1.442695, %v1100_v25 }
 0x69b   :  { %v1285_v60 = vmul.f32 %v4502_v45, %v1284_v55  ;;  %4256 = vmatmul.msk.f32.vlgmr.msrb.gmra.mxu0 %vm624_vm15, %v1281_v57 }
 0x69c   :  { %4503 = vpow2.f32 %v1102_v62 }
 0x69d   :  { %v1286_v30 = vadd.f32 %v4502_v45, %v1285_v60 }
 0x69f   :  { %v1099_v1 = vpop.xlane.xlu1 %1098  ;;  %v1290_v2 = vsel %vm1289_vm2, %v4502_v45, %v1286_v30 }
 0x6a0   :  { %v1101_v41 = vsub.f32 %v1093_v46, %v1099_v1  ;;  %v1295_v3 = vsel %vm1292_vm3, %v1294_v0, %v1290_v2  ;;  %v5561_v1 = vld [vmem:[#allocation17 + $0x78] sm:$0xff]  ;;  %v5563_v2 = vld [vmem:[#allocation17 + $0x70] sm:$0xff] }
 0x6a1   :  { %v1296_v4 = vmul.f32 %v4498_v17, %v1295_v3  ;;  %1199 = vmatpush.msrb.mxu2 %v5561_v1  ;;  %v5570_v3 = vld [vmem:[#allocation17 + $0x60] sm:$0xff] }
 0x6a2   :  { %v4504_v5 = vpop.eup %4503  ;;  %v1104_v6 = vmul.f32 1.442695, %v1101_v41  ;;  %v5566_v41 = vld [vmem:[#allocation17 + $0x68] sm:$0xff] }
 0x6a3   :  { %4257 = vmatmul.msk.f32.gmra.mxu0 %vm624_vm15, %v1296_v4  ;;  %v1106_v7 = vsel %vm624_vm15, %v4504_v5, 0.0  ;;  %1200 = vmatpush.msrb.mxu2 %v5563_v2 }
 0x6a4   :  { %4505 = vpow2.f32 %v1104_v6  ;;  %1107 = vadd.xlane.f32.xlu2 %v1106_v7 }
 0x6a5   :  { %1201 = vmatpush.msrb.mxu2 %v5566_v41 }
 0x6a7   :  { %1202 = vmatpush.msrb.mxu2 %v5570_v3 }
 0x6aa   :  { %v4506_v39 = vpop.eup %4505 }
 0x6ab   :  { %v1109_v8 = vsel %vm624_vm15, %v4506_v39, 0.0 }
 0x6ac   :  { %1110 = vadd.xlane.f32.xlu0 %v1109_v8 }
 0x6b7   :  { %v4392_v42 = vpop.permute.xlu1 %4391 }
 0x6b8   :  { %v4393_v9 = vunpack.i.l.bf16 %v4392_v42  ;;  %v4394_v15 = vunpack.i.h.bf16 %v4392_v42 }
 0x6ba   :  { %1168 = vmatpush.msra.mxu1 %v4393_v9 }
 0x6bc   :  { %1336 = vrot.lane.b32.xlu2 %v5442_v11, %s5034_s30  ;;  %1169 = vmatpush.msra.mxu1 %v4394_v15 }
 0x6bf   :  { %v1331_v17 = vpop.permute.xlu1 %1330 }
 0x6c0   :  { %1334 = vrot.lane.b32.xlu0 %v5448_v13, %s5034_s30 }
 0x6c4   :  { %1524 = vrot.lane.b32.xlu2 %v5442_v11, %s5035_s2 }
 0x6c7   :  { %v1523_v49 = vpop.permute.xlu1 %1522 }
 0x6c8   :  { %1332 = vrot.lane.b32.xlu0 %v5476_v59, %s5034_s30 }
 0x6cc   :  { %1683 = vrot.lane.b32.xlu2 %v5442_v11, %s5036_s8 }
 0x6cf   :  { %v1682_v58 = vpop.permute.xlu1 %1681 }
 0x6d0   :  { %1518 = vrot.lane.b32.xlu0 %v5467_v56, %s5035_s2 }
 0x6d4   :  { %1677 = vrot.lane.b32.xlu2 %v5467_v56, %s5036_s8 }
 0x6d7   :  { %v1680_v37 = vpop.permute.xlu1 %1679 }
 0x6d8   :  { %1520 = vrot.lane.b32.xlu0 %v5476_v59, %s5035_s2 }
 0x717   :  { %v1108_v16 = vpop.xlane.xlu2 %1107 }
 0x718   :  { %4507 = vrcp.f32 %v1108_v16  ;;  %v1320_v13 = vpop.f32.mrf.mxu0  ;;  %v1123_v56 = vand.u32 2147483648, %v1108_v16  ;;  %v1121_v59 = vand.u32 2147483647, %v1108_v16  ;;  %vm1117_vm5 = vweird.f32 %v1108_v16 }
 0x719   :  { %4266 = vmatmul.msk.f32.vlgmr.msra.gmra.mxu0 %vm586_vm14, %v1320_v13 }
 0x71a   :  { %v1124_v38 = vor.u32 1.1754944e-38, %v1123_v56  ;;  %vm1122_vm7 = vcmp.eq.f32.partialorder %v1121_v59, 8.507059e+37 }
 0x71e   :  { %v4508_v10 = vpop.eup %4507 }
 0x71f   :  { %v1113_v20 = vmul.f32 %v4508_v10, %v1108_v16  ;;  %v1337_v21 = vpop.permute.xlu2 %1336  ;;  %v1111_v23 = vpop.xlane.xlu0 %1110  ;;  %vm1118_vm4 = vweird.f32 %v4508_v10 }
 0x720   :  { %4509 = vrcp.f32 %v1111_v23  ;;  %v1323_v11 = vpop.f32.mrf.mxu0  ;;  %4258 = vmatpush.xpose.msk.msrb.mxu1 %vm586_vm14, %v1337_v21  ;;  %vm1119_vm6 = vmor %vm1117_vm5, %vm1118_vm4  ;;  %v1138_v40 = vand.u32 2147483648, %v1111_v23  ;;  %v1136_v47 = vand.u32 2147483647, %v1111_v23  ;;  %vm1132_vm9 = vweird.f32 %v1111_v23 }
 0x721   :  { %v1114_v24 = vsub.f32 1.0, %v1113_v20  ;;  %4267 = vmatmul.msk.f32.gmra.mxu0 %vm586_vm14, %v1323_v11 }
 0x722   :  { %v1139_v51 = vor.u32 1.1754944e-38, %v1138_v40  ;;  %vm1137_vm11 = vcmp.eq.f32.partialorder %v1136_v47, 8.507059e+37 }
 0x723   :  { %v1115_v27 = vmul.f32 %v4508_v10, %v1114_v24 }
 0x725   :  { %v1116_v46 = vadd.f32 %v4508_v10, %v1115_v27 }
 0x726   :  { %v4510_v19 = vpop.eup %4509 }
 0x727   :  { %v1120_v28 = vsel %vm1119_vm6, %v4508_v10, %v1116_v46  ;;  %v1128_v29 = vmul.f32 %v4510_v19, %v1111_v23  ;;  %v1525_v31 = vpop.permute.xlu2 %1524  ;;  %vm1133_vm8 = vweird.f32 %v4510_v19 }
 0x728   :  { %v1125_v32 = vsel %vm1122_vm7, %v1124_v38, %v1120_v28  ;;  %vm1134_vm10 = vmor %vm1132_vm9, %vm1133_vm8 }
 0x729   :  { %v1129_v35 = vsub.f32 1.0, %v1128_v29  ;;  %v1126_v36 = vmul.f32 %v4504_v5, %v1125_v32 }
 0x72b   :  { %v1130_v45 = vmul.f32 %v4510_v19, %v1129_v35  ;;  %4248 = vmatmul.msk.f32.vlgmr.msra.gmra.mxu1 %vm624_vm15, %v1126_v36 }
 0x72d   :  { %v1131_v48 = vadd.f32 %v4510_v19, %v1130_v45 }
 0x72f   :  { %v1684_v53 = vpop.permute.xlu2 %1683  ;;  %v1135_v54 = vsel %vm1134_vm10, %v4510_v19, %v1131_v48 }
 0x730   :  { %4276 = vmatpush.xpose.msk.msrb.mxu0 %vm586_vm14, %v1684_v53  ;;  %v1140_v25 = vsel %vm1137_vm11, %v1139_v51, %v1135_v54 }
 0x731   :  { %v1141_v55 = vmul.f32 %v4506_v39, %v1140_v25 }
 0x732   :  { %v1335_v57 = vpop.permute.xlu0 %1334 }
 0x733   :  { %4249 = vmatmul.msk.f32.gmra.mxu1 %vm624_vm15, %v1141_v55 }
 0x734   :  { %4259 = vmatpush.xpose.msk.msrb.mxu1 %vm586_vm14, %v1335_v57  ;;  %4277 = vmatpush.xpose.msk.msrb.mxu0 %vm586_vm14, %v1682_v58 }
 0x737   :  { %v1678_v62 = vpop.permute.xlu2 %1677 }
 0x738   :  { %4268 = vmatpush.xpose.msk.msra.mxu1 %vm586_vm14, %v1525_v31  ;;  %4278 = vmatmul.msk.f32.vlgmr.msrb.gmra.mxu0 %vm586_vm14, %v1678_v62 }
 0x73a   :  { %v1333_v60 = vpop.permute.xlu0 %1332 }
 0x73b   :  { %4260 = vmatmul.msk.f32.vlgmr.msrb.gmra.mxu1 %vm586_vm14, %v1331_v17 }
 0x73c   :  { %4269 = vmatpush.xpose.msk.msra.mxu1 %vm586_vm14, %v1523_v49 }
 0x740   :  { %4279 = vmatmul.msk.f32.gmra.mxu0 %vm586_vm14, %v1680_v37 }
 0x742   :  { %v1519_v30 = vpop.permute.xlu0 %1518 }
 0x743   :  { %4261 = vmatmul.msk.f32.gmra.mxu1 %vm586_vm14, %v1333_v60 }
 0x74a   :  { %v1521_v0 = vpop.permute.xlu0 %1520 }
 0x74b   :  { %4270 = vmatmul.msk.f32.vlgmr.msra.gmra.mxu1 %vm586_vm14, %v1519_v30  ;;  %v4395_v30 = vpack.i.bf16 %v5490_v50, %v5486_v61  ;;  %v889_v50 = vadd.f32 %v5507_v34, %v5481_v43  ;;  %v892_v43 = vadd.f32 %v5509_v12, %v5483_v44 }
 0x753   :  { %4271 = vmatmul.msk.f32.gmra.mxu1 %vm586_vm14, %v1521_v0 }
 0x796   :  { %v5574_v5 = vpop.f32.mrf.mxu0 }
 0x79e   :  { %v5577_v8 = vpop.f32.mrf.mxu0 }
 0x7a8   :  { %v1171_v4 = vpop.f32.mrf.mxu1 }
 0x7a9   :  { %4250 = vmatmul.msk.f32.vlgmr.msrb.gmra.mxu2 %vm586_vm14, %v1171_v4 }
 0x7b0   :  { %v1174_v6 = vpop.f32.mrf.mxu1 }
 0x7b1   :  { %4251 = vmatmul.msk.f32.gmra.mxu2 %vm586_vm14, %v1174_v6 }
 0x7b5   :  { %v1710_v16 = vpop.f32.mrf.mxu0 }
 0x7b6   :  { %v1716_v10 = vmul.f32 0.17677669, %v1710_v16 }
 0x7b8   :  { %v1363_v7 = vpop.f32.mrf.mxu1  ;;  %v1718_v23 = vsel %vm624_vm15, %v1716_v10, -inf }
 0x7b9   :  { %v1369_v39 = vmul.f32 0.17677669, %v1363_v7 }
 0x7bb   :  { %v1371_v42 = vsel %vm624_vm15, %v1369_v39, -inf }
 0x7bc   :  { %1372 = vmax.xlane.f32.xlu0 %v1371_v42 }
 0x7bd   :  { %v1713_v11 = vpop.f32.mrf.mxu0 }
 0x7be   :  { %v1717_v24 = vmul.f32 0.17677669, %v1713_v11 }
 0x7c0   :  { %v1366_v9 = vpop.f32.mrf.mxu1  ;;  %v1721_v59 = vsel %vm624_vm15, %v1717_v24, -inf }
 0x7c1   :  { %v1370_v15 = vmul.f32 0.17677669, %v1366_v9 }
 0x7c3   :  { %v1374_v13 = vsel %vm624_vm15, %v1370_v15, -inf }
 0x7c4   :  { %1375 = vmax.xlane.f32.xlu2 %v1374_v13  ;;  %v5619_v13 = vld [vmem:[%s6358_s13] ss:$0 sm:$0xff] }
 0x7c8   :  { %v1551_v17 = vpop.f32.mrf.mxu1 }
 0x7c9   :  { %v1557_v20 = vmul.f32 0.17677669, %v1551_v17 }
 0x7cb   :  { %v1559_v21 = vsel %vm624_vm15, %v1557_v20, -inf }
 0x7cc   :  { %1560 = vmax.xlane.f32.xlu1 %v1559_v21  ;;  %1719 = vmax.xlane.f32.xlu2 %v1718_v23 }
 0x7d0   :  { %v1554_v56 = vpop.f32.mrf.mxu1 }
 0x7d1   :  { %v1558_v27 = vmul.f32 0.17677669, %v1554_v56 }
 0x7d3   :  { %v1562_v46 = vsel %vm624_vm15, %v1558_v27, -inf }
 0x7d4   :  { %1722 = vmax.xlane.f32.xlu1 %v1721_v59  ;;  %1563 = vmax.xlane.f32.xlu0 %v1562_v46 }
 0x82c   :  { %v1204_v9 = vpop.f32.mrf.mxu2 }
 0x82f   :  { %v1373_v19 = vpop.xlane.xlu0 %1372 }
 0x830   :  { %v1377_v38 = vsub.f32 %v1369_v39, %v1373_v19 }
 0x832   :  { %v1379_v28 = vmul.f32 1.442695, %v1377_v38 }
 0x834   :  { %4511 = vpow2.f32 %v1379_v28  ;;  %v1207_v34 = vpop.f32.mrf.mxu2 }
 0x837   :  { %v1376_v29 = vpop.xlane.xlu2 %1375 }
 0x838   :  { %v1378_v31 = vsub.f32 %v1370_v15, %v1376_v29  ;;  %v1051_v15 = vadd.f32 %v5493_v63, %v889_v50  ;;  %v1052_v63 = vadd.f32 %v5497_v52, %v892_v43 }
 0x83a   :  { %v5585_v32 = vpop.eup %4511  ;;  %v1381_v49 = vmul.f32 1.442695, %v1378_v31  ;;  %v1210_v16 = vadd.f32 %v1204_v9, %v1051_v15 }
 0x83b   :  { %v1383_v35 = vsel %vm624_vm15, %v5585_v32, 0.0 }
 0x83c   :  { %4513 = vpow2.f32 %v1381_v49  ;;  %1384 = vadd.xlane.f32.xlu0 %v1383_v35 }
 0x83f   :  { %v1561_v36 = vpop.xlane.xlu1 %1560  ;;  %v1720_v40 = vpop.xlane.xlu2 %1719 }
 0x840   :  { %v1565_v45 = vsub.f32 %v1557_v20, %v1561_v36  ;;  %v1724_v51 = vsub.f32 %v1716_v10, %v1720_v40  ;;  %v1840_v10 = vadd.f32 %v5619_v13, %v1210_v16  ;;  %v1211_v20 = vadd.f32 %v1207_v34, %v1052_v63 }
 0x842   :  { %v5589_v47 = vpop.eup %4513  ;;  %v1567_v48 = vmul.f32 1.442695, %v1565_v45  ;;  %v1726_v54 = vmul.f32 1.442695, %v1724_v51  ;;  %v5624_v17 = vadd.f32 %v1840_v10, %v5223_v14  ;;  %v1841_v21 = vadd.f32 %v5619_v13, %v1211_v20 }
 0x843   :  { %v1386_v53 = vsel %vm624_vm15, %v5589_v47, 0.0 }
 0x844   :  { %4515 = vpow2.f32 %v1567_v48  ;;  %1387 = vadd.xlane.f32.xlu2 %v1386_v53  ;;  %v5632_v23 = vadd.f32 %v1841_v21, %v5226_v18 }
 0x845   :  { %4517 = vpow2.f32 %v1726_v54 }
 0x847   :  { %v1564_v25 = vpop.xlane.xlu0 %1563  ;;  %v1723_v55 = vpop.xlane.xlu1 %1722 }
 0x848   :  { %v1566_v57 = vsub.f32 %v1558_v27, %v1564_v25  ;;  %v1725_v60 = vsub.f32 %v1717_v24, %v1723_v55 }
 0x84a   :  { %v5593_v58 = vpop.eup %4515  ;;  %v1569_v62 = vmul.f32 1.442695, %v1566_v57  ;;  %v1728_v0 = vmul.f32 1.442695, %v1725_v60 }
 0x84b   :  { %v1571_v37 = vsel %vm624_vm15, %v5593_v58, 0.0  ;;  %v5599_v4 = vpop.eup %4517 }
 0x84c   :  { %1572 = vadd.xlane.f32.xlu1 %v1571_v37  ;;  %4519 = vpow2.f32 %v1569_v62  ;;  %v1730_v7 = vsel %vm624_vm15, %v5599_v4, 0.0 }
 0x84d   :  { %4521 = vpow2.f32 %v1728_v0 }
 0x850   :  { %4396 = vrot.lane.b32.xlu0 %v4395_v30, %s5034_s30 }
 0x852   :  { %v5602_v6 = vpop.eup %4519 }
 0x853   :  { %v1574_v39 = vsel %vm624_vm15, %v5602_v6, 0.0  ;;  %v5608_v42 = vpop.eup %4521 }
 0x854   :  { %1731 = vadd.xlane.f32.xlu1 %v1730_v7  ;;  %1575 = vadd.xlane.f32.xlu2 %v1574_v39  ;;  %v1733_v61 = vsel %vm624_vm15, %v5608_v42, 0.0 }
 0x85c   :  { %1734 = vadd.xlane.f32.xlu2 %v1733_v61 }
 0x86d   :  { %4401 = vrot.lane.b32.xlu1 %v4395_v30, %s5035_s2 }
 0x874   :  { %4406 = vrot.lane.b32.xlu2 %v4395_v30, %s5036_s8 }
 0x87a   :  { %1850 = vadd.xlane.f32.xlu0 %v5624_v17 }
 0x897   :  { %1852 = vadd.xlane.f32.xlu1 %v5632_v23 }
 0x8af   :  { %v1385_v11 = vpop.xlane.xlu0 %1384 }
 0x8b0   :  { %4523 = vrcp.f32 %v1385_v11  ;;  %v1400_v12 = vand.u32 2147483648, %v1385_v11  ;;  %vm1394_vm13 = vweird.f32 %v1385_v11  ;;  %v1398_v46 = vand.u32 2147483647, %v1385_v11 }
 0x8b2   :  { %v1401_v28 = vor.u32 1.1754944e-38, %v1400_v12  ;;  %vm1399_vm1 = vcmp.eq.f32.partialorder %v1398_v46, 8.507059e+37 }
 0x8b6   :  { %v4524_v14 = vpop.eup %4523 }
 0x8b7   :  { %v1390_v24 = vmul.f32 %v4524_v14, %v1385_v11  ;;  %v1388_v56 = vpop.xlane.xlu2 %1387  ;;  %vm1395_vm12 = vweird.f32 %v4524_v14 }
 0x8b8   :  { %4525 = vrcp.f32 %v1388_v56  ;;  %vm1396_vm0 = vmor %vm1394_vm13, %vm1395_vm12  ;;  %v1415_v40 = vand.u32 2147483648, %v1388_v56  ;;  %vm1409_vm3 = vweird.f32 %v1388_v56  ;;  %v1413_v53 = vand.u32 2147483647, %v1388_v56 }
 0x8b9   :  { %v1391_v27 = vsub.f32 1.0, %v1390_v24 }
 0x8ba   :  { %v1416_v57 = vor.u32 1.1754944e-38, %v1415_v40  ;;  %vm1414_vm5 = vcmp.eq.f32.partialorder %v1413_v53, 8.507059e+37 }
 0x8bb   :  { %v1392_v59 = vmul.f32 %v4524_v14, %v1391_v27 }
 0x8bd   :  { %v1393_v44 = vadd.f32 %v4524_v14, %v1392_v59 }
 0x8be   :  { %v4526_v52 = vpop.eup %4525 }
 0x8bf   :  { %v1405_v19 = vmul.f32 %v4526_v52, %v1388_v56  ;;  %v5635_v18 = vpop.xlane.xlu1 %1572  ;;  %v1397_v38 = vsel %vm1396_vm0, %v4524_v14, %v1393_v44  ;;  %vm1410_vm2 = vweird.f32 %v4526_v52 }
 0x8c0   :  { %v1402_v49 = vsel %vm1399_vm1, %v1401_v28, %v1397_v38  ;;  %4527 = vrcp.f32 %v5635_v18  ;;  %vm1411_vm4 = vmor %vm1409_vm3, %vm1410_vm2  ;;  %v1588_v59 = vand.u32 2147483648, %v5635_v18  ;;  %vm1582_vm11 = vweird.f32 %v5635_v18 }
 0x8c1   :  { %v1406_v29 = vsub.f32 1.0, %v1405_v19  ;;  %v1403_v51 = vmul.f32 %v5585_v32, %v1402_v49  ;;  %v1586_v12 = vand.u32 2147483647, %v5635_v18  ;;  %v1953_v19 = vld [vmem:[#allocation20 + $0x48] sm:$0xff] }
 0x8c2   :  { %v4397_v31 = vpop.permute.xlu0 %4396 }
 0x8c3   :  { %v1407_v35 = vmul.f32 %v4526_v52, %v1406_v29  ;;  %v4398_v36 = vunpack.i.l.bf16 %v4397_v31  ;;  %v4399_v45 = vunpack.i.h.bf16 %v4397_v31  ;;  %vm1587_vm1 = vcmp.eq.f32.partialorder %v1586_v12, 8.507059e+37  ;;  %v1955_v12 = vld [vmem:[#allocation20 + $0x58] sm:$0xff] }
 0x8c5   :  { %1447 = vmatpush.msra.mxu2 %v4398_v36  ;;  %v1408_v48 = vadd.f32 %v4526_v52, %v1407_v35 }
 0x8c6   :  { %v4528_v62 = vpop.eup %4527 }
 0x8c7   :  { %1448 = vmatpush.msra.mxu2 %v4399_v45  ;;  %v1732_v54 = vpop.xlane.xlu1 %1731  ;;  %v5639_v25 = vpop.xlane.xlu2 %1575  ;;  %v1412_v55 = vsel %vm1411_vm4, %v4526_v52, %v1408_v48  ;;  %v1578_v37 = vmul.f32 %v4528_v62, %v5635_v18  ;;  %vm1583_vm9 = vweird.f32 %v4528_v62  ;;  %v1589_v18 = vor.u32 1.1754944e-38, %v1588_v59  ;;  %v1957_v59 = vld [vmem:[#allocation20 + $0x68] sm:$0xff] }
 0x8c8   :  { %4529 = vrcp.f32 %v1732_v54  ;;  %4262 = vmatmul.msk.f32.vlgmr.msra.gmra.mxu2 %vm624_vm15, %v1403_v51  ;;  %v1417_v60 = vsel %vm1414_vm5, %v1416_v57, %v1412_v55  ;;  %v1747_v15 = vand.u32 2147483648, %v1732_v54  ;;  %v1745_v16 = vand.u32 2147483647, %v1732_v54  ;;  %vm5654_vm12 = vmor %vm1582_vm11, %vm1583_vm9 }
 0x8c9   :  { %4531 = vrcp.f32 %v5639_v25  ;;  %v1418_v32 = vmul.f32 %v5589_v47, %v1417_v60  ;;  %v1579_v39 = vsub.f32 1.0, %v1578_v37  ;;  %vm1741_vm7 = vweird.f32 %v1732_v54 }
 0x8ca   :  { %v1748_v20 = vor.u32 1.1754944e-38, %v1747_v15  ;;  %vm1746_vm10 = vcmp.eq.f32.partialorder %v1745_v16, 8.507059e+37  ;;  %vm1597_vm5 = vweird.f32 %v5639_v25  ;;  %v1972_v15 = vld [vmem:[#allocation20 + $0xe0] sm:$0xff]  ;;  %v1969_v16 = vld [vmem:[#allocation20 + $0xc8] sm:$0xff] }
 0x8cb   :  { %v1580_v10 = vmul.f32 %v4528_v62, %v1579_v39  ;;  %v1973_v39 = vld [vmem:[#allocation20 + $0xe8] sm:$0xff] }
 0x8cd   :  { %v1581_v14 = vadd.f32 %v4528_v62, %v1580_v10  ;;  %v1970_v10 = vld [vmem:[#allocation20 + $0xd0] sm:$0xff] }
 0x8ce   :  { %v4530_v30 = vpop.eup %4529 }
 0x8cf   :  { %v1737_v0 = vmul.f32 %v4530_v30, %v1732_v54  ;;  %v1735_v7 = vpop.xlane.xlu2 %1734  ;;  %v5646_v50 = vpop.eup %4531  ;;  %vm1742_vm6 = vweird.f32 %v4530_v30  ;;  %v1585_v31 = vsel %vm5654_vm12, %v4528_v62, %v1581_v14  ;;  %v1603_v54 = vand.u32 2147483648, %v5639_v25  ;;  %v1961_v14 = vld [vmem:[#allocation20 + $0x88] sm:$0xff] }
 0x8d0   :  { %4263 = vmatmul.msk.f32.gmra.mxu2 %vm624_vm15, %v1418_v32  ;;  %4533 = vrcp.f32 %v1735_v7  ;;  %v1593_v34 = vmul.f32 %v5646_v50, %v5639_v25  ;;  %vm1743_vm8 = vmor %vm1741_vm7, %vm1742_vm6  ;;  %v1762_v52 = vand.u32 2147483648, %v1735_v7  ;;  %v1760_v29 = vand.u32 2147483647, %v1735_v7 }
 0x8d1   :  { %v1738_v61 = vsub.f32 1.0, %v1737_v0  ;;  %vm1756_vm0 = vweird.f32 %v1735_v7  ;;  %v1590_v45 = vsel %vm1587_vm1, %v1589_v18, %v1585_v31  ;;  %vm1598_vm4 = vweird.f32 %v5646_v50  ;;  %v1952_v31 = vld [vmem:[#allocation20 + $0x40] sm:$0xff]  ;;  %v1950_v18 = vld [vmem:[#allocation20 + $0x30] sm:$0xff] }
 0x8d2   :  { %v1594_v56 = vsub.f32 1.0, %v1593_v34  ;;  %v1763_v36 = vor.u32 1.1754944e-38, %v1762_v52  ;;  %vm1761_vm3 = vcmp.eq.f32.partialorder %v1760_v29, 8.507059e+37  ;;  %v1591_v57 = vmul.f32 %v5593_v58, %v1590_v45  ;;  %vm1599_vm6 = vmor %vm1597_vm5, %vm1598_vm4  ;;  %v1968_v34 = vld [vmem:[#allocation20 + $0xc0] sm:$0xff]  ;;  %v1949_v29 = vld [vmem:[#allocation20 + $0x28] sm:$0xff] }
 0x8d3   :  { %v1739_v9 = vmul.f32 %v4530_v30, %v1738_v61  ;;  %v1601_v62 = vand.u32 2147483647, %v5639_v25  ;;  %v1974_v61 = vld [vmem:[#allocation20 + $0xf0] sm:$0xff] }
 0x8d4   :  { %v1595_v49 = vmul.f32 %v5646_v50, %v1594_v56  ;;  %v1959_v56 = vld [vmem:[#allocation20 + $0x78] sm:$0xff] }
 0x8d5   :  { %v1740_v43 = vadd.f32 %v4530_v30, %v1739_v9  ;;  %vm1602_vm7 = vcmp.eq.f32.partialorder %v1601_v62, 8.507059e+37 }
 0x8d6   :  { %v4534_v47 = vpop.eup %4533  ;;  %v1596_v53 = vadd.f32 %v5646_v50, %v1595_v49  ;;  %v1947_v49 = vld [vmem:[#allocation20 + $0x18] sm:$0xff] }
 0x8d7   :  { %v1744_v63 = vsel %vm1743_vm8, %v4530_v30, %v1740_v43  ;;  %v1752_v21 = vmul.f32 %v4534_v47, %v1735_v7  ;;  %v4407_v11 = vpop.permute.xlu2 %4406  ;;  %vm1757_vm13 = vweird.f32 %v4534_v47  ;;  %v1604_v30 = vor.u32 1.1754944e-38, %v1603_v54  ;;  %v1967_v43 = vld [vmem:[#allocation20 + $0xb8] sm:$0xff] }
 0x8d8   :  { %v1749_v24 = vsel %vm1746_vm10, %v1748_v20, %v1744_v63  ;;  %v4408_v27 = vunpack.i.l.bf16 %v4407_v11  ;;  %v4409_v46 = vunpack.i.h.bf16 %v4407_v11  ;;  %vm1758_vm2 = vmor %vm1756_vm0, %vm1757_vm13  ;;  %v1600_v37 = vsel %vm1599_vm6, %v5646_v50, %v1596_v53  ;;  %v1971_v50 = vld [vmem:[#allocation20 + $0xd8] sm:$0xff]  ;;  %v1966_v63 = vld [vmem:[#allocation20 + $0xb0] sm:$0xff] }
 0x8d9   :  { %v1753_v44 = vsub.f32 1.0, %v1752_v21  ;;  %v1750_v28 = vmul.f32 %v5599_v4, %v1749_v24  ;;  %v1605_v32 = vsel %vm1602_vm7, %v1604_v30, %v1600_v37  ;;  %v1963_v20 = vld [vmem:[#allocation20 + $0x98] sm:$0xff]  ;;  %v1964_v11 = vld [vmem:[#allocation20 + $0xa0] sm:$0xff]  ;;  %v1962_v24 = vld [vmem:[#allocation20 + $0x90] sm:$0xff] }
 0x8da   :  { %1792 = vmatpush.msrb.mxu1 %v4408_v27  ;;  %v1606_v58 = vmul.f32 %v5602_v6, %v1605_v32  ;;  %v1975_v6 = vld [vmem:[#allocation20 + $0xf8] sm:$0xff]  ;;  %v1960_v27 = vld [vmem:[#allocation20 + $0x80] sm:$0xff] }
 0x8db   :  { %v1754_v38 = vmul.f32 %v4534_v47, %v1753_v44  ;;  %2011 = vmatpush.msra.mxu0 %v1975_v6  ;;  %v1958_v44 = vld [vmem:[#allocation20 + $0x70] sm:$0xff]  ;;  %v1944_v53 = vld [vmem:[#allocation20] sm:$0xff] }
 0x8dc   :  { %1793 = vmatpush.msrb.mxu1 %v4409_v46  ;;  %v1956_v46 = vld [vmem:[#allocation20 + $0x60] sm:$0xff] }
 0x8dd   :  { %4280 = vmatmul.msk.f32.vlgmr.msrb.gmra.mxu1 %vm624_vm15, %v1750_v28  ;;  %v1755_v35 = vadd.f32 %v4534_v47, %v1754_v38  ;;  %2012 = vmatpush.msra.mxu0 %v1973_v39  ;;  %v1954_v38 = vld [vmem:[#allocation20 + $0x50] sm:$0xff]  ;;  %v1951_v28 = vld [vmem:[#allocation20 + $0x38] sm:$0xff] }
 0x8df   :  { %v4402_v40 = vpop.permute.xlu1 %4401  ;;  %v1759_v4 = vsel %vm1758_vm2, %v4534_v47, %v1755_v35  ;;  %2013 = vmatpush.msra.mxu0 %v1971_v50  ;;  %v1965_v47 = vld [vmem:[#allocation20 + $0xa8] sm:$0xff] }
 0x8e0   :  { %v4403_v48 = vunpack.i.l.bf16 %v4402_v40  ;;  %v1764_v51 = vsel %vm1761_vm3, %v1763_v36, %v1759_v4  ;;  %v4404_v55 = vunpack.i.h.bf16 %v4402_v40  ;;  %v1945_v35 = vld [vmem:[#allocation20 + $0x8] sm:$0xff]  ;;  %v1948_v40 = vld [vmem:[#allocation20 + $0x20] sm:$0xff] }
 0x8e1   :  { %v1765_v60 = vmul.f32 %v5608_v42, %v1764_v51  ;;  %2014 = vmatpush.msra.mxu0 %v1969_v16 }
 0x8e2   :  { %1633 = vmatpush.msrb.mxu2 %v4403_v48  ;;  %v1946_v48 = vld [vmem:[#allocation20 + $0x10] sm:$0xff] }
 0x8e3   :  { %2015 = vmatpush.msra.mxu0 %v1967_v43 }
 0x8e4   :  { %1634 = vmatpush.msrb.mxu2 %v4404_v55 }
 0x8e5   :  { %4272 = vmatmul.msk.f32.vlgmr.msrb.gmra.mxu2 %vm624_vm15, %v1591_v57  ;;  %4281 = vmatmul.msk.f32.gmra.mxu1 %vm624_vm15, %v1765_v60 }
 0x8e6   :  { %1823 = vmatpush.msra.mxu2 %v5561_v1  ;;  %2016 = vmatpush.msra.mxu0 %v1965_v47 }
 0x8e8   :  { %1824 = vmatpush.msra.mxu2 %v5563_v2  ;;  %2017 = vmatpush.msra.mxu0 %v1963_v20  ;;  %v2142_v20 = vld [vmem:[#allocation22 + $0xf0] sm:$0xff] }
 0x8ea   :  { %1825 = vmatpush.msra.mxu2 %v5566_v41  ;;  %2018 = vmatpush.msra.mxu0 %v1961_v14  ;;  %v2127_v14 = vld [vmem:[#allocation22 + $0x78] sm:$0xff] }
 0x8eb   :  { %2148 = vmatpush.msra.mxu1 %v2127_v14 }
 0x8ec   :  { %1826 = vmatpush.msra.mxu2 %v5570_v3  ;;  %2019 = vmatpush.msra.mxu0 %v1959_v56  ;;  %v2126_v56 = vld [vmem:[#allocation22 + $0x70] sm:$0xff] }
 0x8ed   :  { %v1851_v42 = vpop.xlane.xlu0 %1850  ;;  %4273 = vmatmul.msk.f32.gmra.mxu2 %vm624_vm15, %v1606_v58  ;;  %v5698_v58 = vld [vmem:[#allocation19] ss:$0 sm:$0xff]  ;;  %2149 = vmatpush.msra.mxu1 %v2126_v56 }
 0x8ee   :  { %v1858_v25 = vmul.f32 %v1851_v42, %v5235_v33  ;;  %2020 = vmatpush.msra.mxu0 %v1957_v59  ;;  %v2125_v59 = vld [vmem:[#allocation22 + $0x68] sm:$0xff] }
 0x8ef   :  { %2150 = vmatpush.msra.mxu1 %v2125_v59 }
 0x8f0   :  { %v5681_v0 = vsub.f32 %v5624_v17, %v1858_v25  ;;  %2021 = vmatpush.msra.mxu0 %v1955_v12  ;;  %v2124_v12 = vld [vmem:[#allocation22 + $0x60] sm:$0xff] }
 0x8f1   :  { %2151 = vmatpush.msra.mxu1 %v2124_v12 }
 0x8f2   :  { %v1866_v1 = vmul.f32 %v5681_v0, %v5681_v0  ;;  %2022 = vmatpush.msra.mxu0 %v1953_v19  ;;  %v2136_v19 = vld [vmem:[#allocation22 + $0xc0] sm:$0xff] }
 0x8f4   :  { %1870 = vadd.xlane.f32.xlu2 %v1866_v1  ;;  %2023 = vmatpush.msra.mxu0 %v1951_v28  ;;  %v5704_v1 = vld [vmem:[%s6360_s15] ss:$0 sm:$0xff]  ;;  %v2122_v28 = vld [vmem:[#allocation22 + $0x50] sm:$0xff] }
 0x8f6   :  { %2024 = vmatpush.msra.mxu0 %v1949_v29  ;;  %v2135_v29 = vld [vmem:[#allocation22 + $0xb8] sm:$0xff] }
 0x8f8   :  { %2025 = vmatpush.msra.mxu0 %v1947_v49 }
 0x8fa   :  { %2026 = vmatpush.msra.mxu0 %v1945_v35  ;;  %v2121_v35 = vld [vmem:[#allocation22 + $0x48] sm:$0xff] }
 0x90a   :  { %v1853_v7 = vpop.xlane.xlu1 %1852 }
 0x90b   :  { %v1859_v2 = vmul.f32 %v1853_v7, %v5235_v33 }
 0x90d   :  { %v5687_v41 = vsub.f32 %v5632_v23, %v1859_v2 }
 0x90f   :  { %v1867_v3 = vmul.f32 %v5687_v41, %v5687_v41 }
 0x911   :  { %1872 = vadd.xlane.f32.xlu0 %v1867_v3 }
 0x94b   :  { %v1450_v9 = vpop.f32.mrf.mxu2 }
 0x94c   :  { %4264 = vmatmul.msk.f32.vlgmr.msra.gmra.mxu3 %vm586_vm14, %v1450_v9 }
 0x94d   :  { %1982 = vmatpush.msra.mxu3 %v1974_v61 }
 0x94f   :  { %1983 = vmatpush.msra.mxu3 %v1972_v15 }
 0x951   :  { %1984 = vmatpush.msra.mxu3 %v1970_v10 }
 0x953   :  { %v1453_v21 = vpop.f32.mrf.mxu2  ;;  %1985 = vmatpush.msra.mxu3 %v1968_v34 }
 0x954   :  { %4265 = vmatmul.msk.f32.gmra.mxu3 %vm586_vm14, %v1453_v21 }
 0x955   :  { %1986 = vmatpush.msra.mxu3 %v1966_v63  ;;  %v2143_v63 = vld [vmem:[#allocation22 + $0xf8] sm:$0xff] }
 0x956   :  { %2177 = vmatpush.msrb.mxu2 %v2143_v63 }
 0x957   :  { %1987 = vmatpush.msra.mxu3 %v1964_v11  ;;  %v2141_v11 = vld [vmem:[#allocation22 + $0xe8] sm:$0xff] }
 0x958   :  { %2178 = vmatpush.msrb.mxu2 %v2142_v20 }
 0x959   :  { %1988 = vmatpush.msra.mxu3 %v1962_v24  ;;  %v2140_v24 = vld [vmem:[#allocation22 + $0xe0] sm:$0xff] }
 0x95a   :  { %v1795_v52 = vpop.f32.mrf.mxu1  ;;  %2179 = vmatpush.msrb.mxu2 %v2141_v11 }
 0x95b   :  { %1989 = vmatpush.msra.mxu3 %v1960_v27  ;;  %4282 = vmatmul.msk.f32.vlgmr.msra.gmra.mxu2 %vm586_vm14, %v1795_v52  ;;  %v2139_v27 = vld [vmem:[#allocation22 + $0xd8] sm:$0xff]  ;;  %v2137_v52 = vld [vmem:[#allocation22 + $0xc8] sm:$0xff] }
 0x95c   :  { %2180 = vmatpush.msrb.mxu2 %v2140_v24 }
 0x95d   :  { %1990 = vmatpush.msra.mxu3 %v1958_v44  ;;  %v2138_v44 = vld [vmem:[#allocation22 + $0xd0] sm:$0xff] }
 0x95e   :  { %2181 = vmatpush.msrb.mxu2 %v2139_v27 }
 0x95f   :  { %1991 = vmatpush.msra.mxu3 %v1956_v46  ;;  %v2123_v46 = vld [vmem:[#allocation22 + $0x58] sm:$0xff] }
 0x960   :  { %2182 = vmatpush.msrb.mxu2 %v2138_v44  ;;  %2152 = vmatpush.msra.mxu1 %v2123_v46 }
 0x961   :  { %1992 = vmatpush.msra.mxu3 %v1954_v38 }
 0x962   :  { %v1798_v36 = vpop.f32.mrf.mxu1  ;;  %2183 = vmatpush.msrb.mxu2 %v2137_v52  ;;  %2153 = vmatpush.msra.mxu1 %v2122_v28 }
 0x963   :  { %1993 = vmatpush.msra.mxu3 %v1952_v31  ;;  %4283 = vmatmul.msk.f32.gmra.mxu2 %vm586_vm14, %v1798_v36  ;;  %v2134_v36 = vld [vmem:[#allocation22 + $0xb0] sm:$0xff] }
 0x964   :  { %2184 = vmatpush.msrb.mxu2 %v2136_v19  ;;  %2154 = vmatpush.msra.mxu1 %v2121_v35 }
 0x965   :  { %1994 = vmatpush.msra.mxu3 %v1950_v18 }
 0x966   :  { %2185 = vmatpush.msrb.mxu2 %v2135_v29 }
 0x967   :  { %v1871_v45 = vpop.xlane.xlu2 %1870  ;;  %1995 = vmatpush.msra.mxu3 %v1948_v40  ;;  %v2120_v40 = vld [vmem:[#allocation22 + $0x40] sm:$0xff] }
 0x968   :  { %v1878_v4 = vmul.f32 %v1871_v45, %v5235_v33  ;;  %v1636_v51 = vpop.f32.mrf.mxu2  ;;  %2186 = vmatpush.msrb.mxu2 %v2134_v36  ;;  %v2133_v45 = vld [vmem:[#allocation22 + $0xa8] sm:$0xff]  ;;  %2155 = vmatpush.msra.mxu1 %v2120_v40 }
 0x969   :  { %4274 = vmatmul.msk.f32.vlgmr.msrb.gmra.mxu3 %vm586_vm14, %v1636_v51  ;;  %v2132_v51 = vld [vmem:[#allocation22 + $0xa0] sm:$0xff] }
 0x96a   :  { %v1882_v54 = vadd.f32 1e-06, %v1878_v4  ;;  %1996 = vmatpush.msra.mxu3 %v1946_v48  ;;  %v2119_v4 = vld [vmem:[#allocation22 + $0x38] sm:$0xff]  ;;  %2187 = vmatpush.msrb.mxu2 %v2133_v45 }
 0x96b   :  { %2156 = vmatpush.msra.mxu1 %v2119_v4 }
 0x96c   :  { %4535 = vrsqrt.f32 %v1882_v54  ;;  %1997 = vmatpush.msra.mxu3 %v1944_v53  ;;  %vm1892_vm9 = vweird.f32 %v1882_v54  ;;  %v2118_v53 = vld [vmem:[#allocation22 + $0x30] sm:$0xff]  ;;  %2188 = vmatpush.msrb.mxu2 %v2132_v51 }
 0x96d   :  { %2157 = vmatpush.msra.mxu1 %v2118_v53 }
 0x970   :  { %v1639_v55 = vpop.f32.mrf.mxu2 }
 0x971   :  { %4275 = vmatmul.msk.f32.gmra.mxu3 %vm586_vm14, %v1639_v55 }
 0x972   :  { %v4536_v57 = vpop.eup %4535 }
 0x973   :  { %v1887_v62 = vmul.f32 %v4536_v57, %v1882_v54  ;;  %vm1893_vm8 = vweird.f32 %v4536_v57  ;;  %v2131_v54 = vld [vmem:[#allocation22 + $0x98] sm:$0xff] }
 0x974   :  { %vm1894_vm10 = vmor %vm1892_vm9, %vm1893_vm8  ;;  %2189 = vmatpush.msrb.mxu2 %v2131_v54 }
 0x975   :  { %v1888_v60 = vmul.f32 %v4536_v57, %v1887_v62  ;;  %v2117_v62 = vld [vmem:[#allocation22 + $0x28] sm:$0xff] }
 0x976   :  { %2158 = vmatpush.msra.mxu1 %v2117_v62 }
 0x977   :  { %v1889_v37 = vmul.f32 0.5, %v1888_v60  ;;  %v2130_v60 = vld [vmem:[#allocation22 + $0x90] sm:$0xff] }
 0x978   :  { %2190 = vmatpush.msrb.mxu2 %v2130_v60 }
 0x979   :  { %v1890_v30 = vsub.f32 1.5, %v1889_v37 }
 0x97b   :  { %v1891_v32 = vmul.f32 %v4536_v57, %v1890_v30 }
 0x97d   :  { %v1895_v42 = vsel %vm1894_vm10, %v4536_v57, %v1891_v32  ;;  %v2116_v32 = vld [vmem:[#allocation22 + $0x20] sm:$0xff] }
 0x97e   :  { %v1926_v25 = vmul.f32 %v1895_v42, %v5681_v0  ;;  %v2129_v42 = vld [vmem:[#allocation22 + $0x88] sm:$0xff]  ;;  %2159 = vmatpush.msra.mxu1 %v2116_v32 }
 0x97f   :  { %2191 = vmatpush.msrb.mxu2 %v2129_v42 }
 0x980   :  { %v1933_v7 = vmul.f32 %v5698_v58, %v1926_v25 }
 0x982   :  { %v1940_v2 = vadd.f32 %v5704_v1, %v1933_v7 }
 0x984   :  { %1998 = vmatmul.f32.vlgmr.msra.gmra.mxu3 %v1940_v2  ;;  %2027 = vmatmul.f32.vlgmr.msra.gmra.mxu0 %v1940_v2  ;;  %v1873_v3 = vpop.xlane.xlu0 %1872  ;;  %v2115_v2 = vld [vmem:[#allocation22 + $0x18] sm:$0xff] }
 0x985   :  { %v1879_v6 = vmul.f32 %v1873_v3, %v5235_v33  ;;  %v2128_v3 = vld [vmem:[#allocation22 + $0x80] sm:$0xff]  ;;  %2160 = vmatpush.msra.mxu1 %v2115_v2 }
 0x986   :  { %2192 = vmatpush.msrb.mxu2 %v2128_v3 }
 0x987   :  { %v1883_v39 = vadd.f32 1e-06, %v1879_v6 }
 0x989   :  { %4537 = vrsqrt.f32 %v1883_v39  ;;  %vm1902_vm12 = vweird.f32 %v1883_v39 }
 0x98f   :  { %v4538_v61 = vpop.eup %4537 }
 0x990   :  { %v1897_v50 = vmul.f32 %v4538_v61, %v1883_v39  ;;  %vm1903_vm11 = vweird.f32 %v4538_v61  ;;  %v1976_v39 = vld [vmem:[%s6362_s17] sm:$0x3] }
 0x991   :  { %vm1904_vm13 = vmor %vm1902_vm12, %vm1903_vm11 }
 0x992   :  { %v1898_v9 = vmul.f32 %v4538_v61, %v1897_v50  ;;  %v5727_v50 = vperm.slane %v1976_v39, 1 }
 0x994   :  { %v1899_v0 = vmul.f32 0.5, %v1898_v9  ;;  %v2112_v9 = vld [vmem:[#allocation22] sm:$0xff] }
 0x996   :  { %v1900_v15 = vsub.f32 1.5, %v1899_v0 }
 0x998   :  { %v1901_v16 = vmul.f32 %v4538_v61, %v1900_v15 }
 0x99a   :  { %v1905_v10 = vsel %vm1904_vm13, %v4538_v61, %v1901_v16  ;;  %v2113_v61 = vld [vmem:[#allocation22 + $0x8] sm:$0xff]  ;;  %v5730_v16 = vperm.slane %v1976_v39, 0 }
 0x99b   :  { %v1927_v43 = vmul.f32 %v1905_v10, %v5687_v41  ;;  %v5742_v39 = vld [vmem:[%s6364_s19] ss:$0 sm:$0xff] }
 0x99d   :  { %v1934_v34 = vmul.f32 %v5698_v58, %v1927_v43 }
 0x99f   :  { %v1941_v47 = vadd.f32 %v5704_v1, %v1934_v34 }
 0x9a1   :  { %2001 = vmatmul.f32.gmra.mxu3 %v1941_v47  ;;  %2030 = vmatmul.f32.gmra.mxu0 %v1941_v47 }
 0x9cf   :  { %v1483_v21 = vpop.f32.mrf.mxu3 }
 0x9d0   :  { %v1513_v38 = vadd.f32 %v5574_v5, %v1483_v21 }
 0x9d7   :  { %v1486_v41 = vpop.f32.mrf.mxu3 }
 0x9d8   :  { %v1516_v55 = vadd.f32 %v5577_v8, %v1486_v41  ;;  %v2114_v8 = vld [vmem:[#allocation22 + $0x10] sm:$0xff] }
 0x9d9   :  { %2161 = vmatpush.msra.mxu1 %v2114_v8 }
 0x9db   :  { %2162 = vmatpush.msra.mxu1 %v2113_v61 }
 0x9dd   :  { %2163 = vmatpush.msra.mxu1 %v2112_v9 }
 0x9de   :  { %v1828_v31 = vpop.f32.mrf.mxu2 }
 0x9e6   :  { %v1831_v25 = vpop.f32.mrf.mxu2 }
 0x9ec   :  { %v1669_v49 = vpop.f32.mrf.mxu3 }
 0x9ed   :  { %v1675_v18 = vadd.f32 %v1669_v49, %v1513_v38 }
 0x9ef   :  { %v1834_v48 = vadd.f32 %v1828_v31, %v1675_v18 }
 0x9f1   :  { %v1842_v5 = vadd.f32 %v5619_v13, %v1834_v48 }
 0x9f3   :  { %v5716_v57 = vadd.f32 %v1842_v5, %v5229_v22 }
 0x9f4   :  { %v1672_v37 = vpop.f32.mrf.mxu3 }
 0x9f5   :  { %v1676_v30 = vadd.f32 %v1672_v37, %v1516_v55  ;;  %1854 = vadd.xlane.f32.xlu0 %v5716_v57 }
 0x9f7   :  { %v1835_v7 = vadd.f32 %v1831_v25, %v1676_v30 }
 0x9f9   :  { %v1843_v22 = vadd.f32 %v5619_v13, %v1835_v7 }
 0x9fb   :  { %v5721_v6 = vadd.f32 %v1843_v22, %v5232_v26 }
 0x9fd   :  { %1856 = vadd.xlane.f32.xlu0 %v5721_v6 }
 0xa01   :  { %v2028_v13 = vpop.f32.mrf.mxu0 }
 0xa02   :  { %v2029_v0 = vadd.f32 %v2028_v13, %v5727_v50 }
 0xa04   :  { %v2049_v15 = vmul.f32 0.044715, %v2029_v0  ;;  %v2041_v27 = vmul.f32 0.5, %v2029_v0 }
 0xa06   :  { %v2057_v26 = vmul.f32 %v2049_v15, %v2029_v0 }
 0xa07   :  { %v1999_v10 = vpop.f32.mrf.mxu3 }
 0xa08   :  { %v2065_v43 = vmul.f32 %v2057_v26, %v2029_v0  ;;  %v2000_v34 = vadd.f32 %v1999_v10, %v5730_v16 }
 0xa0a   :  { %v2048_v47 = vmul.f32 0.044715, %v2000_v34  ;;  %v2073_v63 = vadd.f32 %v2065_v43, %v2029_v0  ;;  %v2040_v12 = vmul.f32 0.5, %v2000_v34 }
 0xa0c   :  { %v2056_v20 = vmul.f32 %v2048_v47, %v2000_v34  ;;  %v2081_v21 = vmul.f32 0.7978846, %v2073_v63 }
 0xa0e   :  { %v2064_v11 = vmul.f32 %v2056_v20, %v2000_v34  ;;  %4539 = vtanh.f32 %v2081_v21 }
 0xa10   :  { %v2072_v14 = vadd.f32 %v2064_v11, %v2000_v34 }
 0xa12   :  { %v2080_v24 = vmul.f32 0.7978846, %v2072_v14 }
 0xa14   :  { %v4540_v56 = vpop.eup %4539  ;;  %4541 = vtanh.f32 %v2080_v24 }
 0xa15   :  { %v2097_v41 = vadd.f32 1.0, %v4540_v56 }
 0xa17   :  { %v2105_v59 = vmul.f32 %v2097_v41, %v2041_v27 }
 0xa19   :  { %2193 = vmatmul.f32.vlgmr.msrb.gmra.mxu2 %v2105_v59 }
 0xa1a   :  { %v4542_v44 = vpop.eup %4541 }
 0xa1b   :  { %v2096_v52 = vadd.f32 1.0, %v4542_v44 }
 0xa1d   :  { %v2104_v46 = vmul.f32 %v2096_v52, %v2040_v12 }
 0xa1e   :  { %v2031_v19 = vpop.f32.mrf.mxu0 }
 0xa1f   :  { %v2032_v38 = vadd.f32 %v2031_v19, %v5727_v50  ;;  %2164 = vmatmul.f32.vlgmr.msra.gmra.mxu1 %v2104_v46 }
 0xa21   :  { %v2051_v28 = vmul.f32 0.044715, %v2032_v38  ;;  %v2043_v53 = vmul.f32 0.5, %v2032_v38 }
 0xa23   :  { %v2059_v29 = vmul.f32 %v2051_v28, %v2032_v38 }
 0xa24   :  { %v2002_v31 = vpop.f32.mrf.mxu3 }
 0xa25   :  { %v2003_v49 = vadd.f32 %v2002_v31, %v5730_v16  ;;  %v2067_v18 = vmul.f32 %v2059_v29, %v2032_v38 }
 0xa27   :  { %v2075_v35 = vadd.f32 %v2067_v18, %v2032_v38  ;;  %v2050_v36 = vmul.f32 0.044715, %v2003_v49  ;;  %v2042_v60 = vmul.f32 0.5, %v2003_v49 }
 0xa29   :  { %v2083_v40 = vmul.f32 0.7978846, %v2075_v35  ;;  %v2058_v45 = vmul.f32 %v2050_v36, %v2003_v49 }
 0xa2b   :  { %4543 = vtanh.f32 %v2083_v40  ;;  %v2066_v48 = vmul.f32 %v2058_v45, %v2003_v49 }
 0xa2d   :  { %v2074_v4 = vadd.f32 %v2066_v48, %v2003_v49 }
 0xa2f   :  { %v2082_v51 = vmul.f32 0.7978846, %v2074_v4 }
 0xa31   :  { %v4544_v5 = vpop.eup %4543  ;;  %4545 = vtanh.f32 %v2082_v51 }
 0xa32   :  { %v2099_v54 = vadd.f32 1.0, %v4544_v5 }
 0xa34   :  { %v2107_v55 = vmul.f32 %v2099_v54, %v2043_v53 }
 0xa36   :  { %2196 = vmatmul.f32.gmra.mxu2 %v2107_v55  ;;  %v2375_v55 = vld [vmem:[#allocation14 + $0xf8] sm:$0xff] }
 0xa37   :  { %v4546_v62 = vpop.eup %4545  ;;  %2381 = vmatpush.msrb.mxu0 %v2375_v55  ;;  %v2362_v55 = vld [vmem:[#allocation14 + $0x90] sm:$0xff] }
 0xa38   :  { %v2098_v37 = vadd.f32 1.0, %v4546_v62  ;;  %v2426_v62 = vld [vmem:[#allocation16 + $0xf8] sm:$0xff] }
 0xa39   :  { %2432 = vmatpush.msrb.mxu1 %v2426_v62  ;;  %v2413_v62 = vld [vmem:[#allocation16 + $0x90] sm:$0xff] }
 0xa3a   :  { %v2106_v30 = vmul.f32 %v2098_v37, %v2042_v60  ;;  %v2323_v60 = vld [vmem:[#allocation11 + $0xf0] sm:$0xff] }
 0xa3b   :  { %v2374_v37 = vld [vmem:[#allocation14 + $0xf0] sm:$0xff] }
 0xa3c   :  { %2167 = vmatmul.f32.gmra.mxu1 %v2106_v30  ;;  %v2425_v30 = vld [vmem:[#allocation16 + $0xf0] sm:$0xff]  ;;  %2382 = vmatpush.msrb.mxu0 %v2374_v37 }
 0xa3d   :  { %2433 = vmatpush.msrb.mxu1 %v2425_v30  ;;  %v2361_v30 = vld [vmem:[#allocation14 + $0x88] sm:$0xff] }
 0xa68   :  { %v1855_v32 = vpop.xlane.xlu0 %1854 }
 0xa69   :  { %v1860_v42 = vmul.f32 %v1855_v32, %v5235_v33  ;;  %v2322_v32 = vld [vmem:[#allocation11 + $0xe8] sm:$0xff] }
 0xa6b   :  { %v1864_v25 = vsub.f32 %v5716_v57, %v1860_v42  ;;  %v2373_v42 = vld [vmem:[#allocation14 + $0xe8] sm:$0xff] }
 0xa6c   :  { %2383 = vmatpush.msrb.mxu0 %v2373_v42 }
 0xa6d   :  { %v1868_v7 = vmul.f32 %v1864_v25, %v1864_v25 }
 0xa6f   :  { %1874 = vadd.xlane.f32.xlu1 %v1868_v7  ;;  %v2321_v7 = vld [vmem:[#allocation11 + $0xe0] sm:$0xff] }
 0xa70   :  { %v1857_v2 = vpop.xlane.xlu0 %1856 }
 0xa71   :  { %v1861_v3 = vmul.f32 %v1857_v2, %v5235_v33  ;;  %v2372_v2 = vld [vmem:[#allocation14 + $0xe0] sm:$0xff] }
 0xa72   :  { %2384 = vmatpush.msrb.mxu0 %v2372_v2  ;;  %v2309_v2 = vld [vmem:[#allocation11 + $0x80] sm:$0xff] }
 0xa73   :  { %v1865_v22 = vsub.f32 %v5721_v6, %v1861_v3  ;;  %v2423_v3 = vld [vmem:[#allocation16 + $0xe0] sm:$0xff] }
 0xa75   :  { %v1869_v8 = vmul.f32 %v1865_v22, %v1865_v22 }
 0xa77   :  { %1876 = vadd.xlane.f32.xlu2 %v1869_v8  ;;  %v2371_v8 = vld [vmem:[#allocation14 + $0xd8] sm:$0xff] }
 0xa78   :  { %2385 = vmatpush.msrb.mxu0 %v2371_v8 }
 0xa9c   :  { %v2165_v61 = vpop.f32.mrf.mxu1  ;;  %v2194_v13 = vpop.f32.mrf.mxu2 }
 0xa9d   :  { %v2166_v9 = vadd.f32 %v5742_v39, %v2165_v61  ;;  %v2422_v61 = vld [vmem:[#allocation16 + $0xd8] sm:$0xff] }
 0xa9f   :  { %v2195_v0 = vadd.f32 %v2194_v13, %v2166_v9  ;;  %v2319_v9 = vld [vmem:[#allocation11 + $0xd0] sm:$0xff] }
 0xaa0   :  { %v2370_v13 = vld [vmem:[#allocation14 + $0xd0] sm:$0xff] }
 0xaa1   :  { %v5746_v15 = vadd.f32 %v2195_v0, %v5624_v17  ;;  %v2421_v0 = vld [vmem:[#allocation16 + $0xd0] sm:$0xff]  ;;  %2386 = vmatpush.msrb.mxu0 %v2370_v13 }
 0xaa3   :  { %2214 = vadd.xlane.f32.xlu0 %v5746_v15 }
 0xab9   :  { %v2168_v26 = vpop.f32.mrf.mxu1  ;;  %v2197_v43 = vpop.f32.mrf.mxu2 }
 0xaba   :  { %v2169_v10 = vadd.f32 %v5742_v39, %v2168_v26  ;;  %v2318_v26 = vld [vmem:[#allocation11 + $0xc8] sm:$0xff] }
 0xabc   :  { %v2198_v34 = vadd.f32 %v2197_v43, %v2169_v10  ;;  %v2369_v10 = vld [vmem:[#allocation14 + $0xc8] sm:$0xff] }
 0xabd   :  { %v2420_v43 = vld [vmem:[#allocation16 + $0xc8] sm:$0xff]  ;;  %2387 = vmatpush.msrb.mxu0 %v2369_v10 }
 0xabe   :  { %v5751_v47 = vadd.f32 %v2198_v34, %v5632_v23 }
 0xac0   :  { %2216 = vadd.xlane.f32.xlu1 %v5751_v47 }
 0xae2   :  { %v1875_v63 = vpop.xlane.xlu1 %1874 }
 0xae3   :  { %v1880_v20 = vmul.f32 %v1875_v63, %v5235_v33 }
 0xae5   :  { %v1884_v21 = vadd.f32 1e-06, %v1880_v20  ;;  %v2317_v20 = vld [vmem:[#allocation11 + $0xc0] sm:$0xff] }
 0xae7   :  { %4547 = vrsqrt.f32 %v1884_v21  ;;  %vm1912_vm1 = vweird.f32 %v1884_v21 }
 0xaea   :  { %v1877_v11 = vpop.xlane.xlu2 %1876 }
 0xaeb   :  { %v1881_v17 = vmul.f32 %v1877_v11, %v5235_v33  ;;  %v2419_v11 = vld [vmem:[#allocation16 + $0xc0] sm:$0xff] }
 0xaed   :  { %v4548_v14 = vpop.eup %4547  ;;  %v1885_v24 = vadd.f32 1e-06, %v1881_v17 }
 0xaee   :  { %v1907_v56 = vmul.f32 %v4548_v14, %v1884_v21  ;;  %vm1913_vm0 = vweird.f32 %v4548_v14  ;;  %v2368_v21 = vld [vmem:[#allocation14 + $0xc0] sm:$0xff] }
 0xaef   :  { %4549 = vrsqrt.f32 %v1885_v24  ;;  %vm1914_vm2 = vmor %vm1912_vm1, %vm1913_vm0  ;;  %vm1922_vm4 = vweird.f32 %v1885_v24  ;;  %2388 = vmatpush.msrb.mxu0 %v2368_v21 }
 0xaf0   :  { %v1908_v27 = vmul.f32 %v4548_v14, %v1907_v56  ;;  %v2418_v56 = vld [vmem:[#allocation16 + $0xb8] sm:$0xff] }
 0xaf2   :  { %v1909_v41 = vmul.f32 0.5, %v1908_v27 }
 0xaf4   :  { %v1910_v59 = vsub.f32 1.5, %v1909_v41  ;;  %v2315_v41 = vld [vmem:[#allocation11 + $0xb0] sm:$0xff] }
 0xaf5   :  { %v4550_v23 = vpop.eup %4549 }
 0xaf6   :  { %v1911_v44 = vmul.f32 %v4548_v14, %v1910_v59  ;;  %v1917_v12 = vmul.f32 %v4550_v23, %v1885_v24  ;;  %vm1923_vm3 = vweird.f32 %v4550_v23  ;;  %v2367_v24 = vld [vmem:[#allocation14 + $0xb8] sm:$0xff]  ;;  %v2366_v59 = vld [vmem:[#allocation14 + $0xb0] sm:$0xff] }
 0xaf7   :  { %vm1924_vm5 = vmor %vm1922_vm4, %vm1923_vm3  ;;  %2389 = vmatpush.msrb.mxu0 %v2367_v24 }
 0xaf8   :  { %v1918_v52 = vmul.f32 %v4550_v23, %v1917_v12  ;;  %v1915_v46 = vsel %vm1914_vm2, %v4548_v14, %v1911_v44  ;;  %v2316_v14 = vld [vmem:[#allocation11 + $0xb8] sm:$0xff] }
 0xaf9   :  { %v1928_v19 = vmul.f32 %v1915_v46, %v1864_v25  ;;  %v2424_v25 = vld [vmem:[#allocation16 + $0xe8] sm:$0xff]  ;;  %2390 = vmatpush.msrb.mxu0 %v2366_v59 }
 0xafa   :  { %v1919_v38 = vmul.f32 0.5, %v1918_v52  ;;  %2434 = vmatpush.msrb.mxu1 %v2424_v25  ;;  %v2314_v46 = vld [vmem:[#allocation11 + $0xa8] sm:$0xff] }
 0xafb   :  { %v1935_v28 = vmul.f32 %v5698_v58, %v1928_v19  ;;  %v2365_v19 = vld [vmem:[#allocation14 + $0xa8] sm:$0xff] }
 0xafc   :  { %v1920_v29 = vsub.f32 1.5, %v1919_v38  ;;  %2435 = vmatpush.msrb.mxu1 %v2423_v3  ;;  %v2416_v38 = vld [vmem:[#allocation16 + $0xa8] sm:$0xff]  ;;  %2391 = vmatpush.msrb.mxu0 %v2365_v19  ;;  %v2360_v3 = vld [vmem:[#allocation14 + $0x80] sm:$0xff] }
 0xafd   :  { %v1942_v31 = vadd.f32 %v5704_v1, %v1935_v28 }
 0xafe   :  { %v1921_v49 = vmul.f32 %v4550_v23, %v1920_v29  ;;  %2436 = vmatpush.msrb.mxu1 %v2422_v61 }
 0xaff   :  { %2004 = vmatmul.f32.gmra.mxu3 %v1942_v31  ;;  %2033 = vmatmul.f32.gmra.mxu0 %v1942_v31 }
 0xb00   :  { %v1925_v18 = vsel %vm1924_vm5, %v4550_v23, %v1921_v49  ;;  %2437 = vmatpush.msrb.mxu1 %v2421_v0  ;;  %v2417_v23 = vld [vmem:[#allocation16 + $0xb0] sm:$0xff] }
 0xb01   :  { %v1929_v35 = vmul.f32 %v1925_v18, %v1865_v22  ;;  %v2320_v22 = vld [vmem:[#allocation11 + $0xd8] sm:$0xff]  ;;  %v2313_v18 = vld [vmem:[#allocation11 + $0xa0] sm:$0xff] }
 0xb02   :  { %2438 = vmatpush.msrb.mxu1 %v2420_v43 }
 0xb03   :  { %v1936_v36 = vmul.f32 %v5698_v58, %v1929_v35  ;;  %v2364_v35 = vld [vmem:[#allocation14 + $0xa0] sm:$0xff] }
 0xb04   :  { %2439 = vmatpush.msrb.mxu1 %v2419_v11  ;;  %2392 = vmatpush.msrb.mxu0 %v2364_v35 }
 0xb05   :  { %v1943_v40 = vadd.f32 %v5704_v1, %v1936_v36  ;;  %v2324_v1 = vld [vmem:[#allocation11 + $0xf8] sm:$0xff]  ;;  %v2415_v36 = vld [vmem:[#allocation16 + $0xa0] sm:$0xff] }
 0xb06   :  { %2330 = vmatpush.msrb.mxu3 %v2324_v1  ;;  %2440 = vmatpush.msrb.mxu1 %v2418_v56 }
 0xb07   :  { %2007 = vmatmul.f32.gmra.mxu3 %v1943_v40  ;;  %2036 = vmatmul.f32.gmra.mxu0 %v1943_v40 }
 0xb08   :  { %2331 = vmatpush.msrb.mxu3 %v2323_v60  ;;  %2441 = vmatpush.msrb.mxu1 %v2417_v23  ;;  %v2310_v60 = vld [vmem:[#allocation11 + $0x88] sm:$0xff] }
 0xb0a   :  { %2332 = vmatpush.msrb.mxu3 %v2322_v32  ;;  %2442 = vmatpush.msrb.mxu1 %v2416_v38  ;;  %v2412_v32 = vld [vmem:[#allocation16 + $0x88] sm:$0xff] }
 0xb0c   :  { %2333 = vmatpush.msrb.mxu3 %v2321_v7  ;;  %2443 = vmatpush.msrb.mxu1 %v2415_v36 }
 0xb0e   :  { %2334 = vmatpush.msrb.mxu3 %v2320_v22  ;;  %v2411_v22 = vld [vmem:[#allocation16 + $0x80] sm:$0xff] }
 0xb10   :  { %2335 = vmatpush.msrb.mxu3 %v2319_v9 }
 0xb12   :  { %2336 = vmatpush.msrb.mxu3 %v2318_v26 }
 0xb14   :  { %2337 = vmatpush.msrb.mxu3 %v2317_v20 }
 0xb16   :  { %v2215_v45 = vpop.xlane.xlu0 %2214  ;;  %2338 = vmatpush.msrb.mxu3 %v2316_v14 }
 0xb17   :  { %v2222_v48 = vmul.f32 %v2215_v45, %v5235_v33 }
 0xb18   :  { %2339 = vmatpush.msrb.mxu3 %v2315_v41 }
 0xb19   :  { %v5762_v4 = vsub.f32 %v5746_v15, %v2222_v48 }
 0xb1a   :  { %2340 = vmatpush.msrb.mxu3 %v2314_v46 }
 0xb1b   :  { %v2230_v51 = vmul.f32 %v5762_v4, %v5762_v4 }
 0xb1c   :  { %2341 = vmatpush.msrb.mxu3 %v2313_v18 }
 0xb1d   :  { %2234 = vadd.xlane.f32.xlu2 %v2230_v51  ;;  %v2312_v51 = vld [vmem:[#allocation11 + $0x98] sm:$0xff] }
 0xb1e   :  { %2342 = vmatpush.msrb.mxu3 %v2312_v51 }
 0xb33   :  { %v2217_v5 = vpop.xlane.xlu1 %2216 }
 0xb34   :  { %v2223_v53 = vmul.f32 %v2217_v5, %v5235_v33  ;;  %v2414_v5 = vld [vmem:[#allocation16 + $0x98] sm:$0xff] }
 0xb35   :  { %2444 = vmatpush.msrb.mxu1 %v2414_v5 }
 0xb36   :  { %v5768_v54 = vsub.f32 %v5751_v47, %v2223_v53  ;;  %v2311_v53 = vld [vmem:[#allocation11 + $0x90] sm:$0xff] }
 0xb37   :  { %2343 = vmatpush.msrb.mxu3 %v2311_v53  ;;  %2445 = vmatpush.msrb.mxu1 %v2413_v62 }
 0xb38   :  { %v2231_v58 = vmul.f32 %v5768_v54, %v5768_v54 }
 0xb39   :  { %2344 = vmatpush.msrb.mxu3 %v2310_v60  ;;  %2446 = vmatpush.msrb.mxu1 %v2412_v32 }
 0xb3a   :  { %2236 = vadd.xlane.f32.xlu0 %v2231_v58 }
 0xb3b   :  { %2345 = vmatpush.msrb.mxu3 %v2309_v2  ;;  %2447 = vmatpush.msrb.mxu1 %v2411_v22 }
 0xb7c   :  { %v2034_v34 = vpop.f32.mrf.mxu0 }
 0xb7d   :  { %v5773_v63 = vadd.f32 %v2034_v34, %v5727_v50 }
 0xb7f   :  { %v2053_v17 = vmul.f32 0.044715, %v5773_v63  ;;  %v2045_v10 = vmul.f32 0.5, %v5773_v63 }
 0xb81   :  { %v2061_v27 = vmul.f32 %v2053_v17, %v5773_v63 }
 0xb82   :  { %v2005_v44 = vpop.f32.mrf.mxu3 }
 0xb83   :  { %v5778_v12 = vadd.f32 %v2005_v44, %v5730_v16  ;;  %v2069_v52 = vmul.f32 %v2061_v27, %v5773_v63 }
 0xb84   :  { %v2037_v28 = vpop.f32.mrf.mxu0 }
 0xb85   :  { %v5782_v29 = vadd.f32 %v2037_v28, %v5727_v50  ;;  %v2077_v31 = vadd.f32 %v2069_v52, %v5773_v63  ;;  %v2052_v49 = vmul.f32 0.044715, %v5778_v12  ;;  %v2363_v50 = vld [vmem:[#allocation14 + $0x98] sm:$0xff]  ;;  %v2044_v56 = vmul.f32 0.5, %v5778_v12 }
 0xb86   :  { %2393 = vmatpush.msrb.mxu0 %v2363_v50 }
 0xb87   :  { %v2085_v40 = vmul.f32 0.7978846, %v2077_v31  ;;  %v2060_v45 = vmul.f32 %v2052_v49, %v5778_v12  ;;  %v2055_v48 = vmul.f32 0.044715, %v5782_v29  ;;  %v2047_v63 = vmul.f32 0.5, %v5782_v29 }
 0xb88   :  { %2394 = vmatpush.msrb.mxu0 %v2362_v55 }
 0xb89   :  { %4551 = vtanh.f32 %v2085_v40  ;;  %v2068_v58 = vmul.f32 %v2060_v45, %v5778_v12  ;;  %v2063_v1 = vmul.f32 %v2055_v48, %v5782_v29  ;;  %v5804_v45 = vld [vmem:[#allocation10 + $0x1] ss:$0 sm:$0xff] }
 0xb8a   :  { %v2008_v37 = vpop.f32.mrf.mxu3  ;;  %2395 = vmatpush.msrb.mxu0 %v2361_v30 }
 0xb8b   :  { %v2009_v42 = vadd.f32 %v2008_v37, %v5730_v16  ;;  %v2076_v25 = vadd.f32 %v2068_v58, %v5778_v12  ;;  %v2071_v7 = vmul.f32 %v2063_v1, %v5782_v29 }
 0xb8c   :  { %2396 = vmatpush.msrb.mxu0 %v2360_v3 }
 0xb8d   :  { %v2084_v8 = vmul.f32 0.7978846, %v2076_v25  ;;  %v2079_v61 = vadd.f32 %v2071_v7, %v5782_v29  ;;  %v2054_v9 = vmul.f32 0.044715, %v2009_v42  ;;  %v2046_v28 = vmul.f32 0.5, %v2009_v42 }
 0xb8e   :  { %v5801_v29 = vld [vmem:[%s6383_s0 + $0x1] ss:$0 sm:$0xff] }
 0xb8f   :  { %v4552_v13 = vpop.eup %4551  ;;  %4553 = vtanh.f32 %v2084_v8  ;;  %v2087_v16 = vmul.f32 0.7978846, %v2079_v61  ;;  %v2062_v0 = vmul.f32 %v2054_v9, %v2009_v42 }
 0xb90   :  { %v2235_v26 = vpop.xlane.xlu2 %2234  ;;  %v2101_v43 = vadd.f32 1.0, %v4552_v13 }
 0xb91   :  { %v2242_v34 = vmul.f32 %v2235_v26, %v5235_v33  ;;  %4555 = vtanh.f32 %v2087_v16  ;;  %v2070_v20 = vmul.f32 %v2062_v0, %v2009_v42  ;;  %v5825_v26 = vld [vmem:[%s6356_s11 + $0x1] ss:$0 sm:$0xff] }
 0xb92   :  { %v2109_v21 = vmul.f32 %v2101_v43, %v2045_v10 }
 0xb93   :  { %v2246_v11 = vadd.f32 1e-06, %v2242_v34  ;;  %v2078_v17 = vadd.f32 %v2070_v20, %v2009_v42  ;;  %v5841_v20 = vld [vmem:[#allocation13 + $0x1] ss:$0 sm:$0xff] }
 0xb94   :  { %2199 = vmatmul.f32.gmra.mxu2 %v2109_v21 }
 0xb95   :  { %v4554_v14 = vpop.eup %4553  ;;  %4557 = vrsqrt.f32 %v2246_v11  ;;  %v2086_v24 = vmul.f32 0.7978846, %v2078_v17  ;;  %vm2256_vm7 = vweird.f32 %v2246_v11 }
 0xb96   :  { %v2100_v27 = vadd.f32 1.0, %v4554_v14 }
 0xb97   :  { %v4556_v41 = vpop.eup %4555  ;;  %4559 = vtanh.f32 %v2086_v24 }
 0xb98   :  { %v2108_v59 = vmul.f32 %v2100_v27, %v2044_v56  ;;  %v2103_v23 = vadd.f32 1.0, %v4556_v41 }
 0xb9a   :  { %2170 = vmatmul.f32.gmra.mxu1 %v2108_v59  ;;  %v2111_v44 = vmul.f32 %v2103_v23, %v2047_v63 }
 0xb9b   :  { %v4558_v52 = vpop.eup %4557 }
 0xb9c   :  { %v2251_v46 = vmul.f32 %v4558_v52, %v2246_v11  ;;  %2202 = vmatmul.f32.gmra.mxu2 %v2111_v44  ;;  %vm2257_vm6 = vweird.f32 %v4558_v52 }
 0xb9d   :  { %v4560_v19 = vpop.eup %4559  ;;  %vm2258_vm8 = vmor %vm2256_vm7, %vm2257_vm6 }
 0xb9e   :  { %v2252_v38 = vmul.f32 %v4558_v52, %v2251_v46  ;;  %v2102_v31 = vadd.f32 1.0, %v4560_v19 }
 0xba0   :  { %v2253_v49 = vmul.f32 0.5, %v2252_v38  ;;  %v2110_v18 = vmul.f32 %v2102_v31, %v2046_v28 }
 0xba2   :  { %v2254_v35 = vsub.f32 1.5, %v2253_v49  ;;  %2173 = vmatmul.f32.gmra.mxu1 %v2110_v18 }
 0xba4   :  { %v2255_v12 = vmul.f32 %v4558_v52, %v2254_v35 }
 0xba6   :  { %v2259_v36 = vsel %vm2258_vm8, %v4558_v52, %v2255_v12 }
 0xba7   :  { %v2290_v40 = vmul.f32 %v2259_v36, %v5762_v4 }
 0xba9   :  { %v2297_v48 = vmul.f32 %v5801_v29, %v2290_v40 }
 0xbab   :  { %v2304_v51 = vadd.f32 %v5804_v45, %v2297_v48 }
 0xbad   :  { %2346 = vmatmul.f32.vlgmr.msrb.gmra.mxu3 %v2304_v51  ;;  %2397 = vmatmul.f32.vlgmr.msrb.gmra.mxu0 %v2304_v51  ;;  %v2237_v50 = vpop.xlane.xlu0 %2236 }
 0xbae   :  { %2448 = vmatmul.f32.vlgmr.msrb.gmra.mxu1 %v2304_v51  ;;  %v2243_v5 = vmul.f32 %v2237_v50, %v5235_v33 }
 0xbb0   :  { %v2247_v53 = vadd.f32 1e-06, %v2243_v5 }
 0xbb2   :  { %4561 = vrsqrt.f32 %v2247_v53  ;;  %vm2266_vm10 = vweird.f32 %v2247_v53 }
 0xbb8   :  { %v4562_v58 = vpop.eup %4561 }
 0xbb9   :  { %v2261_v1 = vmul.f32 %v4562_v58, %v2247_v53  ;;  %vm2267_vm9 = vweird.f32 %v4562_v58 }
 0xbba   :  { %vm2268_vm11 = vmor %vm2266_vm10, %vm2267_vm9 }
 0xbbb   :  { %v2262_v55 = vmul.f32 %v4562_v58, %v2261_v1 }
 0xbbd   :  { %v2263_v62 = vmul.f32 0.5, %v2262_v55 }
 0xbbf   :  { %v2264_v60 = vsub.f32 1.5, %v2263_v62 }
 0xbc1   :  { %v2265_v4 = vmul.f32 %v4562_v58, %v2264_v60 }
 0xbc3   :  { %v2269_v37 = vsel %vm2268_vm11, %v4562_v58, %v2265_v4 }
 0xbc4   :  { %v2291_v30 = vmul.f32 %v2269_v37, %v5768_v54 }
 0xbc6   :  { %v2298_v32 = vmul.f32 %v5801_v29, %v2291_v30 }
 0xbc8   :  { %v2305_v42 = vadd.f32 %v5804_v45, %v2298_v32 }
 0xbca   :  { %2349 = vmatmul.f32.gmra.mxu3 %v2305_v42  ;;  %2400 = vmatmul.f32.gmra.mxu0 %v2305_v42 }
 0xbcb   :  { %2451 = vmatmul.f32.gmra.mxu1 %v2305_v42 }
 0xc17   :  { %v2171_v25 = vpop.f32.mrf.mxu1  ;;  %v2200_v7 = vpop.f32.mrf.mxu2 }
 0xc18   :  { %v2172_v2 = vadd.f32 %v5742_v39, %v2171_v25 }
 0xc1a   :  { %v2201_v3 = vadd.f32 %v2200_v7, %v2172_v2 }
 0xc1c   :  { %v5814_v22 = vadd.f32 %v2201_v3, %v5716_v57  ;;  %v5830_v57 = vld [vmem:[%s6354_s9 + $0x1] ss:$0 sm:$0xff] }
 0xc1e   :  { %2218 = vadd.xlane.f32.xlu1 %v5814_v22 }
 0xc1f   :  { %v2174_v8 = vpop.f32.mrf.mxu1  ;;  %v2203_v61 = vpop.f32.mrf.mxu2 }
 0xc20   :  { %v2175_v54 = vadd.f32 %v5742_v39, %v2174_v8 }
 0xc22   :  { %v2204_v9 = vadd.f32 %v2203_v61, %v2175_v54 }
 0xc24   :  { %v5819_v13 = vadd.f32 %v2204_v9, %v5721_v6 }
 0xc26   :  { %2220 = vadd.xlane.f32.xlu2 %v5819_v13 }
 0xc2a   :  { %v2398_v16 = vpop.f32.mrf.mxu0 }
 0xc2b   :  { %v2449_v0 = vpop.f32.mrf.mxu1  ;;  %v5846_v11 = vadd.f32 %v5830_v57, %v2398_v16 }
 0xc2c   :  { %v2450_v43 = vadd.f32 %v5825_v26, %v2449_v0 }
 0xc30   :  { %v2347_v17 = vpop.f32.mrf.mxu3 }
 0xc31   :  { %v5851_v14 = vadd.f32 %v5841_v20, %v2347_v17 }
 0xc47   :  { %v2401_v39 = vpop.f32.mrf.mxu0 }
 0xc48   :  { %v5833_v10 = vadd.f32 %v5830_v57, %v2401_v39  ;;  %v2452_v6 = vpop.f32.mrf.mxu1 }
 0xc49   :  { %v2453_v34 = vadd.f32 %v5825_v26, %v2452_v6 }
 0xc4a   :  { %2586 = vrot.lane.b32.xlu2 %v5833_v10, %s5034_s30  ;;  %4287 = vmatpush.xpose.msk.msra.mxu2 %vm586_vm14, %v5833_v10 }
 0xc4b   :  { %v5843_v21 = vpack.i.bf16 %v2450_v43, %v2453_v34 }
 0xc4d   :  { %v2350_v24 = vpop.f32.mrf.mxu3 }
 0xc4e   :  { %4288 = vmatpush.xpose.msk.msra.mxu2 %vm586_vm14, %v5846_v11  ;;  %v5858_v56 = vadd.f32 %v5841_v20, %v2350_v24 }
 0xc51   :  { %4289 = vmatmul.msk.f32.vlgmr.msra.gmra.mxu2 %vm586_vm14, %v5851_v14 }
 0xc52   :  { %2566 = vmatpush.msrb.mxu2 %v2453_v34  ;;  %2774 = vrot.lane.b32.xlu2 %v5833_v10, %s5035_s2 }
 0xc54   :  { %2567 = vmatpush.msrb.mxu2 %v2450_v43 }
 0xc59   :  { %4290 = vmatmul.msk.f32.gmra.mxu2 %vm586_vm14, %v5858_v56 }
 0xc5a   :  { %2768 = vrot.lane.b32.xlu2 %v5851_v14, %s5035_s2 }
 0xc91   :  { %v2219_v27 = vpop.xlane.xlu1 %2218 }
 0xc92   :  { %v2224_v41 = vmul.f32 %v2219_v27, %v5235_v33 }
 0xc94   :  { %v2228_v59 = vsub.f32 %v5814_v22, %v2224_v41 }
 0xc96   :  { %v2232_v63 = vmul.f32 %v2228_v59, %v2228_v59 }
 0xc98   :  { %2238 = vadd.xlane.f32.xlu0 %v2232_v63 }
 0xc99   :  { %v2221_v23 = vpop.xlane.xlu2 %2220 }
 0xc9a   :  { %v2225_v44 = vmul.f32 %v2221_v23, %v5235_v33 }
 0xc9c   :  { %v2229_v52 = vsub.f32 %v5819_v13, %v2225_v44 }
 0xc9e   :  { %v2233_v46 = vmul.f32 %v2229_v52, %v2229_v52 }
 0xca0   :  { %2240 = vadd.xlane.f32.xlu1 %v2233_v46 }
 0xca4   :  { %v2587_v19 = vpop.permute.xlu2 %2586 }
 0xca5   :  { %4293 = vmatpush.xpose.msk.msra.mxu3 %vm586_vm14, %v2587_v19 }
 0xcac   :  { %2584 = vrot.lane.b32.xlu0 %v5846_v11, %s5034_s30  ;;  %v2775_v53 = vpop.permute.xlu2 %2774 }
 0xcb4   :  { %2582 = vrot.lane.b32.xlu0 %v5858_v56, %s5034_s30  ;;  %v2769_v9 = vpop.permute.xlu2 %2768 }
 0xcb9   :  { %2580 = vrot.lane.b32.xlu1 %v5851_v14, %s5034_s30 }
 0xcbc   :  { %2772 = vrot.lane.b32.xlu0 %v5846_v11, %s5035_s2 }
 0xcc1   :  { %2770 = vrot.lane.b32.xlu1 %v5858_v56, %s5035_s2 }
 0xd0b   :  { %v2239_v38 = vpop.xlane.xlu0 %2238 }
 0xd0c   :  { %v2244_v28 = vmul.f32 %v2239_v38, %v5235_v33 }
 0xd0e   :  { %v2248_v31 = vadd.f32 1e-06, %v2244_v28 }
 0xd10   :  { %4563 = vrsqrt.f32 %v2248_v31  ;;  %vm2276_vm13 = vweird.f32 %v2248_v31 }
 0xd13   :  { %v2241_v49 = vpop.xlane.xlu1 %2240 }
 0xd14   :  { %v2245_v18 = vmul.f32 %v2241_v49, %v5235_v33 }
 0xd16   :  { %v4564_v35 = vpop.eup %4563  ;;  %v2249_v12 = vadd.f32 1e-06, %v2245_v18 }
 0xd17   :  { %v2271_v36 = vmul.f32 %v4564_v35, %v2248_v31  ;;  %vm2277_vm12 = vweird.f32 %v4564_v35 }
 0xd18   :  { %4565 = vrsqrt.f32 %v2249_v12  ;;  %vm2278_vm0 = vmor %vm2276_vm13, %vm2277_vm12  ;;  %vm2286_vm2 = vweird.f32 %v2249_v12 }
 0xd19   :  { %v2272_v40 = vmul.f32 %v4564_v35, %v2271_v36 }
 0xd1b   :  { %v2273_v48 = vmul.f32 0.5, %v2272_v40 }
 0xd1d   :  { %v2274_v51 = vsub.f32 1.5, %v2273_v48 }
 0xd1e   :  { %v4566_v50 = vpop.eup %4565  ;;  %v2585_v5 = vpop.permute.xlu0 %2584 }
 0xd1f   :  { %v2275_v58 = vmul.f32 %v4564_v35, %v2274_v51  ;;  %v2281_v1 = vmul.f32 %v4566_v50, %v2249_v12  ;;  %4294 = vmatpush.xpose.msk.msra.mxu3 %vm586_vm14, %v2585_v5  ;;  %vm2287_vm1 = vweird.f32 %v4566_v50 }
 0xd20   :  { %vm2288_vm3 = vmor %vm2286_vm2, %vm2287_vm1 }
 0xd21   :  { %v2279_v55 = vsel %vm2278_vm0, %v4564_v35, %v2275_v58  ;;  %v2282_v62 = vmul.f32 %v4566_v50, %v2281_v1  ;;  %v2490_v1 = vpop.f32.mrf.mxu2 }
 0xd22   :  { %v2292_v60 = vmul.f32 %v2279_v55, %v2228_v59 }
 0xd23   :  { %4303 = vmatpush.xpose.msk.msrb.mxu3 %vm586_vm14, %v2775_v53  ;;  %v2283_v4 = vmul.f32 0.5, %v2282_v62  ;;  %v5918_v62 = vmul.f32 0.17677669, %v2490_v1 }
 0xd24   :  { %v2299_v37 = vmul.f32 %v5801_v29, %v2292_v60 }
 0xd25   :  { %v2284_v30 = vsub.f32 1.5, %v2283_v4  ;;  %v2498_v60 = vsel %vm624_vm15, %v5918_v62, -inf }
 0xd26   :  { %v2583_v32 = vpop.permute.xlu0 %2582  ;;  %v2306_v42 = vadd.f32 %v5804_v45, %v2299_v37 }
 0xd27   :  { %v2285_v25 = vmul.f32 %v4566_v50, %v2284_v30 }
 0xd28   :  { %2352 = vmatmul.f32.gmra.mxu3 %v2306_v42  ;;  %2403 = vmatmul.f32.gmra.mxu0 %v2306_v42 }
 0xd29   :  { %v2289_v7 = vsel %vm2288_vm3, %v4566_v50, %v2285_v25  ;;  %2454 = vmatmul.f32.gmra.mxu1 %v2306_v42  ;;  %v2493_v4 = vpop.f32.mrf.mxu2 }
 0xd2a   :  { %v2293_v2 = vmul.f32 %v2289_v7, %v2229_v52  ;;  %v5922_v37 = vmul.f32 0.17677669, %v2493_v4 }
 0xd2b   :  { %v2581_v61 = vpop.permute.xlu1 %2580 }
 0xd2c   :  { %v2300_v3 = vmul.f32 %v5801_v29, %v2293_v2  ;;  %v2501_v30 = vsel %vm624_vm15, %v5922_v37, -inf }
 0xd2e   :  { %v2773_v8 = vpop.permute.xlu0 %2772  ;;  %v2307_v54 = vadd.f32 %v5804_v45, %v2300_v3 }
 0xd2f   :  { %4304 = vmatpush.xpose.msk.msrb.mxu3 %vm586_vm14, %v2773_v8 }
 0xd30   :  { %2355 = vmatmul.f32.gmra.mxu3 %v2307_v54  ;;  %2406 = vmatmul.f32.gmra.mxu0 %v2307_v54 }
 0xd31   :  { %2457 = vmatmul.f32.gmra.mxu1 %v2307_v54 }
 0xd33   :  { %v2771_v16 = vpop.permute.xlu1 %2770 }
 0xd38   :  { %4295 = vmatmul.msk.f32.vlgmr.msra.gmra.mxu3 %vm586_vm14, %v2581_v61 }
 0xd40   :  { %4296 = vmatmul.msk.f32.gmra.mxu3 %vm586_vm14, %v2583_v32 }
 0xd48   :  { %4305 = vmatmul.msk.f32.vlgmr.msrb.gmra.mxu3 %vm586_vm14, %v2769_v9 }
 0xd50   :  { %4306 = vmatmul.msk.f32.gmra.mxu3 %vm586_vm14, %v2771_v16 }
 0xdab   :  { %v5892_v29 = vpop.f32.mrf.mxu3 }
 0xdb3   :  { %v5894_v0 = vpop.f32.mrf.mxu3 }
 0xdbb   :  { %v2613_v45 = vpop.f32.mrf.mxu3 }
 0xdbc   :  { %v2619_v39 = vmul.f32 0.17677669, %v2613_v45 }
 0xdbe   :  { %v2621_v6 = vsel %vm624_vm15, %v2619_v39, -inf }
 0xdbf   :  { %2622 = vmax.xlane.f32.xlu0 %v2621_v6 }
 0xdc3   :  { %v2616_v43 = vpop.f32.mrf.mxu3 }
 0xdc4   :  { %v2620_v34 = vmul.f32 0.17677669, %v2616_v43 }
 0xdc6   :  { %v2624_v17 = vsel %vm624_vm15, %v2620_v34, -inf }
 0xdc7   :  { %2625 = vmax.xlane.f32.xlu2 %v2624_v17 }
 0xdcb   :  { %v2801_v24 = vpop.f32.mrf.mxu3 }
 0xdcc   :  { %v2807_v27 = vmul.f32 0.17677669, %v2801_v24 }
 0xdce   :  { %v2809_v41 = vsel %vm624_vm15, %v2807_v27, -inf }
 0xdcf   :  { %2810 = vmax.xlane.f32.xlu1 %v2809_v41 }
 0xdd3   :  { %v2804_v59 = vpop.f32.mrf.mxu3 }
 0xdd4   :  { %v2808_v63 = vmul.f32 0.17677669, %v2804_v59 }
 0xdd6   :  { %v2812_v23 = vsel %vm624_vm15, %v2808_v63, -inf }
 0xdd7   :  { %2813 = vmax.xlane.f32.xlu2 %v2812_v23  ;;  %v5978_v23 = vld [vmem:[#allocation17 + $0x88] sm:$0xff] }
 0xe32   :  { %v2623_v44 = vpop.xlane.xlu0 %2622 }
 0xe33   :  { %v2627_v52 = vsub.f32 %v2619_v39, %v2623_v44 }
 0xe35   :  { %v2629_v46 = vmul.f32 1.442695, %v2627_v52 }
 0xe37   :  { %4567 = vpow2.f32 %v2629_v46 }
 0xe3a   :  { %v2626_v19 = vpop.xlane.xlu2 %2625 }
 0xe3b   :  { %v2628_v38 = vsub.f32 %v2620_v34, %v2626_v19 }
 0xe3d   :  { %v5900_v28 = vpop.eup %4567  ;;  %v2631_v31 = vmul.f32 1.442695, %v2628_v38 }
 0xe3e   :  { %v2633_v49 = vsel %vm624_vm15, %v5900_v28, 0.0 }
 0xe3f   :  { %4569 = vpow2.f32 %v2631_v31  ;;  %2634 = vadd.xlane.f32.xlu0 %v2633_v49 }
 0xe42   :  { %v2811_v18 = vpop.xlane.xlu1 %2810 }
 0xe43   :  { %v2815_v35 = vsub.f32 %v2807_v27, %v2811_v18 }
 0xe45   :  { %v5904_v12 = vpop.eup %4569  ;;  %v2817_v36 = vmul.f32 1.442695, %v2815_v35 }
 0xe46   :  { %v2636_v40 = vsel %vm624_vm15, %v5904_v12, 0.0 }
 0xe47   :  { %4571 = vpow2.f32 %v2817_v36  ;;  %2637 = vadd.xlane.f32.xlu1 %v2636_v40 }
 0xe4a   :  { %v2814_v48 = vpop.xlane.xlu2 %2813 }
 0xe4b   :  { %v2816_v51 = vsub.f32 %v2808_v63, %v2814_v48 }
 0xe4d   :  { %v5908_v50 = vpop.eup %4571  ;;  %v2819_v5 = vmul.f32 1.442695, %v2816_v51 }
 0xe4e   :  { %v2821_v53 = vsel %vm624_vm15, %v5908_v50, 0.0 }
 0xe4f   :  { %4573 = vpow2.f32 %v2819_v5  ;;  %2822 = vadd.xlane.f32.xlu2 %v2821_v53 }
 0xe53   :  { %4411 = vrot.lane.b32.xlu0 %v5843_v21, %s5034_s30 }
 0xe55   :  { %v5914_v58 = vpop.eup %4573 }
 0xe56   :  { %v2824_v55 = vsel %vm624_vm15, %v5914_v58, 0.0 }
 0xe57   :  { %2825 = vadd.xlane.f32.xlu1 %v2824_v55 }
 0xe5f   :  { %2499 = vmax.xlane.f32.xlu1 %v2498_v60 }
 0xe67   :  { %4416 = vrot.lane.b32.xlu2 %v5843_v21, %s5035_s2  ;;  %2502 = vmax.xlane.f32.xlu1 %v2501_v30 }
 0xe6f   :  { %2933 = vrot.lane.b32.xlu2 %v5833_v10, %s5036_s8 }
 0xe77   :  { %2927 = vrot.lane.b32.xlu2 %v5851_v14, %s5036_s8 }
 0xe7f   :  { %2929 = vrot.lane.b32.xlu2 %v5858_v56, %s5036_s8 }
 0xeb2   :  { %v2635_v32 = vpop.xlane.xlu0 %2634 }
 0xeb3   :  { %4575 = vrcp.f32 %v2635_v32  ;;  %v2650_v54 = vand.u32 2147483648, %v2635_v32  ;;  %vm2644_vm5 = vweird.f32 %v2635_v32  ;;  %v2648_v10 = vand.u32 2147483647, %v2635_v32 }
 0xeb5   :  { %v2651_v56 = vor.u32 1.1754944e-38, %v2650_v54  ;;  %vm2649_vm7 = vcmp.eq.f32.partialorder %v2648_v10, 8.507059e+37 }
 0xeb9   :  { %v4576_v42 = vpop.eup %4575 }
 0xeba   :  { %v2640_v25 = vmul.f32 %v4576_v42, %v2635_v32  ;;  %v2638_v7 = vpop.xlane.xlu1 %2637  ;;  %vm2645_vm4 = vweird.f32 %v4576_v42 }
 0xebb   :  { %4577 = vrcp.f32 %v2638_v7  ;;  %vm2646_vm6 = vmor %vm2644_vm5, %vm2645_vm4  ;;  %v2665_v24 = vand.u32 2147483648, %v2638_v7  ;;  %vm2659_vm9 = vweird.f32 %v2638_v7  ;;  %v2663_v63 = vand.u32 2147483647, %v2638_v7 }
 0xebc   :  { %v2641_v2 = vsub.f32 1.0, %v2640_v25 }
 0xebd   :  { %v2666_v38 = vor.u32 1.1754944e-38, %v2665_v24  ;;  %vm2664_vm11 = vcmp.eq.f32.partialorder %v2663_v63, 8.507059e+37  ;;  %v5969_v24 = vld [vmem:[#allocation17 + $0xc0] sm:$0xff]  ;;  %v5975_v63 = vld [vmem:[#allocation17 + $0x90] sm:$0xff] }
 0xebe   :  { %v2642_v3 = vmul.f32 %v4576_v42, %v2641_v2 }
 0xec0   :  { %v2643_v8 = vadd.f32 %v4576_v42, %v2642_v3 }
 0xec1   :  { %v4578_v61 = vpop.eup %4577 }
 0xec2   :  { %v2655_v9 = vmul.f32 %v4578_v61, %v2638_v7  ;;  %v2823_v14 = vpop.xlane.xlu2 %2822  ;;  %v2647_v16 = vsel %vm2646_vm6, %v4576_v42, %v2643_v8  ;;  %vm2660_vm8 = vweird.f32 %v4578_v61 }
 0xec3   :  { %4579 = vrcp.f32 %v2823_v14  ;;  %v2652_v6 = vsel %vm2649_vm7, %v2651_v56, %v2647_v16  ;;  %vm5935_vm10 = vmor %vm2659_vm9, %vm2660_vm8  ;;  %v2838_v40 = vand.u32 2147483648, %v2823_v14  ;;  %vm2832_vm13 = vweird.f32 %v2823_v14  ;;  %v2708_v56 = vld [vmem:[#allocation17 + $0xb0] sm:$0xff] }
 0xec4   :  { %v2656_v45 = vsub.f32 1.0, %v2655_v9  ;;  %v2653_v59 = vmul.f32 %v5900_v28, %v2652_v6  ;;  %v2836_v51 = vand.u32 2147483647, %v2823_v14 }
 0xec5   :  { %v4412_v39 = vpop.permute.xlu0 %4411  ;;  %v2839_v4 = vor.u32 1.1754944e-38, %v2838_v40 }
 0xec6   :  { %v2657_v43 = vmul.f32 %v4578_v61, %v2656_v45  ;;  %v4413_v34 = vunpack.i.l.bf16 %v4412_v39  ;;  %v4414_v27 = vunpack.i.h.bf16 %v4412_v39  ;;  %vm2837_vm1 = vcmp.eq.f32.partialorder %v2836_v51, 8.507059e+37  ;;  %v2706_v39 = vld [vmem:[#allocation17 + $0xa0] sm:$0xff] }
 0xec8   :  { %v2658_v17 = vadd.f32 %v4578_v61, %v2657_v43  ;;  %2697 = vmatpush.msra.mxu0 %v4413_v34  ;;  %v5956_v43 = vld [vmem:[#allocation17 + $0xd8] sm:$0xff] }
 0xec9   :  { %v4580_v41 = vpop.eup %4579 }
 0xeca   :  { %v2828_v44 = vmul.f32 %v4580_v41, %v2823_v14  ;;  %v2826_v52 = vpop.xlane.xlu1 %2825  ;;  %v4417_v46 = vpop.permute.xlu2 %4416  ;;  %2698 = vmatpush.msra.mxu0 %v4414_v27  ;;  %v2662_v19 = vsel %vm5935_vm10, %v4578_v61, %v2658_v17  ;;  %vm2833_vm12 = vweird.f32 %v4580_v41  ;;  %v5960_v17 = vld [vmem:[#allocation17 + $0xd0] sm:$0xff] }
 0xecb   :  { %4581 = vrcp.f32 %v2826_v52  ;;  %4297 = vmatmul.msk.f32.vlgmr.msra.gmra.mxu0 %vm624_vm15, %v2653_v59  ;;  %v4418_v49 = vunpack.i.l.bf16 %v4417_v46  ;;  %v4419_v18 = vunpack.i.h.bf16 %v4417_v46  ;;  %v2667_v35 = vsel %vm2664_vm11, %v2666_v38, %v2662_v19  ;;  %vm2834_vm0 = vmor %vm2832_vm13, %vm2833_vm12  ;;  %v2404_v27 = vpop.f32.mrf.mxu0  ;;  %v5972_v59 = vld [vmem:[#allocation17 + $0x98] sm:$0xff] }
 0xecc   :  { %v2829_v31 = vsub.f32 1.0, %v2828_v44  ;;  %v2668_v5 = vmul.f32 %v5904_v12, %v2667_v35  ;;  %v2853_v2 = vand.u32 2147483648, %v2826_v52  ;;  %vm2847_vm3 = vweird.f32 %v2826_v52  ;;  %2757 = vmatpush.msra.mxu2 %v5972_v59  ;;  %v5981_v44 = vld [vmem:[#allocation17 + $0x80] sm:$0xff] }
 0xecd   :  { %2883 = vmatpush.msrb.mxu0 %v4418_v49  ;;  %v2851_v3 = vand.u32 2147483647, %v2826_v52  ;;  %v5991_v46 = vadd.f32 %v5830_v57, %v2404_v27 }
 0xece   :  { %v2830_v28 = vmul.f32 %v4580_v41, %v2829_v31  ;;  %v2854_v61 = vor.u32 1.1754944e-38, %v2853_v2  ;;  %2758 = vmatpush.msra.mxu2 %v5975_v63  ;;  %v6002_v2 = vadd.f32 %v5841_v20, %v5892_v29  ;;  %v6014_v29 = vadd.f32 %v5841_v20, %v5894_v0 }
 0xecf   :  { %2884 = vmatpush.msrb.mxu0 %v4419_v18  ;;  %vm2852_vm5 = vcmp.eq.f32.partialorder %v2851_v3, 8.507059e+37 }
 0xed0   :  { %v2831_v36 = vadd.f32 %v4580_v41, %v2830_v28  ;;  %2759 = vmatpush.msra.mxu2 %v5978_v23 }
 0xed1   :  { %v4582_v48 = vpop.eup %4581 }
 0xed2   :  { %v2843_v53 = vmul.f32 %v4582_v48, %v2826_v52  ;;  %v2500_v1 = vpop.xlane.xlu1 %2499  ;;  %v2835_v55 = vsel %vm2834_vm0, %v4580_v41, %v2831_v36  ;;  %vm2848_vm2 = vweird.f32 %v4582_v48  ;;  %2760 = vmatpush.msra.mxu2 %v5981_v44 }
 0xed3   :  { %v2504_v60 = vsub.f32 %v5918_v62, %v2500_v1  ;;  %4298 = vmatmul.msk.f32.gmra.mxu0 %vm624_vm15, %v2668_v5  ;;  %v2840_v42 = vsel %vm2837_vm1, %v2839_v4, %v2835_v55  ;;  %vm2849_vm4 = vmor %vm2847_vm3, %vm2848_vm2  ;;  %v2407_v41 = vpop.f32.mrf.mxu0 }
 0xed4   :  { %v2844_v30 = vsub.f32 1.0, %v2843_v53  ;;  %v2841_v12 = vmul.f32 %v5908_v50, %v2840_v42  ;;  %v2709_v50 = vld [vmem:[#allocation17 + $0xb8] sm:$0xff]  ;;  %v2934_v42 = vpop.permute.xlu2 %2933 }
 0xed5   :  { %v2506_v32 = vmul.f32 1.442695, %v2504_v60  ;;  %2728 = vmatpush.msra.mxu1 %v2709_v50 }
 0xed6   :  { %v2845_v25 = vmul.f32 %v4582_v48, %v2844_v30 }
 0xed7   :  { %4583 = vpow2.f32 %v2506_v32  ;;  %2729 = vmatpush.msra.mxu1 %v2708_v56 }
 0xed8   :  { %v2846_v7 = vadd.f32 %v4582_v48, %v2845_v25 }
 0xeda   :  { %v2503_v8 = vpop.xlane.xlu1 %2502  ;;  %v2850_v54 = vsel %vm2849_vm4, %v4582_v48, %v2846_v7 }
 0xedb   :  { %v2505_v62 = vsub.f32 %v5922_v37, %v2503_v8  ;;  %4307 = vmatmul.msk.f32.vlgmr.msrb.gmra.mxu0 %vm624_vm15, %v2841_v12  ;;  %v2855_v16 = vsel %vm2852_vm5, %v2854_v61, %v2850_v54  ;;  %v2707_v37 = vld [vmem:[#allocation17 + $0xa8] sm:$0xff] }
 0xedc   :  { %v2856_v45 = vmul.f32 %v5914_v58, %v2855_v16  ;;  %2730 = vmatpush.msra.mxu1 %v2707_v37  ;;  %v5963_v58 = vld [vmem:[#allocation17 + $0xc8] sm:$0xff] }
 0xedd   :  { %v5948_v10 = vpop.eup %4583  ;;  %v2508_v9 = vmul.f32 1.442695, %v2505_v62 }
 0xede   :  { %v2510_v14 = vsel %vm624_vm15, %v5948_v10, 0.0  ;;  %2731 = vmatpush.msra.mxu1 %v2706_v39 }
 0xedf   :  { %4585 = vpow2.f32 %v2508_v9  ;;  %2511 = vadd.xlane.f32.xlu0 %v2510_v14 }
 0xee0   :  { %2914 = vmatpush.msrb.mxu1 %v5956_v43 }
 0xee2   :  { %2915 = vmatpush.msrb.mxu1 %v5960_v17 }
 0xee3   :  { %4308 = vmatmul.msk.f32.gmra.mxu0 %vm624_vm15, %v2856_v45 }
 0xee4   :  { %2916 = vmatpush.msrb.mxu1 %v5963_v58 }
 0xee5   :  { %v5954_v6 = vpop.eup %4585 }
 0xee6   :  { %v2513_v34 = vsel %vm624_vm15, %v5954_v6, 0.0  ;;  %2917 = vmatpush.msrb.mxu1 %v5969_v24 }
 0xee7   :  { %2514 = vadd.xlane.f32.xlu1 %v2513_v34 }
 0xf00   :  { %2931 = vrot.lane.b32.xlu1 %v5846_v11, %s5036_s8  ;;  %v5985_v11 = vadd.f32 %v5830_v57, %v2407_v41 }
 0xf48   :  { %v2700_v52 = vpop.f32.mrf.mxu0 }
 0xf49   :  { %4299 = vmatmul.msk.f32.vlgmr.msra.gmra.mxu1 %vm586_vm14, %v2700_v52 }
 0xf4a   :  { %4319 = vmatpush.xpose.msk.msra.mxu1 %vm586_vm14, %v5985_v11 }
 0xf4e   :  { %4320 = vmatpush.xpose.msk.msra.mxu1 %vm586_vm14, %v5991_v46 }
 0xf50   :  { %v2703_v19 = vpop.f32.mrf.mxu0 }
 0xf51   :  { %4300 = vmatmul.msk.f32.gmra.mxu1 %vm586_vm14, %v2703_v19 }
 0xf52   :  { %v2512_v38 = vpop.xlane.xlu0 %2511 }
 0xf53   :  { %4587 = vrcp.f32 %v2512_v38  ;;  %v2527_v57 = vand.u32 2147483648, %v2512_v38  ;;  %v2525_v40 = vand.u32 2147483647, %v2512_v38  ;;  %vm2521_vm7 = vweird.f32 %v2512_v38 }
 0xf55   :  { %v2528_v53 = vor.u32 1.1754944e-38, %v2527_v57  ;;  %vm2526_vm9 = vcmp.eq.f32.partialorder %v2525_v40, 8.507059e+37 }
 0xf58   :  { %v2886_v31 = vpop.f32.mrf.mxu0 }
 0xf59   :  { %v4588_v49 = vpop.eup %4587  ;;  %4309 = vmatmul.msk.f32.vlgmr.msrb.gmra.mxu1 %vm586_vm14, %v2886_v31 }
 0xf5a   :  { %v2517_v28 = vmul.f32 %v4588_v49, %v2512_v38  ;;  %v2515_v18 = vpop.xlane.xlu1 %2514  ;;  %3352 = vmatpush.msrb.mxu1 %v2709_v50  ;;  %vm2522_vm6 = vweird.f32 %v4588_v49 }
 0xf5b   :  { %4589 = vrcp.f32 %v2515_v18  ;;  %vm2523_vm8 = vmor %vm2521_vm7, %vm2522_vm6  ;;  %v2542_v32 = vand.u32 2147483648, %v2515_v18  ;;  %v2540_v7 = vand.u32 2147483647, %v2515_v18  ;;  %vm2536_vm11 = vweird.f32 %v2515_v18 }
 0xf5c   :  { %v2518_v35 = vsub.f32 1.0, %v2517_v28  ;;  %3353 = vmatpush.msrb.mxu1 %v2708_v56 }
 0xf5d   :  { %v2543_v3 = vor.u32 1.1754944e-38, %v2542_v32  ;;  %vm2541_vm13 = vcmp.eq.f32.partialorder %v2540_v7, 8.507059e+37 }
 0xf5e   :  { %v2519_v36 = vmul.f32 %v4588_v49, %v2518_v35  ;;  %3354 = vmatpush.msrb.mxu1 %v2707_v37 }
 0xf60   :  { %v2520_v48 = vadd.f32 %v4588_v49, %v2519_v36  ;;  %v2889_v51 = vpop.f32.mrf.mxu0  ;;  %3355 = vmatpush.msrb.mxu1 %v2706_v39 }
 0xf61   :  { %v4590_v5 = vpop.eup %4589  ;;  %4310 = vmatmul.msk.f32.gmra.mxu1 %vm586_vm14, %v2889_v51 }
 0xf62   :  { %v2524_v1 = vsel %vm2523_vm8, %v4588_v49, %v2520_v48  ;;  %v2532_v55 = vmul.f32 %v4590_v5, %v2515_v18  ;;  %vm2537_vm10 = vweird.f32 %v4590_v5 }
 0xf63   :  { %v2529_v60 = vsel %vm2526_vm9, %v2528_v53, %v2524_v1  ;;  %vm2538_vm12 = vmor %vm2536_vm11, %vm2537_vm10 }
 0xf64   :  { %v2533_v4 = vsub.f32 1.0, %v2532_v55  ;;  %v2530_v30 = vmul.f32 %v5948_v10, %v2529_v60  ;;  %v2455_v10 = vpop.f32.mrf.mxu1 }
 0xf66   :  { %v2534_v25 = vmul.f32 %v4590_v5, %v2533_v4  ;;  %4291 = vmatmul.msk.f32.vlgmr.msrb.gmra.mxu2 %vm624_vm15, %v2530_v30 }
 0xf67   :  { %4311 = vmatpush.xpose.msk.msrb.mxu2 %vm586_vm14, %v2934_v42 }
 0xf68   :  { %v2535_v12 = vadd.f32 %v4590_v5, %v2534_v25 }
 0xf69   :  { %4321 = vmatmul.msk.f32.vlgmr.msra.gmra.mxu1 %vm586_vm14, %v6002_v2 }
 0xf6a   :  { %v2539_v8 = vsel %vm2538_vm12, %v4590_v5, %v2535_v12  ;;  %3538 = vmatpush.msra.mxu1 %v5956_v43 }
 0xf6b   :  { %v2544_v62 = vsel %vm2541_vm13, %v2543_v3, %v2539_v8 }
 0xf6c   :  { %v2545_v54 = vmul.f32 %v5954_v6, %v2544_v62  ;;  %3539 = vmatpush.msra.mxu1 %v5960_v17  ;;  %v2458_v9 = vpop.f32.mrf.mxu1  ;;  %v6034_v6 = vadd.f32 %v5825_v26, %v2455_v10 }
 0xf6d   :  { %v6029_v45 = vadd.f32 %v5825_v26, %v2458_v9 }
 0xf6e   :  { %4292 = vmatmul.msk.f32.gmra.mxu2 %vm624_vm15, %v2545_v54  ;;  %3540 = vmatpush.msra.mxu1 %v5963_v58 }
 0xf70   :  { %3541 = vmatpush.msra.mxu1 %v5969_v24  ;;  %v2928_v24 = vpop.permute.xlu2 %2927 }
 0xf71   :  { %4322 = vmatmul.msk.f32.gmra.mxu1 %vm586_vm14, %v6014_v29 }
 0xf72   :  { %v2932_v61 = vpop.permute.xlu1 %2931 }
 0xf73   :  { %4312 = vmatpush.xpose.msk.msrb.mxu2 %vm586_vm14, %v2932_v61 }
 0xf78   :  { %v2930_v26 = vpop.permute.xlu2 %2929 }
 0xfc6   :  { %v6020_v14 = vpop.f32.mrf.mxu1 }
 0xfce   :  { %v6022_v16 = vpop.f32.mrf.mxu1 }
 0xfd6   :  { %v6024_v50 = vpop.f32.mrf.mxu1 }
 0xfde   :  { %v6026_v56 = vpop.f32.mrf.mxu1 }
 0xfe6   :  { %v3115_v20 = vpop.f32.mrf.mxu1 }
 0xfe7   :  { %v3121_v0 = vmul.f32 0.17677669, %v3115_v20 }
 0xfe9   :  { %v2569_v37 = vpop.f32.mrf.mxu2  ;;  %v3123_v39 = vsel %vm624_vm15, %v3121_v0, -inf }
 0xfea   :  { %4301 = vmatmul.msk.f32.vlgmr.msra.gmra.mxu2 %vm586_vm14, %v2569_v37  ;;  %3124 = vmax.xlane.f32.xlu2 %v3123_v39 }
 0xfeb   :  { %3191 = vmatpush.msra.mxu2 %v6029_v45 }
 0xfed   :  { %3192 = vmatpush.msra.mxu2 %v6034_v6 }
 0xfee   :  { %v3118_v43 = vpop.f32.mrf.mxu1 }
 0xfef   :  { %v3122_v34 = vmul.f32 0.17677669, %v3118_v43 }
 0xff1   :  { %v2572_v17 = vpop.f32.mrf.mxu2  ;;  %v3126_v58 = vsel %vm624_vm15, %v3122_v34, -inf }
 0xff2   :  { %4302 = vmatmul.msk.f32.gmra.mxu2 %vm586_vm14, %v2572_v17  ;;  %3127 = vmax.xlane.f32.xlu1 %v3126_v58 }
 0xffa   :  { %4313 = vmatmul.msk.f32.vlgmr.msrb.gmra.mxu2 %vm586_vm14, %v2928_v24 }
 0xffb   :  { %3381 = vmatpush.msrb.mxu2 %v5972_v59 }
 0xffd   :  { %3382 = vmatpush.msrb.mxu2 %v5975_v63 }
 0xfff   :  { %3383 = vmatpush.msrb.mxu2 %v5978_v23 }
0x1001   :  { %3384 = vmatpush.msrb.mxu2 %v5981_v44 }
0x1002   :  { %4314 = vmatmul.msk.f32.gmra.mxu2 %vm586_vm14, %v2930_v26 }
0x100b   :  { %4421 = vrot.lane.b32.xlu1 %v5843_v21, %s5036_s8 }
0x1013   :  { %3557 = vrot.lane.b32.xlu1 %v5985_v11, %s5036_s8 }
0x101b   :  { %3555 = vrot.lane.b32.xlu1 %v5991_v46, %s5036_s8 }
0x1023   :  { %3392 = vrot.lane.b32.xlu1 %v6002_v2, %s5035_s2 }
0x105d   :  { %v3125_v27 = vpop.xlane.xlu2 %3124 }
0x105e   :  { %v3129_v41 = vsub.f32 %v3121_v0, %v3125_v27 }
0x1060   :  { %v3131_v59 = vmul.f32 1.442695, %v3129_v41 }
0x1062   :  { %4591 = vpow2.f32 %v3131_v59 }
0x1065   :  { %v3128_v63 = vpop.xlane.xlu1 %3127 }
0x1066   :  { %v3130_v23 = vsub.f32 %v3122_v34, %v3128_v63 }
0x1068   :  { %v4592_v44 = vpop.eup %4591  ;;  %v3133_v52 = vmul.f32 1.442695, %v3130_v23 }
0x1069   :  { %v3135_v19 = vsel %vm624_vm15, %v4592_v44, 0.0 }
0x106a   :  { %4593 = vpow2.f32 %v3133_v52  ;;  %3136 = vadd.xlane.f32.xlu0 %v3135_v19 }
0x106d   :  { %v6055_v21 = vpop.f32.mrf.mxu2 }
0x1070   :  { %v4594_v38 = vpop.eup %4593 }
0x1071   :  { %v3138_v31 = vsel %vm624_vm15, %v4594_v38, 0.0 }
0x1072   :  { %3139 = vadd.xlane.f32.xlu0 %v3138_v31 }
0x1075   :  { %v6058_v49 = vpop.f32.mrf.mxu2 }
0x107d   :  { %v2960_v28 = vpop.f32.mrf.mxu2  ;;  %v4422_v18 = vpop.permute.xlu1 %4421 }
0x107e   :  { %v2966_v35 = vmul.f32 0.17677669, %v2960_v28  ;;  %v4423_v57 = vunpack.i.l.bf16 %v4422_v18  ;;  %v4424_v36 = vunpack.i.h.bf16 %v4422_v18 }
0x1080   :  { %3042 = vmatpush.msra.mxu3 %v4423_v57  ;;  %v2968_v40 = vsel %vm624_vm15, %v2966_v35, -inf }
0x1081   :  { %2969 = vmax.xlane.f32.xlu0 %v2968_v40 }
0x1082   :  { %3043 = vmatpush.msra.mxu3 %v4424_v36 }
0x1085   :  { %v2963_v48 = vpop.f32.mrf.mxu2  ;;  %v3558_v25 = vpop.permute.xlu1 %3557 }
0x1086   :  { %v2967_v51 = vmul.f32 0.17677669, %v2963_v48 }
0x1088   :  { %v2971_v5 = vsel %vm624_vm15, %v2967_v51, -inf }
0x1089   :  { %2972 = vmax.xlane.f32.xlu0 %v2971_v5 }
0x108d   :  { %v3556_v34 = vpop.permute.xlu1 %3555 }
0x10dd   :  { %v3137_v53 = vpop.xlane.xlu0 %3136 }
0x10de   :  { %4595 = vrcp.f32 %v3137_v53  ;;  %v3152_v30 = vand.u32 2147483648, %v3137_v53  ;;  %v3150_v42 = vand.u32 2147483647, %v3137_v53  ;;  %vm3146_vm1 = vweird.f32 %v3137_v53 }
0x10e0   :  { %v3153_v3 = vor.u32 1.1754944e-38, %v3152_v30  ;;  %vm3151_vm3 = vcmp.eq.f32.partialorder %v3150_v42, 8.507059e+37 }
0x10e4   :  { %v4596_v1 = vpop.eup %4595 }
0x10e5   :  { %v3142_v55 = vmul.f32 %v4596_v1, %v3137_v53  ;;  %v3140_v60 = vpop.xlane.xlu0 %3139  ;;  %vm3147_vm0 = vweird.f32 %v4596_v1 }
0x10e6   :  { %4597 = vrcp.f32 %v3140_v60  ;;  %vm3148_vm2 = vmor %vm3146_vm1, %vm3147_vm0  ;;  %v3167_v9 = vand.u32 2147483648, %v3140_v60  ;;  %v3165_v0 = vand.u32 2147483647, %v3140_v60  ;;  %vm3161_vm5 = vweird.f32 %v3140_v60 }
0x10e7   :  { %v3143_v4 = vsub.f32 1.0, %v3142_v55 }
0x10e8   :  { %v3168_v39 = vor.u32 1.1754944e-38, %v3167_v9  ;;  %vm3166_vm7 = vcmp.eq.f32.partialorder %v3165_v0, 8.507059e+37  ;;  %v3393_v0 = vpop.permute.xlu1 %3392 }
0x10e9   :  { %v3144_v32 = vmul.f32 %v4596_v1, %v3143_v4 }
0x10eb   :  { %v3145_v7 = vadd.f32 %v4596_v1, %v3144_v32 }
0x10ec   :  { %v4598_v12 = vpop.eup %4597 }
0x10ed   :  { %v3149_v8 = vsel %vm3148_vm2, %v4596_v1, %v3145_v7  ;;  %v3157_v62 = vmul.f32 %v4598_v12, %v3140_v60  ;;  %vm3162_vm4 = vweird.f32 %v4598_v12 }
0x10ee   :  { %v3154_v54 = vsel %vm3151_vm3, %v3153_v3, %v3149_v8  ;;  %vm3163_vm6 = vmor %vm3161_vm5, %vm3162_vm4 }
0x10ef   :  { %v3155_v61 = vmul.f32 %v4592_v44, %v3154_v54  ;;  %v3158_v10 = vsub.f32 1.0, %v3157_v62 }
0x10f1   :  { %v3159_v20 = vmul.f32 %v4598_v12, %v3158_v10  ;;  %4323 = vmatmul.msk.f32.vlgmr.msra.gmra.mxu2 %vm624_vm15, %v3155_v61 }
0x10f2   :  { %4343 = vmatpush.xpose.msk.msra.mxu2 %vm586_vm14, %v3558_v25 }
0x10f3   :  { %v3160_v37 = vadd.f32 %v4598_v12, %v3159_v20 }
0x10f4   :  { %v2970_v43 = vpop.xlane.xlu0 %2969 }
0x10f5   :  { %v2974_v17 = vsub.f32 %v2966_v35, %v2970_v43  ;;  %v3164_v58 = vsel %vm3163_vm6, %v4598_v12, %v3160_v37  ;;  %v6102_v43 = vld [vmem:[#allocation17 + $0xf0] sm:$0xff] }
0x10f6   :  { %4344 = vmatpush.xpose.msk.msra.mxu2 %vm586_vm14, %v3556_v34  ;;  %v3169_v24 = vsel %vm3166_vm7, %v3168_v39, %v3164_v58  ;;  %v6100_v39 = vld [vmem:[#allocation17 + $0xf8] sm:$0xff]  ;;  %v6105_v34 = vld [vmem:[#allocation17 + $0xe8] sm:$0xff] }
0x10f7   :  { %v2976_v26 = vmul.f32 1.442695, %v2974_v17  ;;  %v3170_v27 = vmul.f32 %v4594_v38, %v3169_v24  ;;  %3073 = vmatpush.msra.mxu0 %v6100_v39  ;;  %v6109_v17 = vld [vmem:[#allocation17 + $0xe0] sm:$0xff] }
0x10f9   :  { %4599 = vpow2.f32 %v2976_v26  ;;  %4324 = vmatmul.msk.f32.gmra.mxu2 %vm624_vm15, %v3170_v27  ;;  %3074 = vmatpush.msra.mxu0 %v6102_v43 }
0x10fb   :  { %3075 = vmatpush.msra.mxu0 %v6105_v34 }
0x10fc   :  { %v2973_v41 = vpop.xlane.xlu0 %2972 }
0x10fd   :  { %v2975_v59 = vsub.f32 %v2967_v51, %v2973_v41  ;;  %3076 = vmatpush.msra.mxu0 %v6109_v17 }
0x10ff   :  { %v4600_v63 = vpop.eup %4599  ;;  %v2978_v23 = vmul.f32 1.442695, %v2975_v59 }
0x1100   :  { %v2980_v44 = vsel %vm624_vm15, %v4600_v63, 0.0 }
0x1101   :  { %4601 = vpow2.f32 %v2978_v23  ;;  %2981 = vadd.xlane.f32.xlu0 %v2980_v44 }
0x1107   :  { %v4602_v52 = vpop.eup %4601 }
0x1108   :  { %v2983_v19 = vsel %vm624_vm15, %v4602_v52, 0.0 }
0x1109   :  { %2984 = vadd.xlane.f32.xlu2 %v2983_v19 }
0x1115   :  { %3210 = vrot.lane.b32.xlu0 %v5985_v11, %s5034_s30 }
0x111d   :  { %3204 = vrot.lane.b32.xlu0 %v6002_v2, %s5034_s30 }
0x1121   :  { %3208 = vrot.lane.b32.xlu2 %v5991_v46, %s5034_s30 }
0x1125   :  { %3398 = vrot.lane.b32.xlu0 %v5985_v11, %s5035_s2 }
0x1129   :  { %3206 = vrot.lane.b32.xlu2 %v6014_v29, %s5034_s30 }
0x112d   :  { %3396 = vrot.lane.b32.xlu0 %v5991_v46, %s5035_s2 }
0x1131   :  { %3551 = vrot.lane.b32.xlu2 %v6002_v2, %s5036_s8 }
0x1135   :  { %3394 = vrot.lane.b32.xlu0 %v6014_v29, %s5035_s2 }
0x1139   :  { %3553 = vrot.lane.b32.xlu2 %v6014_v29, %s5036_s8 }
0x1174   :  { %v3194_v38 = vpop.f32.mrf.mxu2  ;;  %v2982_v31 = vpop.xlane.xlu0 %2981 }
0x1175   :  { %4603 = vrcp.f32 %v2982_v31  ;;  %4333 = vmatmul.msk.f32.vlgmr.msrb.gmra.mxu2 %vm586_vm14, %v3194_v38  ;;  %v2997_v2 = vand.u32 2147483648, %v2982_v31  ;;  %v2995_v36 = vand.u32 2147483647, %v2982_v31  ;;  %vm2991_vm9 = vweird.f32 %v2982_v31 }
0x1177   :  { %v2998_v48 = vor.u32 1.1754944e-38, %v2997_v2  ;;  %vm2996_vm11 = vcmp.eq.f32.partialorder %v2995_v36, 8.507059e+37 }
0x117b   :  { %v4604_v11 = vpop.eup %4603 }
0x117c   :  { %v2987_v28 = vmul.f32 %v4604_v11, %v2982_v31  ;;  %v3197_v18 = vpop.f32.mrf.mxu2  ;;  %v2985_v35 = vpop.xlane.xlu2 %2984  ;;  %vm2992_vm8 = vweird.f32 %v4604_v11 }
0x117d   :  { %4605 = vrcp.f32 %v2985_v35  ;;  %4334 = vmatmul.msk.f32.gmra.mxu2 %vm586_vm14, %v3197_v18  ;;  %vm2993_vm10 = vmor %vm2991_vm9, %vm2992_vm8  ;;  %v3012_v4 = vand.u32 2147483648, %v2985_v35  ;;  %v3010_v42 = vand.u32 2147483647, %v2985_v35  ;;  %vm3006_vm13 = vweird.f32 %v2985_v35 }
0x117e   :  { %v2988_v46 = vsub.f32 1.0, %v2987_v28 }
0x117f   :  { %v3013_v7 = vor.u32 1.1754944e-38, %v3012_v4  ;;  %vm3011_vm1 = vcmp.eq.f32.partialorder %v3010_v42, 8.507059e+37 }
0x1180   :  { %v2989_v57 = vmul.f32 %v4604_v11, %v2988_v46 }
0x1182   :  { %v2990_v40 = vadd.f32 %v4604_v11, %v2989_v57 }
0x1183   :  { %v4606_v29 = vpop.eup %4605 }
0x1184   :  { %v2994_v51 = vsel %vm2993_vm10, %v4604_v11, %v2990_v40  ;;  %v3002_v5 = vmul.f32 %v4606_v29, %v2985_v35  ;;  %v3209_v53 = vpop.permute.xlu2 %3208  ;;  %vm3007_vm12 = vweird.f32 %v4606_v29 }
0x1185   :  { %v2999_v1 = vsel %vm2996_vm11, %v2998_v48, %v2994_v51  ;;  %vm3008_vm0 = vmor %vm3006_vm13, %vm3007_vm12 }
0x1186   :  { %v3000_v55 = vmul.f32 %v4600_v63, %v2999_v1  ;;  %v3003_v60 = vsub.f32 1.0, %v3002_v5 }
0x1187   :  { %v3211_v30 = vpop.permute.xlu0 %3210 }
0x1188   :  { %v3004_v32 = vmul.f32 %v4606_v29, %v3003_v60  ;;  %4315 = vmatmul.msk.f32.vlgmr.msra.gmra.mxu3 %vm624_vm15, %v3000_v55 }
0x1189   :  { %4325 = vmatpush.xpose.msk.msrb.mxu3 %vm586_vm14, %v3211_v30 }
0x118a   :  { %v3005_v25 = vadd.f32 %v4606_v29, %v3004_v32 }
0x118c   :  { %v3207_v12 = vpop.permute.xlu2 %3206  ;;  %v3009_v3 = vsel %vm3008_vm0, %v4606_v29, %v3005_v25 }
0x118d   :  { %4326 = vmatpush.xpose.msk.msrb.mxu3 %vm586_vm14, %v3209_v53  ;;  %v3014_v8 = vsel %vm3011_vm1, %v3013_v7, %v3009_v3 }
0x118e   :  { %v3015_v62 = vmul.f32 %v4602_v52, %v3014_v8 }
0x118f   :  { %v3205_v54 = vpop.permute.xlu0 %3204 }
0x1190   :  { %4316 = vmatmul.msk.f32.gmra.mxu3 %vm624_vm15, %v3015_v62 }
0x1194   :  { %v3552_v61 = vpop.permute.xlu2 %3551 }
0x1195   :  { %4345 = vmatmul.msk.f32.vlgmr.msra.gmra.mxu2 %vm586_vm14, %v3552_v61 }
0x1197   :  { %v3399_v10 = vpop.permute.xlu0 %3398 }
0x1198   :  { %4327 = vmatmul.msk.f32.vlgmr.msrb.gmra.mxu3 %vm586_vm14, %v3205_v54 }
0x1199   :  { %4335 = vmatpush.xpose.msk.msra.mxu3 %vm586_vm14, %v3399_v10 }
0x119c   :  { %v3554_v9 = vpop.permute.xlu2 %3553 }
0x119d   :  { %4346 = vmatmul.msk.f32.gmra.mxu2 %vm586_vm14, %v3554_v9 }
0x119f   :  { %v3397_v20 = vpop.permute.xlu0 %3396 }
0x11a0   :  { %4328 = vmatmul.msk.f32.gmra.mxu3 %vm586_vm14, %v3207_v12 }
0x11a1   :  { %4336 = vmatpush.xpose.msk.msra.mxu3 %vm586_vm14, %v3397_v20 }
0x11a7   :  { %v3395_v37 = vpop.permute.xlu0 %3394 }
0x11a8   :  { %4337 = vmatmul.msk.f32.vlgmr.msra.gmra.mxu3 %vm586_vm14, %v3393_v0 }
0x11b0   :  { %4338 = vmatmul.msk.f32.gmra.mxu3 %vm586_vm14, %v3395_v37 }
0x11f8   :  { %v6112_v58 = vpop.f32.mrf.mxu2 }
0x1200   :  { %v6115_v26 = vpop.f32.mrf.mxu2 }
0x120b   :  { %v3045_v24 = vpop.f32.mrf.mxu3 }
0x120c   :  { %4317 = vmatmul.msk.f32.vlgmr.msra.gmra.mxu0 %vm586_vm14, %v3045_v24 }
0x1213   :  { %v3048_v27 = vpop.f32.mrf.mxu3 }
0x1214   :  { %4318 = vmatmul.msk.f32.gmra.mxu0 %vm586_vm14, %v3048_v27 }
0x1218   :  { %v3584_v41 = vpop.f32.mrf.mxu2 }
0x1219   :  { %v3590_v59 = vmul.f32 0.17677669, %v3584_v41 }
0x121b   :  { %v3237_v63 = vpop.f32.mrf.mxu3  ;;  %v3592_v23 = vsel %vm624_vm15, %v3590_v59, -inf }
0x121c   :  { %v3243_v44 = vmul.f32 0.17677669, %v3237_v63  ;;  %3593 = vmax.xlane.f32.xlu0 %v3592_v23  ;;  %v4425_v23 = vpack.i.bf16 %v6034_v6, %v6029_v45  ;;  %v6161_v45 = vld [vmem:[%s6358_s13 + $0x1] ss:$0 sm:$0xff] }
0x121e   :  { %v3245_v52 = vsel %vm624_vm15, %v3243_v44, -inf }
0x121f   :  { %3246 = vmax.xlane.f32.xlu1 %v3245_v52  ;;  %v2763_v52 = vadd.f32 %v6055_v21, %v6020_v14 }
0x1220   :  { %v3587_v11 = vpop.f32.mrf.mxu2 }
0x1221   :  { %v3591_v28 = vmul.f32 0.17677669, %v3587_v11 }
0x1223   :  { %v3240_v19 = vpop.f32.mrf.mxu3  ;;  %v3595_v2 = vsel %vm624_vm15, %v3591_v28, -inf }
0x1224   :  { %v3244_v38 = vmul.f32 0.17677669, %v3240_v19  ;;  %v2925_v19 = vadd.f32 %v6024_v50, %v2763_v52 }
0x1226   :  { %v3248_v31 = vsel %vm624_vm15, %v3244_v38, -inf }
0x1227   :  { %3249 = vmax.xlane.f32.xlu2 %v3248_v31 }
0x122b   :  { %v3425_v18 = vpop.f32.mrf.mxu3 }
0x122c   :  { %v3431_v35 = vmul.f32 0.17677669, %v3425_v18 }
0x122e   :  { %v3433_v46 = vsel %vm624_vm15, %v3431_v35, -inf }
0x122f   :  { %3434 = vmax.xlane.f32.xlu1 %v3433_v46  ;;  %3596 = vmax.xlane.f32.xlu2 %v3595_v2 }
0x1233   :  { %v3428_v57 = vpop.f32.mrf.mxu3 }
0x1234   :  { %v3432_v36 = vmul.f32 0.17677669, %v3428_v57 }
0x1236   :  { %v3436_v40 = vsel %vm624_vm15, %v3432_v36, -inf }
0x1237   :  { %3437 = vmax.xlane.f32.xlu0 %v3436_v40 }
0x128f   :  { %v3594_v29 = vpop.xlane.xlu0 %3593 }
0x1290   :  { %v3598_v48 = vsub.f32 %v3590_v59, %v3594_v29 }
0x1292   :  { %v3600_v51 = vmul.f32 1.442695, %v3598_v48  ;;  %v3247_v5 = vpop.xlane.xlu1 %3246 }
0x1293   :  { %v3251_v53 = vsub.f32 %v3243_v44, %v3247_v5  ;;  %v3078_v44 = vpop.f32.mrf.mxu0 }
0x1294   :  { %4607 = vpow2.f32 %v3600_v51  ;;  %v3084_v31 = vadd.f32 %v3078_v44, %v2925_v19 }
0x1295   :  { %v3253_v1 = vmul.f32 1.442695, %v3251_v53 }
0x1296   :  { %v3715_v11 = vadd.f32 %v6161_v45, %v3084_v31 }
0x1297   :  { %4609 = vpow2.f32 %v3253_v1 }
0x129a   :  { %v6124_v55 = vpop.eup %4607  ;;  %v3250_v60 = vpop.xlane.xlu2 %3249 }
0x129b   :  { %v3252_v4 = vsub.f32 %v3244_v38, %v3250_v60  ;;  %v3604_v30 = vsel %vm624_vm15, %v6124_v55, 0.0  ;;  %v2766_v38 = vadd.f32 %v6058_v49, %v6022_v16  ;;  %v3081_v6 = vpop.f32.mrf.mxu0 }
0x129c   :  { %3605 = vadd.xlane.f32.xlu0 %v3604_v30 }
0x129d   :  { %v6128_v32 = vpop.eup %4609  ;;  %v3255_v42 = vmul.f32 1.442695, %v3252_v4 }
0x129e   :  { %v3257_v25 = vsel %vm624_vm15, %v6128_v32, 0.0 }
0x129f   :  { %4611 = vpow2.f32 %v3255_v42  ;;  %3258 = vadd.xlane.f32.xlu1 %v3257_v25 }
0x12a2   :  { %v3435_v7 = vpop.xlane.xlu1 %3434  ;;  %v3597_v12 = vpop.xlane.xlu2 %3596 }
0x12a3   :  { %v3439_v3 = vsub.f32 %v3431_v35, %v3435_v7  ;;  %v3599_v8 = vsub.f32 %v3591_v28, %v3597_v12  ;;  %v2926_v28 = vadd.f32 %v6026_v56, %v2766_v38  ;;  %v6166_v35 = vadd.f32 %v3715_v11, %v5746_v15 }
0x12a5   :  { %v6132_v62 = vpop.eup %4611  ;;  %v3441_v54 = vmul.f32 1.442695, %v3439_v3  ;;  %v3602_v61 = vmul.f32 1.442695, %v3599_v8  ;;  %v3085_v18 = vadd.f32 %v3081_v6, %v2926_v28 }
0x12a6   :  { %v3260_v10 = vsel %vm624_vm15, %v6132_v62, 0.0 }
0x12a7   :  { %4613 = vpow2.f32 %v3441_v54  ;;  %3261 = vadd.xlane.f32.xlu2 %v3260_v10  ;;  %v3716_v14 = vadd.f32 %v6161_v45, %v3085_v18 }
0x12a8   :  { %4615 = vpow2.f32 %v3602_v61 }
0x12a9   :  { %v6171_v16 = vadd.f32 %v3716_v14, %v5751_v47 }
0x12aa   :  { %v3438_v9 = vpop.xlane.xlu0 %3437 }
0x12ab   :  { %v3440_v20 = vsub.f32 %v3432_v36, %v3438_v9 }
0x12ad   :  { %v6136_v0 = vpop.eup %4613  ;;  %v3443_v37 = vmul.f32 1.442695, %v3440_v20 }
0x12ae   :  { %v6138_v24 = vpop.eup %4615  ;;  %v3445_v27 = vsel %vm624_vm15, %v6136_v0, 0.0 }
0x12af   :  { %4617 = vpow2.f32 %v3443_v37  ;;  %3446 = vadd.xlane.f32.xlu1 %v3445_v27  ;;  %v3607_v41 = vsel %vm624_vm15, %v6138_v24, 0.0 }
0x12b0   :  { %3608 = vadd.xlane.f32.xlu0 %v3607_v41 }
0x12b5   :  { %v6144_v59 = vpop.eup %4617 }
0x12b6   :  { %v3448_v63 = vsel %vm624_vm15, %v6144_v59, 0.0 }
0x12b7   :  { %3449 = vadd.xlane.f32.xlu1 %v3448_v63 }
0x12bf   :  { %4426 = vrot.lane.b32.xlu2 %v4425_v23, %s5034_s30 }
0x12c4   :  { %4431 = vrot.lane.b32.xlu0 %v4425_v23, %s5036_s8 }
0x12d0   :  { %4436 = vrot.lane.b32.xlu1 %v4425_v23, %s5035_s2 }
0x12e8   :  { %3727 = vadd.xlane.f32.xlu2 %v6166_v35 }
0x12ee   :  { %3729 = vadd.xlane.f32.xlu0 %v6171_v16 }
0x130f   :  { %v6174_v21 = vpop.xlane.xlu0 %3605 }
0x1310   :  { %v3621_v38 = vand.u32 2147483648, %v6174_v21  ;;  %vm3615_vm11 = vweird.f32 %v6174_v21  ;;  %v3619_v6 = vand.u32 2147483647, %v6174_v21 }
0x1312   :  { %v3259_v50 = vpop.xlane.xlu1 %3258  ;;  %vm3620_vm13 = vcmp.eq.f32.partialorder %v3619_v6, 8.507059e+37  ;;  %v3842_v6 = vld [vmem:[#allocation20 + $0x1a0] sm:$0xff] }
0x1313   :  { %4619 = vrcp.f32 %v3259_v50  ;;  %v3274_v40 = vand.u32 2147483648, %v3259_v50  ;;  %vm3268_vm3 = vweird.f32 %v3259_v50  ;;  %v3272_v29 = vand.u32 2147483647, %v3259_v50 }
0x1314   :  { %4621 = vrcp.f32 %v6174_v21 }
0x1315   :  { %v3275_v4 = vor.u32 1.1754944e-38, %v3274_v40  ;;  %vm3273_vm5 = vcmp.eq.f32.partialorder %v3272_v29, 8.507059e+37 }
0x1319   :  { %v4620_v49 = vpop.eup %4619 }
0x131a   :  { %v3264_v56 = vmul.f32 %v4620_v49, %v3259_v50  ;;  %v3262_v46 = vpop.xlane.xlu2 %3261  ;;  %vm3269_vm2 = vweird.f32 %v4620_v49  ;;  %v4622_v57 = vpop.eup %4621  ;;  %v3622_v50 = vor.u32 1.1754944e-38, %v3621_v38  ;;  %v3845_v38 = vld [vmem:[#allocation20 + $0x1b8] sm:$0xff] }
0x131b   :  { %4623 = vrcp.f32 %v3262_v46  ;;  %vm3270_vm4 = vmor %vm3268_vm3, %vm3269_vm2  ;;  %v3611_v60 = vmul.f32 %v4622_v57, %v6174_v21  ;;  %v3289_v8 = vand.u32 2147483648, %v3262_v46  ;;  %vm3283_vm7 = vweird.f32 %v3262_v46 }
0x131c   :  { %v3265_v15 = vsub.f32 1.0, %v3264_v56  ;;  %v3287_v10 = vand.u32 2147483647, %v3262_v46  ;;  %vm3616_vm10 = vweird.f32 %v4622_v57 }
0x131d   :  { %v3612_v12 = vsub.f32 1.0, %v3611_v60  ;;  %v3290_v27 = vor.u32 1.1754944e-38, %v3289_v8  ;;  %vm3617_vm12 = vmor %vm3615_vm11, %vm3616_vm10 }
0x131e   :  { %v3266_v2 = vmul.f32 %v4620_v49, %v3265_v15  ;;  %vm3288_vm9 = vcmp.eq.f32.partialorder %v3287_v10, 8.507059e+37 }
0x131f   :  { %v3613_v37 = vmul.f32 %v4622_v57, %v3612_v12 }
0x1320   :  { %v3267_v36 = vadd.f32 %v4620_v49, %v3266_v2 }
0x1321   :  { %v4624_v47 = vpop.eup %4623 }
0x1322   :  { %v3279_v48 = vmul.f32 %v4624_v47, %v3262_v46  ;;  %v6177_v51 = vpop.xlane.xlu1 %3446  ;;  %v3271_v5 = vsel %vm3270_vm4, %v4620_v49, %v3267_v36  ;;  %v4427_v1 = vpop.permute.xlu2 %4426  ;;  %vm3284_vm6 = vweird.f32 %v4624_v47 }
0x1323   :  { %v6179_v53 = vpop.xlane.xlu0 %3608  ;;  %v3276_v42 = vsel %vm3273_vm5, %v3275_v4, %v3271_v5  ;;  %v4428_v7 = vunpack.i.l.bf16 %v4427_v1  ;;  %v4429_v54 = vunpack.i.h.bf16 %v4427_v1  ;;  %vm3285_vm8 = vmor %vm3283_vm7, %vm3284_vm6  ;;  %v3462_v5 = vand.u32 2147483648, %v6177_v51 }
0x1324   :  { %v3280_v30 = vsub.f32 1.0, %v3279_v48  ;;  %4625 = vrcp.f32 %v6179_v53  ;;  %v3277_v61 = vmul.f32 %v6128_v32, %v3276_v42  ;;  %v3614_v32 = vadd.f32 %v4622_v57, %v3613_v37 }
0x1325   :  { %4627 = vrcp.f32 %v6177_v51  ;;  %3321 = vmatpush.msrb.mxu0 %v4428_v7  ;;  %v3636_v36 = vand.u32 2147483648, %v6179_v53  ;;  %vm3630_vm1 = vweird.f32 %v6179_v53  ;;  %vm3456_vm4 = vweird.f32 %v6177_v51 }
0x1326   :  { %v3281_v25 = vmul.f32 %v4624_v47, %v3280_v30  ;;  %v3618_v11 = vsel %vm3617_vm12, %v4622_v57, %v3614_v32  ;;  %v3634_v57 = vand.u32 2147483647, %v6179_v53  ;;  %v3460_v60 = vand.u32 2147483647, %v6177_v51  ;;  %v3846_v32 = vld [vmem:[#allocation20 + $0x1c0] sm:$0xff] }
0x1327   :  { %3322 = vmatpush.msrb.mxu0 %v4429_v54  ;;  %v3623_v56 = vsel %vm3620_vm13, %v3622_v50, %v3618_v11  ;;  %v3637_v1 = vor.u32 1.1754944e-38, %v3636_v36  ;;  %v3463_v30 = vor.u32 1.1754944e-38, %v3462_v5  ;;  %v3843_v11 = vld [vmem:[#allocation20 + $0x1a8] sm:$0xff]  ;;  %v3832_v36 = vld [vmem:[#allocation20 + $0x150] sm:$0xff]  ;;  %v3829_v5 = vld [vmem:[#allocation20 + $0x138] sm:$0xff] }
0x1328   :  { %v3282_v3 = vadd.f32 %v4624_v47, %v3281_v25  ;;  %4329 = vmatmul.msk.f32.vlgmr.msrb.gmra.mxu0 %vm624_vm15, %v3277_v61  ;;  %v3624_v40 = vmul.f32 %v6124_v55, %v3623_v56  ;;  %vm3635_vm5 = vcmp.eq.f32.partialorder %v3634_v57, 8.507059e+37  ;;  %vm3461_vm7 = vcmp.eq.f32.partialorder %v3460_v60, 8.507059e+37  ;;  %v3839_v50 = vld [vmem:[#allocation20 + $0x188] sm:$0xff]  ;;  %v3836_v56 = vld [vmem:[#allocation20 + $0x170] sm:$0xff] }
0x1329   :  { %v3831_v57 = vld [vmem:[#allocation20 + $0x148] sm:$0xff] }
0x132a   :  { %v4626_v9 = vpop.eup %4625  ;;  %v3286_v20 = vsel %vm3285_vm8, %v4624_v47, %v3282_v3  ;;  %v6187_v63 = vpop.xlane.xlu1 %3449  ;;  %v3827_v60 = vld [vmem:[#allocation20 + $0x128] sm:$0xff] }
0x132b   :  { %v3626_v41 = vmul.f32 %v4626_v9, %v6179_v53  ;;  %v4628_v23 = vpop.eup %4627  ;;  %v3291_v44 = vsel %vm3288_vm9, %v3290_v27, %v3286_v20  ;;  %4629 = vrcp.f32 %v6187_v63  ;;  %vm3631_vm0 = vweird.f32 %v4626_v9 }
0x132c   :  { %v3452_v52 = vmul.f32 %v4628_v23, %v6177_v51  ;;  %v3292_v31 = vmul.f32 %v6132_v62, %v3291_v44  ;;  %vm3632_vm2 = vmor %vm3630_vm1, %vm3631_vm0  ;;  %vm3457_vm3 = vweird.f32 %v4628_v23  ;;  %v3477_v8 = vand.u32 2147483648, %v6187_v63  ;;  %v3849_v44 = vld [vmem:[#allocation20 + $0x1d8] sm:$0xff] }
0x132d   :  { %v3627_v19 = vsub.f32 1.0, %v3626_v41  ;;  %vm3458_vm6 = vmor %vm3456_vm4, %vm3457_vm3  ;;  %vm3471_vm9 = vweird.f32 %v6187_v63  ;;  %v3475_v61 = vand.u32 2147483647, %v6187_v63 }
0x132e   :  { %v3453_v28 = vsub.f32 1.0, %v3452_v52  ;;  %v3478_v10 = vor.u32 1.1754944e-38, %v3477_v8  ;;  %v3847_v52 = vld [vmem:[#allocation20 + $0x1c8] sm:$0xff] }
0x132f   :  { %v3628_v18 = vmul.f32 %v4626_v9, %v3627_v19  ;;  %vm3476_vm11 = vcmp.eq.f32.partialorder %v3475_v61, 8.507059e+37  ;;  %v3844_v19 = vld [vmem:[#allocation20 + $0x1b0] sm:$0xff] }
0x1330   :  { %4330 = vmatmul.msk.f32.gmra.mxu0 %vm624_vm15, %v3292_v31  ;;  %v3454_v15 = vmul.f32 %v4628_v23, %v3453_v28  ;;  %v3840_v28 = vld [vmem:[#allocation20 + $0x190] sm:$0xff] }
0x1331   :  { %v4630_v14 = vpop.eup %4629  ;;  %v3629_v2 = vadd.f32 %v4626_v9, %v3628_v18  ;;  %v3841_v18 = vld [vmem:[#allocation20 + $0x198] sm:$0xff] }
0x1332   :  { %v3467_v62 = vmul.f32 %v4630_v14, %v6187_v63  ;;  %v3455_v47 = vadd.f32 %v4628_v23, %v3454_v15  ;;  %vm3472_vm8 = vweird.f32 %v4630_v14 }
0x1333   :  { %v3633_v48 = vsel %vm3632_vm2, %v4626_v9, %v3629_v2  ;;  %vm3473_vm10 = vmor %vm3471_vm9, %vm3472_vm8  ;;  %v3834_v2 = vld [vmem:[#allocation20 + $0x160] sm:$0xff] }
0x1334   :  { %v3468_v29 = vsub.f32 1.0, %v3467_v62  ;;  %v3638_v55 = vsel %vm3635_vm5, %v3637_v1, %v3633_v48  ;;  %v3459_v4 = vsel %vm3458_vm6, %v4628_v23, %v3455_v47  ;;  %v3848_v23 = vld [vmem:[#allocation20 + $0x1d0] sm:$0xff]  ;;  %v3835_v62 = vld [vmem:[#allocation20 + $0x168] sm:$0xff]  ;;  %v3826_v1 = vld [vmem:[#allocation20 + $0x120] sm:$0xff] }
0x1335   :  { %v3639_v25 = vmul.f32 %v6138_v24, %v3638_v55  ;;  %v3464_v7 = vsel %vm3461_vm7, %v3463_v30, %v3459_v4  ;;  %v3828_v48 = vld [vmem:[#allocation20 + $0x130] sm:$0xff]  ;;  %v3825_v4 = vld [vmem:[#allocation20 + $0x118] sm:$0xff]  ;;  %v3823_v30 = vld [vmem:[#allocation20 + $0x108] sm:$0xff] }
0x1336   :  { %v4432_v49 = vpop.permute.xlu0 %4431  ;;  %v3469_v53 = vmul.f32 %v4630_v14, %v3468_v29  ;;  %v3465_v51 = vmul.f32 %v6136_v0, %v3464_v7  ;;  %v3824_v55 = vld [vmem:[#allocation20 + $0x110] sm:$0xff] }
0x1337   :  { %v4433_v46 = vunpack.i.l.bf16 %v4432_v49  ;;  %v4434_v21 = vunpack.i.h.bf16 %v4432_v49 }
0x1338   :  { %v3470_v3 = vadd.f32 %v4630_v14, %v3469_v53  ;;  %v3822_v53 = vld [vmem:[#allocation20 + $0x100] sm:$0xff] }
0x1339   :  { %3666 = vmatpush.msrb.mxu3 %v4433_v46  ;;  %v3837_v46 = vld [vmem:[#allocation20 + $0x178] sm:$0xff] }
0x133a   :  { %v3474_v24 = vsel %vm3473_vm10, %v4630_v14, %v3470_v3  ;;  %v3838_v14 = vld [vmem:[#allocation20 + $0x180] sm:$0xff] }
0x133b   :  { %3667 = vmatpush.msrb.mxu3 %v4434_v21  ;;  %v3479_v9 = vsel %vm3476_vm11, %v3478_v10, %v3474_v24  ;;  %v3833_v21 = vld [vmem:[#allocation20 + $0x158] sm:$0xff] }
0x133c   :  { %4347 = vmatmul.msk.f32.vlgmr.msrb.gmra.mxu3 %vm624_vm15, %v3624_v40  ;;  %v3480_v0 = vmul.f32 %v6144_v59, %v3479_v9  ;;  %v3851_v59 = vld [vmem:[#allocation20 + $0x1e8] sm:$0xff]  ;;  %v3830_v40 = vld [vmem:[#allocation20 + $0x140] sm:$0xff]  ;;  %v6233_v24 = vld [vmem:[#allocation19 + $0x1] ss:$0 sm:$0xff] }
0x1342   :  { %v4437_v42 = vpop.permute.xlu1 %4436 }
0x1343   :  { %v4438_v12 = vunpack.i.l.bf16 %v4437_v42  ;;  %v4439_v54 = vunpack.i.h.bf16 %v4437_v42 }
0x1344   :  { %4348 = vmatmul.msk.f32.gmra.mxu3 %vm624_vm15, %v3639_v25 }
0x1345   :  { %3507 = vmatpush.msra.mxu0 %v4438_v12 }
0x1347   :  { %3508 = vmatpush.msra.mxu0 %v4439_v54 }
0x1348   :  { %4339 = vmatmul.msk.f32.vlgmr.msra.gmra.mxu0 %vm624_vm15, %v3465_v51 }
0x1349   :  { %3697 = vmatpush.msrb.mxu0 %v6100_v39 }
0x134b   :  { %3698 = vmatpush.msrb.mxu0 %v6102_v43  ;;  %v3852_v43 = vld [vmem:[#allocation20 + $0x1f0] sm:$0xff] }
0x134d   :  { %3699 = vmatpush.msrb.mxu0 %v6105_v34  ;;  %v3853_v34 = vld [vmem:[#allocation20 + $0x1f8] sm:$0xff] }
0x134e   :  { %3890 = vmatpush.msrb.mxu2 %v3853_v34  ;;  %v4006_v34 = vld [vmem:[#allocation22 + $0x170] sm:$0xff] }
0x134f   :  { %3700 = vmatpush.msrb.mxu0 %v6109_v17  ;;  %v3850_v17 = vld [vmem:[#allocation20 + $0x1e0] sm:$0xff] }
0x1350   :  { %4340 = vmatmul.msk.f32.gmra.mxu0 %vm624_vm15, %v3480_v0  ;;  %3891 = vmatpush.msrb.mxu2 %v3851_v59  ;;  %v6239_v0 = vld [vmem:[%s6360_s15 + $0x1] ss:$0 sm:$0xff] }
0x1351   :  { %v4005_v59 = vld [vmem:[#allocation22 + $0x168] sm:$0xff] }
0x1352   :  { %3892 = vmatpush.msrb.mxu2 %v3849_v44 }
0x1354   :  { %3893 = vmatpush.msrb.mxu2 %v3847_v52 }
0x1356   :  { %3894 = vmatpush.msrb.mxu2 %v3845_v38 }
0x1358   :  { %3895 = vmatpush.msrb.mxu2 %v3843_v11 }
0x135a   :  { %3896 = vmatpush.msrb.mxu2 %v3841_v18 }
0x135b   :  { %v3728_v20 = vpop.xlane.xlu2 %3727 }
0x135c   :  { %v3735_v37 = vmul.f32 %v3728_v20, %v5235_v33  ;;  %3897 = vmatpush.msrb.mxu2 %v3839_v50 }
0x135e   :  { %v6220_v27 = vsub.f32 %v6166_v35, %v3735_v37  ;;  %3898 = vmatpush.msrb.mxu2 %v3837_v46 }
0x1360   :  { %v3743_v39 = vmul.f32 %v6220_v27, %v6220_v27  ;;  %3899 = vmatpush.msrb.mxu2 %v3835_v62 }
0x1361   :  { %v6229_v47 = vpop.xlane.xlu0 %3729 }
0x1362   :  { %3747 = vadd.xlane.f32.xlu0 %v3743_v39  ;;  %3900 = vmatpush.msrb.mxu2 %v3833_v21  ;;  %v4018_v21 = vld [vmem:[#allocation22 + $0x1d0] sm:$0xff] }
0x1364   :  { %3901 = vmatpush.msrb.mxu2 %v3831_v57  ;;  %v4017_v57 = vld [vmem:[#allocation22 + $0x1c8] sm:$0xff] }
0x1366   :  { %3902 = vmatpush.msrb.mxu2 %v3829_v5  ;;  %v4015_v5 = vld [vmem:[#allocation22 + $0x1b8] sm:$0xff] }
0x1368   :  { %3903 = vmatpush.msrb.mxu2 %v3827_v60  ;;  %v4014_v60 = vld [vmem:[#allocation22 + $0x1b0] sm:$0xff] }
0x136a   :  { %3904 = vmatpush.msrb.mxu2 %v3825_v4  ;;  %v4013_v4 = vld [vmem:[#allocation22 + $0x1a8] sm:$0xff] }
0x136c   :  { %3905 = vmatpush.msrb.mxu2 %v3823_v30  ;;  %v4012_v30 = vld [vmem:[#allocation22 + $0x1a0] sm:$0xff] }
0x13a5   :  { %v3324_v41 = vpop.f32.mrf.mxu0 }
0x13a6   :  { %4331 = vmatmul.msk.f32.vlgmr.msrb.gmra.mxu1 %vm586_vm14, %v3324_v41 }
0x13a7   :  { %3861 = vmatpush.msrb.mxu1 %v3852_v43  ;;  %v4007_v43 = vld [vmem:[#allocation22 + $0x178] sm:$0xff] }
0x13a8   :  { %4029 = vmatpush.msra.mxu3 %v4007_v43 }
0x13a9   :  { %3862 = vmatpush.msrb.mxu1 %v3850_v17  ;;  %v4023_v17 = vld [vmem:[#allocation22 + $0x1f8] sm:$0xff] }
0x13aa   :  { %4058 = vmatpush.msra.mxu0 %v4023_v17  ;;  %4030 = vmatpush.msra.mxu3 %v4006_v34 }
0x13ab   :  { %3863 = vmatpush.msrb.mxu1 %v3848_v23 }
0x13ac   :  { %4031 = vmatpush.msra.mxu3 %v4005_v59 }
0x13ad   :  { %v3327_v63 = vpop.f32.mrf.mxu0  ;;  %3864 = vmatpush.msrb.mxu1 %v3846_v32 }
0x13ae   :  { %4332 = vmatmul.msk.f32.gmra.mxu1 %vm586_vm14, %v3327_v63 }
0x13af   :  { %3865 = vmatpush.msrb.mxu1 %v3844_v19 }
0x13b1   :  { %3866 = vmatpush.msrb.mxu1 %v3842_v6 }
0x13b3   :  { %3867 = vmatpush.msrb.mxu1 %v3840_v28 }
0x13b5   :  { %3868 = vmatpush.msrb.mxu1 %v3838_v14  ;;  %v3736_v14 = vmul.f32 %v6229_v47, %v5235_v33  ;;  %v3997_v47 = vld [vmem:[#allocation22 + $0x128] sm:$0xff] }
0x13b7   :  { %3869 = vmatpush.msrb.mxu1 %v3836_v56  ;;  %v4022_v56 = vld [vmem:[#allocation22 + $0x1f0] sm:$0xff]  ;;  %v6258_v46 = vsub.f32 %v6171_v16, %v3736_v14 }
0x13b8   :  { %4059 = vmatpush.msra.mxu0 %v4022_v56 }
0x13b9   :  { %3870 = vmatpush.msrb.mxu1 %v3834_v2  ;;  %v4000_v2 = vld [vmem:[#allocation22 + $0x140] sm:$0xff]  ;;  %v3744_v62 = vmul.f32 %v6258_v46, %v6258_v46 }
0x13bb   :  { %3871 = vmatpush.msrb.mxu1 %v3832_v36  ;;  %v3999_v36 = vld [vmem:[#allocation22 + $0x138] sm:$0xff] }
0x13bd   :  { %3872 = vmatpush.msrb.mxu1 %v3830_v40  ;;  %v3998_v40 = vld [vmem:[#allocation22 + $0x130] sm:$0xff] }
0x13bf   :  { %v3669_v31 = vpop.f32.mrf.mxu3  ;;  %3873 = vmatpush.msrb.mxu1 %v3828_v48  ;;  %v3996_v48 = vld [vmem:[#allocation22 + $0x120] sm:$0xff] }
0x13c0   :  { %4349 = vmatmul.msk.f32.vlgmr.msrb.gmra.mxu0 %vm586_vm14, %v3669_v31 }
0x13c1   :  { %3874 = vmatpush.msrb.mxu1 %v3826_v1  ;;  %v3995_v1 = vld [vmem:[#allocation22 + $0x118] sm:$0xff] }
0x13c3   :  { %3875 = vmatpush.msrb.mxu1 %v3824_v55  ;;  %v3994_v55 = vld [vmem:[#allocation22 + $0x110] sm:$0xff] }
0x13c5   :  { %v3510_v49 = vpop.f32.mrf.mxu0  ;;  %3876 = vmatpush.msrb.mxu1 %v3822_v53  ;;  %v3993_v53 = vld [vmem:[#allocation22 + $0x108] sm:$0xff] }
0x13c6   :  { %4341 = vmatmul.msk.f32.vlgmr.msra.gmra.mxu1 %vm586_vm14, %v3510_v49  ;;  %v4003_v49 = vld [vmem:[#allocation22 + $0x158] sm:$0xff] }
0x13c7   :  { %v3672_v15 = vpop.f32.mrf.mxu3 }
0x13c8   :  { %4350 = vmatmul.msk.f32.gmra.mxu0 %vm586_vm14, %v3672_v15  ;;  %v4020_v15 = vld [vmem:[#allocation22 + $0x1e0] sm:$0xff] }
0x13cd   :  { %v3513_v29 = vpop.f32.mrf.mxu0 }
0x13ce   :  { %4342 = vmatmul.msk.f32.gmra.mxu1 %vm586_vm14, %v3513_v29  ;;  %v4016_v29 = vld [vmem:[#allocation22 + $0x1c0] sm:$0xff] }
0x13d5   :  { %v3748_v42 = vpop.xlane.xlu0 %3747 }
0x13d6   :  { %v3755_v25 = vmul.f32 %v3748_v42, %v5235_v33  ;;  %v3992_v42 = vld [vmem:[#allocation22 + $0x100] sm:$0xff] }
0x13d8   :  { %v3759_v7 = vadd.f32 1e-06, %v3755_v25  ;;  %v4011_v25 = vld [vmem:[#allocation22 + $0x198] sm:$0xff] }
0x13da   :  { %4631 = vrsqrt.f32 %v3759_v7  ;;  %vm3769_vm15 = vweird.f32 %v3759_v7 }
0x13e0   :  { %v4632_v12 = vpop.eup %4631 }
0x13e1   :  { %v3764_v3 = vmul.f32 %v4632_v12, %v3759_v7  ;;  %vm3770_vm14 = vweird.f32 %v4632_v12  ;;  %v4010_v7 = vld [vmem:[#allocation22 + $0x190] sm:$0xff] }
0x13e2   :  { %vm3771_vm12 = vmor %vm3769_vm15, %vm3770_vm14 }
0x13e3   :  { %v3765_v8 = vmul.f32 %v4632_v12, %v3764_v3  ;;  %v4009_v3 = vld [vmem:[#allocation22 + $0x188] sm:$0xff] }
0x13e5   :  { %v3766_v54 = vmul.f32 0.5, %v3765_v8 }
0x13e7   :  { %v3767_v51 = vsub.f32 1.5, %v3766_v54  ;;  %v4008_v54 = vld [vmem:[#allocation22 + $0x180] sm:$0xff] }
0x13e9   :  { %v3768_v61 = vmul.f32 %v4632_v12, %v3767_v51 }
0x13eb   :  { %v3772_v10 = vsel %vm3771_vm12, %v4632_v12, %v3768_v61  ;;  %v4353_v12 = vld [vmem:[%s6362_s17 + $0x2] sm:$0x3] }
0x13ec   :  { %v3803_v9 = vmul.f32 %v3772_v10, %v6220_v27  ;;  %v4004_v27 = vld [vmem:[#allocation22 + $0x160] sm:$0xff]  ;;  %v6265_v8 = vperm.slane %v4353_v12, 0 }
0x13ed   :  { %4032 = vmatpush.msra.mxu3 %v4004_v27 }
0x13ee   :  { %v3810_v20 = vmul.f32 %v6233_v24, %v3803_v9  ;;  %v6268_v9 = vperm.slane %v4353_v12, 1 }
0x13ef   :  { %4033 = vmatpush.msra.mxu3 %v4003_v49 }
0x13f0   :  { %v3817_v37 = vadd.f32 %v6239_v0, %v3810_v20 }
0x13f2   :  { %3877 = vmatmul.f32.vlgmr.msrb.gmra.mxu1 %v3817_v37  ;;  %3906 = vmatmul.f32.vlgmr.msrb.gmra.mxu2 %v3817_v37 }
0x1423   :  { %v3357_v39 = vpop.f32.mrf.mxu1 }
0x1424   :  { %v3387_v63 = vadd.f32 %v6112_v58, %v3357_v39 }
0x142b   :  { %v3360_v41 = vpop.f32.mrf.mxu1 }
0x142c   :  { %v3390_v38 = vadd.f32 %v6115_v26, %v3360_v41  ;;  %v4021_v26 = vld [vmem:[#allocation22 + $0x1e8] sm:$0xff] }
0x142d   :  { %4060 = vmatpush.msra.mxu0 %v4021_v26 }
0x142f   :  { %4061 = vmatpush.msra.mxu0 %v4020_v15 }
0x143d   :  { %v3702_v23 = vpop.f32.mrf.mxu0 }
0x1443   :  { %v3543_v44 = vpop.f32.mrf.mxu1 }
0x1444   :  { %v3549_v32 = vadd.f32 %v3543_v44, %v3387_v63 }
0x1445   :  { %v3705_v28 = vpop.f32.mrf.mxu0 }
0x1446   :  { %v3708_v52 = vadd.f32 %v3702_v23, %v3549_v32 }
0x1448   :  { %v3717_v19 = vadd.f32 %v6161_v45, %v3708_v52 }
0x144a   :  { %v6247_v31 = vadd.f32 %v3717_v19, %v5814_v22  ;;  %v4002_v22 = vld [vmem:[#allocation22 + $0x150] sm:$0xff] }
0x144b   :  { %v3546_v6 = vpop.f32.mrf.mxu1  ;;  %4034 = vmatpush.msra.mxu3 %v4002_v22 }
0x144c   :  { %v3550_v11 = vadd.f32 %v3546_v6, %v3390_v38  ;;  %3731 = vadd.xlane.f32.xlu1 %v6247_v31 }
0x144e   :  { %v3709_v18 = vadd.f32 %v3705_v28, %v3550_v11 }
0x1450   :  { %v3718_v58 = vadd.f32 %v6161_v45, %v3709_v18  ;;  %v4001_v45 = vld [vmem:[#allocation22 + $0x148] sm:$0xff] }
0x1451   :  { %4035 = vmatpush.msra.mxu3 %v4001_v45 }
0x1452   :  { %v6254_v50 = vadd.f32 %v3718_v58, %v5819_v13  ;;  %v4019_v13 = vld [vmem:[#allocation22 + $0x1d8] sm:$0xff] }
0x1453   :  { %4036 = vmatpush.msra.mxu3 %v4000_v2  ;;  %4062 = vmatpush.msra.mxu0 %v4019_v13 }
0x1454   :  { %3733 = vadd.xlane.f32.xlu2 %v6254_v50 }
0x1455   :  { %4037 = vmatpush.msra.mxu3 %v3999_v36  ;;  %4063 = vmatpush.msra.mxu0 %v4018_v21 }
0x1457   :  { %4038 = vmatpush.msra.mxu3 %v3998_v40  ;;  %4064 = vmatpush.msra.mxu0 %v4017_v57 }
0x1459   :  { %4039 = vmatpush.msra.mxu3 %v3997_v47  ;;  %4065 = vmatpush.msra.mxu0 %v4016_v29 }
0x145b   :  { %4040 = vmatpush.msra.mxu3 %v3996_v48  ;;  %4066 = vmatpush.msra.mxu0 %v4015_v5 }
0x145c   :  { %3749 = vadd.xlane.f32.xlu2 %v3744_v62 }
0x145d   :  { %4041 = vmatpush.msra.mxu3 %v3995_v1  ;;  %4067 = vmatpush.msra.mxu0 %v4014_v60  ;;  %v6286_v60 = vld [vmem:[%s6364_s19 + $0x1] ss:$0 sm:$0xff] }
0x145f   :  { %4042 = vmatpush.msra.mxu3 %v3994_v55  ;;  %4068 = vmatpush.msra.mxu0 %v4013_v4 }
0x1461   :  { %4043 = vmatpush.msra.mxu3 %v3993_v53  ;;  %4069 = vmatpush.msra.mxu0 %v4012_v30 }
0x1463   :  { %4044 = vmatpush.msra.mxu3 %v3992_v42  ;;  %4070 = vmatpush.msra.mxu0 %v4011_v25 }
0x1465   :  { %4071 = vmatpush.msra.mxu0 %v4010_v7 }
0x1467   :  { %4072 = vmatpush.msra.mxu0 %v4009_v3 }
0x1469   :  { %4073 = vmatpush.msra.mxu0 %v4008_v54 }
0x146f   :  { %v3878_v51 = vpop.f32.mrf.mxu1 }
0x1470   :  { %v3879_v61 = vadd.f32 %v3878_v51, %v6265_v8 }
0x1472   :  { %v3927_v10 = vmul.f32 0.044715, %v3879_v61  ;;  %v3919_v32 = vmul.f32 0.5, %v3879_v61 }
0x1474   :  { %v3935_v20 = vmul.f32 %v3927_v10, %v3879_v61 }
0x1475   :  { %v3907_v37 = vpop.f32.mrf.mxu2 }
0x1476   :  { %v3943_v39 = vmul.f32 %v3935_v20, %v3879_v61  ;;  %v3908_v41 = vadd.f32 %v3907_v37, %v6268_v9 }
0x1478   :  { %v3951_v43 = vadd.f32 %v3943_v39, %v3879_v61  ;;  %v3928_v34 = vmul.f32 0.044715, %v3908_v41  ;;  %v3920_v6 = vmul.f32 0.5, %v3908_v41 }
0x147a   :  { %v3959_v17 = vmul.f32 0.7978846, %v3951_v43  ;;  %v3936_v59 = vmul.f32 %v3928_v34, %v3908_v41 }
0x147c   :  { %4633 = vtanh.f32 %v3959_v17  ;;  %v3944_v27 = vmul.f32 %v3936_v59, %v3908_v41 }
0x147e   :  { %v3952_v63 = vadd.f32 %v3944_v27, %v3908_v41 }
0x1480   :  { %v3960_v23 = vmul.f32 0.7978846, %v3952_v63 }
0x1482   :  { %v4634_v44 = vpop.eup %4633  ;;  %4635 = vtanh.f32 %v3960_v23 }
0x1483   :  { %v3975_v52 = vadd.f32 1.0, %v4634_v44 }
0x1485   :  { %v3983_v19 = vmul.f32 %v3975_v52, %v3919_v32 }
0x1487   :  { %4045 = vmatmul.f32.vlgmr.msra.gmra.mxu3 %v3983_v19 }
0x1488   :  { %v4636_v38 = vpop.eup %4635 }
0x1489   :  { %v3976_v11 = vadd.f32 1.0, %v4636_v38 }
0x148b   :  { %v3984_v28 = vmul.f32 %v3976_v11, %v3920_v6 }
0x148d   :  { %4074 = vmatmul.f32.vlgmr.msra.gmra.mxu0 %v3984_v28 }
0x14bf   :  { %v3732_v18 = vpop.xlane.xlu1 %3731 }
0x14c0   :  { %v3737_v58 = vmul.f32 %v3732_v18, %v5235_v33 }
0x14c2   :  { %v3741_v14 = vsub.f32 %v6247_v31, %v3737_v58 }
0x14c4   :  { %v3745_v49 = vmul.f32 %v3741_v14, %v3741_v14 }
0x14c6   :  { %3751 = vadd.xlane.f32.xlu0 %v3745_v49 }
0x14c7   :  { %v3734_v56 = vpop.xlane.xlu2 %3733 }
0x14c8   :  { %v3738_v22 = vmul.f32 %v3734_v56, %v5235_v33 }
0x14ca   :  { %v6275_v26 = vsub.f32 %v6254_v50, %v3738_v22 }
0x14cc   :  { %v3746_v45 = vmul.f32 %v6275_v26, %v6275_v26 }
0x14ce   :  { %3753 = vadd.xlane.f32.xlu1 %v3746_v45 }
0x14cf   :  { %v3750_v15 = vpop.xlane.xlu2 %3749 }
0x14d0   :  { %v3756_v2 = vmul.f32 %v3750_v15, %v5235_v33 }
0x14d2   :  { %v3760_v13 = vadd.f32 1e-06, %v3756_v2 }
0x14d4   :  { %4637 = vrsqrt.f32 %v3760_v13  ;;  %vm3779_vm0 = vweird.f32 %v3760_v13 }
0x14da   :  { %v4638_v62 = vpop.eup %4637 }
0x14db   :  { %v3774_v36 = vmul.f32 %v4638_v62, %v3760_v13  ;;  %vm3780_vm13 = vweird.f32 %v4638_v62 }
0x14dc   :  { %vm3781_vm1 = vmor %vm3779_vm0, %vm3780_vm13 }
0x14dd   :  { %v3775_v21 = vmul.f32 %v4638_v62, %v3774_v36 }
0x14df   :  { %v3776_v40 = vmul.f32 0.5, %v3775_v21 }
0x14e1   :  { %v3777_v57 = vsub.f32 1.5, %v3776_v40 }
0x14e3   :  { %v3778_v47 = vmul.f32 %v4638_v62, %v3777_v57 }
0x14e5   :  { %v3782_v29 = vsel %vm3781_vm1, %v4638_v62, %v3778_v47 }
0x14e6   :  { %v3804_v48 = vmul.f32 %v3782_v29, %v6258_v46 }
0x14e8   :  { %v3811_v5 = vmul.f32 %v6233_v24, %v3804_v48 }
0x14ea   :  { %v3818_v1 = vadd.f32 %v6239_v0, %v3811_v5 }
0x14ec   :  { %3880 = vmatmul.f32.gmra.mxu1 %v3818_v1  ;;  %3909 = vmatmul.f32.gmra.mxu2 %v3818_v1 }
0x150a   :  { %v4046_v55 = vpop.f32.mrf.mxu3  ;;  %v4075_v53 = vpop.f32.mrf.mxu0 }
0x150b   :  { %v4047_v4 = vadd.f32 %v6286_v60, %v4046_v55 }
0x150d   :  { %v4076_v30 = vadd.f32 %v4075_v53, %v4047_v4 }
0x150f   :  { %v6290_v42 = vadd.f32 %v4076_v30, %v6166_v35 }
0x1511   :  { %4093 = vadd.xlane.f32.xlu2 %v6290_v42 }
0x1539   :  { %v3752_v46 = vpop.xlane.xlu0 %3751 }
0x153a   :  { %v3757_v25 = vmul.f32 %v3752_v46, %v5235_v33 }
0x153c   :  { %v3761_v7 = vadd.f32 1e-06, %v3757_v25 }
0x153e   :  { %4639 = vrsqrt.f32 %v3761_v7  ;;  %vm3789_vm3 = vweird.f32 %v3761_v7 }
0x1541   :  { %v3754_v12 = vpop.xlane.xlu1 %3753 }
0x1542   :  { %v3758_v3 = vmul.f32 %v3754_v12, %v5235_v33 }
0x1544   :  { %v4640_v54 = vpop.eup %4639  ;;  %v3762_v51 = vadd.f32 1e-06, %v3758_v3 }
0x1545   :  { %v3784_v61 = vmul.f32 %v4640_v54, %v3761_v7  ;;  %vm3790_vm2 = vweird.f32 %v4640_v54 }
0x1546   :  { %4641 = vrsqrt.f32 %v3762_v51  ;;  %vm3791_vm4 = vmor %vm3789_vm3, %vm3790_vm2  ;;  %vm3799_vm6 = vweird.f32 %v3762_v51 }
0x1547   :  { %v3785_v10 = vmul.f32 %v4640_v54, %v3784_v61 }
0x1549   :  { %v3786_v20 = vmul.f32 0.5, %v3785_v10 }
0x154b   :  { %v3787_v37 = vsub.f32 1.5, %v3786_v20 }
0x154c   :  { %v4642_v35 = vpop.eup %4641 }
0x154d   :  { %v3788_v39 = vmul.f32 %v4640_v54, %v3787_v37  ;;  %v3794_v41 = vmul.f32 %v4642_v35, %v3762_v51  ;;  %vm3800_vm5 = vweird.f32 %v4642_v35 }
0x154e   :  { %vm3801_vm7 = vmor %vm3799_vm6, %vm3800_vm5 }
0x154f   :  { %v3792_v43 = vsel %vm3791_vm4, %v4640_v54, %v3788_v39  ;;  %v3795_v34 = vmul.f32 %v4642_v35, %v3794_v41 }
0x1550   :  { %v3805_v17 = vmul.f32 %v3792_v43, %v3741_v14 }
0x1551   :  { %v3796_v59 = vmul.f32 0.5, %v3795_v34 }
0x1552   :  { %v3812_v27 = vmul.f32 %v6233_v24, %v3805_v17 }
0x1553   :  { %v3797_v63 = vsub.f32 1.5, %v3796_v59 }
0x1554   :  { %v3819_v23 = vadd.f32 %v6239_v0, %v3812_v27 }
0x1555   :  { %v3798_v44 = vmul.f32 %v4642_v35, %v3797_v63 }
0x1556   :  { %3883 = vmatmul.f32.gmra.mxu1 %v3819_v23  ;;  %3912 = vmatmul.f32.gmra.mxu2 %v3819_v23 }
0x1557   :  { %v3802_v32 = vsel %vm3801_vm7, %v4642_v35, %v3798_v44 }
0x1558   :  { %v3806_v52 = vmul.f32 %v3802_v32, %v6275_v26 }
0x155a   :  { %v3813_v19 = vmul.f32 %v6233_v24, %v3806_v52 }
0x155c   :  { %v3820_v38 = vadd.f32 %v6239_v0, %v3813_v19 }
0x155e   :  { %3886 = vmatmul.f32.gmra.mxu1 %v3820_v38  ;;  %3915 = vmatmul.f32.gmra.mxu2 %v3820_v38 }
0x1569   :  { %v3881_v6 = vpop.f32.mrf.mxu1 }
0x156a   :  { %v3882_v11 = vadd.f32 %v3881_v6, %v6265_v8 }
0x156c   :  { %v3929_v28 = vmul.f32 0.044715, %v3882_v11  ;;  %v3921_v13 = vmul.f32 0.5, %v3882_v11 }
0x156e   :  { %v3937_v18 = vmul.f32 %v3929_v28, %v3882_v11 }
0x156f   :  { %v3910_v58 = vpop.f32.mrf.mxu2 }
0x1570   :  { %v3911_v14 = vadd.f32 %v3910_v58, %v6268_v9  ;;  %v3945_v49 = vmul.f32 %v3937_v18, %v3882_v11 }
0x1572   :  { %v3930_v56 = vmul.f32 0.044715, %v3911_v14  ;;  %v3953_v22 = vadd.f32 %v3945_v49, %v3882_v11  ;;  %v3922_v40 = vmul.f32 0.5, %v3911_v14 }
0x1574   :  { %v3961_v45 = vmul.f32 0.7978846, %v3953_v22  ;;  %v3938_v15 = vmul.f32 %v3930_v56, %v3911_v14 }
0x1576   :  { %4643 = vtanh.f32 %v3961_v45  ;;  %v3946_v26 = vmul.f32 %v3938_v15, %v3911_v14 }
0x1578   :  { %v3954_v24 = vadd.f32 %v3946_v26, %v3911_v14 }
0x157a   :  { %v3962_v2 = vmul.f32 0.7978846, %v3954_v24 }
0x157c   :  { %v4644_v0 = vpop.eup %4643  ;;  %4645 = vtanh.f32 %v3962_v2 }
0x157d   :  { %v3977_v62 = vadd.f32 1.0, %v4644_v0 }
0x157f   :  { %v3985_v36 = vmul.f32 %v3977_v62, %v3921_v13 }
0x1581   :  { %4048 = vmatmul.f32.gmra.mxu3 %v3985_v36 }
0x1582   :  { %v4646_v21 = vpop.eup %4645 }
0x1583   :  { %v3978_v57 = vadd.f32 1.0, %v4646_v21 }
0x1584   :  { %v4094_v15 = vpop.xlane.xlu2 %4093 }
0x1585   :  { %v3986_v47 = vmul.f32 %v3978_v57, %v3922_v40  ;;  %v4101_v2 = vmul.f32 %v4094_v15, %v5235_v33 }
0x1587   :  { %4077 = vmatmul.f32.gmra.mxu0 %v3986_v47  ;;  %v4105_v13 = vsub.f32 %v6290_v42, %v4101_v2 }
0x1589   :  { %v4109_v62 = vmul.f32 %v4105_v13, %v4105_v13 }
0x15d3   :  { %v3884_v29 = vpop.f32.mrf.mxu1 }
0x15d4   :  { %v3885_v48 = vadd.f32 %v3884_v29, %v6265_v8 }
0x15d6   :  { %v3931_v5 = vmul.f32 0.044715, %v3885_v48 }
0x15d8   :  { %v3939_v1 = vmul.f32 %v3931_v5, %v3885_v48 }
0x15d9   :  { %v3913_v55 = vpop.f32.mrf.mxu2 }
0x15da   :  { %v3914_v4 = vadd.f32 %v3913_v55, %v6268_v9  ;;  %v3947_v53 = vmul.f32 %v3939_v1, %v3885_v48 }
0x15db   :  { %v3887_v30 = vpop.f32.mrf.mxu1 }
0x15dc   :  { %v3932_v46 = vmul.f32 0.044715, %v3914_v4  ;;  %v3888_v25 = vadd.f32 %v3887_v30, %v6265_v8  ;;  %v3955_v7 = vadd.f32 %v3947_v53, %v3885_v48  ;;  %v3923_v8 = vmul.f32 0.5, %v3885_v48 }
0x15dd   :  { %v3924_v19 = vmul.f32 0.5, %v3914_v4 }
0x15de   :  { %v3933_v12 = vmul.f32 0.044715, %v3888_v25  ;;  %v3963_v3 = vmul.f32 0.7978846, %v3955_v7  ;;  %v3940_v54 = vmul.f32 %v3932_v46, %v3914_v4  ;;  %v3925_v11 = vmul.f32 0.5, %v3888_v25 }
0x15e0   :  { %4647 = vtanh.f32 %v3963_v3  ;;  %v3948_v51 = vmul.f32 %v3940_v54, %v3914_v4  ;;  %v3941_v61 = vmul.f32 %v3933_v12, %v3888_v25 }
0x15e1   :  { %v3916_v10 = vpop.f32.mrf.mxu2 }
0x15e2   :  { %v3917_v20 = vadd.f32 %v3916_v10, %v6268_v9  ;;  %v3956_v37 = vadd.f32 %v3948_v51, %v3914_v4  ;;  %v3949_v35 = vmul.f32 %v3941_v61, %v3888_v25  ;;  %v6324_v10 = vld [vmem:[%s6366_s21] ss:$0 sm:$0xff] }
0x15e4   :  { %v3934_v39 = vmul.f32 0.044715, %v3917_v20  ;;  %v3964_v41 = vmul.f32 0.7978846, %v3956_v37  ;;  %v3957_v43 = vadd.f32 %v3949_v35, %v3888_v25  ;;  %v3926_v14 = vmul.f32 0.5, %v3917_v20 }
0x15e6   :  { %v4648_v34 = vpop.eup %4647  ;;  %4649 = vtanh.f32 %v3964_v41  ;;  %v3965_v17 = vmul.f32 0.7978846, %v3957_v43  ;;  %v3942_v59 = vmul.f32 %v3934_v39, %v3917_v20 }
0x15e7   :  { %v3979_v27 = vadd.f32 1.0, %v4648_v34 }
0x15e8   :  { %4651 = vtanh.f32 %v3965_v17  ;;  %v3950_v63 = vmul.f32 %v3942_v59, %v3917_v20 }
0x15e9   :  { %v3987_v23 = vmul.f32 %v3979_v27, %v3923_v8 }
0x15ea   :  { %v3958_v44 = vadd.f32 %v3950_v63, %v3917_v20 }
0x15eb   :  { %4051 = vmatmul.f32.gmra.mxu3 %v3987_v23 }
0x15ec   :  { %v4650_v32 = vpop.eup %4649  ;;  %v3966_v52 = vmul.f32 0.7978846, %v3958_v44 }
0x15ed   :  { %v3980_v9 = vadd.f32 1.0, %v4650_v32 }
0x15ee   :  { %v4652_v38 = vpop.eup %4651  ;;  %4653 = vtanh.f32 %v3966_v52 }
0x15ef   :  { %v3988_v6 = vmul.f32 %v3980_v9, %v3924_v19  ;;  %v3981_v28 = vadd.f32 1.0, %v4652_v38 }
0x15f1   :  { %4080 = vmatmul.f32.gmra.mxu0 %v3988_v6  ;;  %v3989_v18 = vmul.f32 %v3981_v28, %v3925_v11 }
0x15f3   :  { %4054 = vmatmul.f32.gmra.mxu3 %v3989_v18 }
0x15f4   :  { %v4654_v58 = vpop.eup %4653 }
0x15f5   :  { %v3982_v49 = vadd.f32 1.0, %v4654_v58 }
0x15f7   :  { %v3990_v56 = vmul.f32 %v3982_v49, %v3926_v14 }
0x15f9   :  { %4083 = vmatmul.f32.gmra.mxu0 %v3990_v56 }
0x1604   :  { %v4049_v22 = vpop.f32.mrf.mxu3  ;;  %v4078_v26 = vpop.f32.mrf.mxu0 }
0x1605   :  { %v4050_v45 = vadd.f32 %v6286_v60, %v4049_v22 }
0x1607   :  { %v4079_v24 = vadd.f32 %v4078_v26, %v4050_v45 }
0x1609   :  { %v4088_v0 = vadd.f32 %v4079_v24, %v6171_v16 }
0x160b   :  { %4095 = vadd.xlane.f32.xlu0 %v4088_v0 }
0x1613   :  { %4113 = vadd.xlane.f32.xlu0 %v4109_v62 }
0x166e   :  { %v4052_v36 = vpop.f32.mrf.mxu3  ;;  %v4081_v21 = vpop.f32.mrf.mxu0 }
0x166f   :  { %v4053_v40 = vadd.f32 %v6286_v60, %v4052_v36 }
0x1671   :  { %v4082_v57 = vadd.f32 %v4081_v21, %v4053_v40 }
0x1673   :  { %v4089_v47 = vadd.f32 %v4082_v57, %v6247_v31 }
0x1675   :  { %4097 = vadd.xlane.f32.xlu1 %v4089_v47 }
0x1676   :  { %v4055_v29 = vpop.f32.mrf.mxu3  ;;  %v4084_v5 = vpop.f32.mrf.mxu0 }
0x1677   :  { %v4056_v48 = vadd.f32 %v6286_v60, %v4055_v29 }
0x1679   :  { %v4085_v1 = vadd.f32 %v4084_v5, %v4056_v48 }
0x167b   :  { %v4090_v16 = vadd.f32 %v4085_v1, %v6254_v50  ;;  %v6319_v50 = vld [vmem:[%s6365_s20] ss:$0 sm:$0xff]  ;;  %s5037_s20 = smov [#allocation23]  }
0x167c   :  { %s4195_s21 = sshll.u32 %s5037_s20, 4  ;;  %s4196_s21 = int_to_ptr.vmem [resolvable:$true] %s4195_s21 }
0x167d   :  { %4099 = vadd.xlane.f32.xlu2 %v4090_v16 }
0x167e   :  { %v4096_v55 = vpop.xlane.xlu0 %4095 }
0x167f   :  { %v4102_v42 = vmul.f32 %v4096_v55, %v5235_v33 }
0x1681   :  { %v4106_v4 = vsub.f32 %v4088_v0, %v4102_v42 }
0x1683   :  { %v4110_v53 = vmul.f32 %v4106_v4, %v4106_v4 }
0x1685   :  { %4115 = vadd.xlane.f32.xlu1 %v4110_v53 }
0x1686   :  { %v4114_v30 = vpop.xlane.xlu0 %4113 }
0x1687   :  { %v4121_v46 = vmul.f32 %v4114_v30, %v5235_v33 }
0x1689   :  { %v4125_v25 = vadd.f32 1e-06, %v4121_v46 }
0x168b   :  { %4655 = vrsqrt.f32 %v4125_v25  ;;  %vm4135_vm9 = vweird.f32 %v4125_v25 }
0x1691   :  { %v4656_v31 = vpop.eup %4655 }
0x1692   :  { %v4130_v7 = vmul.f32 %v4656_v31, %v4125_v25  ;;  %vm4136_vm8 = vweird.f32 %v4656_v31 }
0x1693   :  { %vm4137_vm10 = vmor %vm4135_vm9, %vm4136_vm8 }
0x1694   :  { %v4131_v12 = vmul.f32 %v4656_v31, %v4130_v7 }
0x1696   :  { %v4132_v60 = vmul.f32 0.5, %v4131_v12 }
0x1698   :  { %v4133_v3 = vsub.f32 1.5, %v4132_v60 }
0x169a   :  { %v4134_v54 = vmul.f32 %v4656_v31, %v4133_v3 }
0x169c   :  { %v4138_v51 = vsel %vm4137_vm10, %v4656_v31, %v4134_v54 }
0x169d   :  { %v4169_v61 = vmul.f32 %v4138_v51, %v4105_v13 }
0x169f   :  { %v4176_v20 = vmul.f32 %v6319_v50, %v4169_v61 }
0x16a1   :  { %v4183_v37 = vadd.f32 %v6324_v10, %v4176_v20 }
0x16a3   :  { %4187 = vst [vmem:[#allocation23] sm:$0xff] %v4183_v37 }
0x16e8   :  { %v4098_v35 = vpop.xlane.xlu1 %4097 }
0x16e9   :  { %v4103_v39 = vmul.f32 %v4098_v35, %v5235_v33 }
0x16eb   :  { %v4107_v41 = vsub.f32 %v4089_v47, %v4103_v39 }
0x16ed   :  { %v4111_v43 = vmul.f32 %v4107_v41, %v4107_v41 }
0x16ef   :  { %4117 = vadd.xlane.f32.xlu2 %v4111_v43 }
0x16f0   :  { %v4100_v34 = vpop.xlane.xlu2 %4099 }
0x16f1   :  { %v4104_v17 = vmul.f32 %v4100_v34, %v5235_v33 }
0x16f3   :  { %v4108_v59 = vsub.f32 %v4090_v16, %v4104_v17 }
0x16f5   :  { %v4112_v8 = vmul.f32 %v4108_v59, %v4108_v59 }
0x16f7   :  { %4119 = vadd.xlane.f32.xlu0 %v4112_v8 }
0x16f8   :  { %v4116_v27 = vpop.xlane.xlu1 %4115 }
0x16f9   :  { %v4122_v63 = vmul.f32 %v4116_v27, %v5235_v33 }
0x16fb   :  { %v4126_v23 = vadd.f32 1e-06, %v4122_v63 }
0x16fd   :  { %4657 = vrsqrt.f32 %v4126_v23  ;;  %vm4145_vm14 = vweird.f32 %v4126_v23 }
0x1703   :  { %v4658_v44 = vpop.eup %4657 }
0x1704   :  { %v4140_v32 = vmul.f32 %v4658_v44, %v4126_v23  ;;  %vm4146_vm11 = vweird.f32 %v4658_v44 }
0x1705   :  { %vm4147_vm15 = vmor %vm4145_vm14, %vm4146_vm11 }
0x1706   :  { %v4141_v52 = vmul.f32 %v4658_v44, %v4140_v32 }
0x1708   :  { %v4142_v19 = vmul.f32 0.5, %v4141_v52 }
0x170a   :  { %v4143_v9 = vsub.f32 1.5, %v4142_v19 }
0x170c   :  { %v4144_v38 = vmul.f32 %v4658_v44, %v4143_v9 }
0x170e   :  { %v4148_v6 = vsel %vm4147_vm15, %v4658_v44, %v4144_v38 }
0x170f   :  { %v4170_v11 = vmul.f32 %v4148_v6, %v4106_v4 }
0x1711   :  { %v4177_v28 = vmul.f32 %v6319_v50, %v4170_v11 }
0x1713   :  { %v4184_v18 = vadd.f32 %v6324_v10, %v4177_v28 }
0x1715   :  { %4188 = vst [vmem:[#allocation23 + $0x8] sm:$0xff] %v4184_v18 }
0x1762   :  { %v4118_v58 = vpop.xlane.xlu2 %4117 }
0x1763   :  { %v4123_v14 = vmul.f32 %v4118_v58, %v5235_v33 }
0x1765   :  { %v4127_v49 = vadd.f32 1e-06, %v4123_v14 }
0x1767   :  { %4659 = vrsqrt.f32 %v4127_v49  ;;  %vm4155_vm13 = vweird.f32 %v4127_v49 }
0x176a   :  { %v4120_v56 = vpop.xlane.xlu0 %4119 }
0x176b   :  { %v4124_v22 = vmul.f32 %v4120_v56, %v5235_v33 }
0x176d   :  { %v4660_v45 = vpop.eup %4659  ;;  %v4128_v15 = vadd.f32 1e-06, %v4124_v22 }
0x176e   :  { %v4150_v26 = vmul.f32 %v4660_v45, %v4127_v49  ;;  %vm4156_vm12 = vweird.f32 %v4660_v45 }
0x176f   :  { %4661 = vrsqrt.f32 %v4128_v15  ;;  %vm4157_vm0 = vmor %vm4155_vm13, %vm4156_vm12  ;;  %vm4165_vm2 = vweird.f32 %v4128_v15 }
0x1770   :  { %v4151_v24 = vmul.f32 %v4660_v45, %v4150_v26 }
0x1772   :  { %v4152_v2 = vmul.f32 0.5, %v4151_v24 }
0x1774   :  { %v4153_v0 = vsub.f32 1.5, %v4152_v2 }
0x1775   :  { %v4662_v13 = vpop.eup %4661 }
0x1776   :  { %v4154_v62 = vmul.f32 %v4660_v45, %v4153_v0  ;;  %v4160_v36 = vmul.f32 %v4662_v13, %v4128_v15  ;;  %vm4166_vm1 = vweird.f32 %v4662_v13 }
0x1777   :  { %vm4167_vm3 = vmor %vm4165_vm2, %vm4166_vm1 }
0x1778   :  { %v4158_v21 = vsel %vm4157_vm0, %v4660_v45, %v4154_v62  ;;  %v4161_v40 = vmul.f32 %v4662_v13, %v4160_v36 }
0x1779   :  { %v4171_v57 = vmul.f32 %v4158_v21, %v4107_v41 }
0x177a   :  { %v4162_v47 = vmul.f32 0.5, %v4161_v40 }
0x177b   :  { %v4178_v29 = vmul.f32 %v6319_v50, %v4171_v57 }
0x177c   :  { %v4163_v33 = vsub.f32 1.5, %v4162_v47 }
0x177d   :  { %v4185_v48 = vadd.f32 %v6324_v10, %v4178_v29 }
0x177e   :  { %v4164_v5 = vmul.f32 %v4662_v13, %v4163_v33 }
0x177f   :  { %4189 = vst [vmem:[#allocation23 + $0x10] sm:$0xff] %v4185_v48 }
0x1780   :  { %v4168_v1 = vsel %vm4167_vm3, %v4662_v13, %v4164_v5 }
0x1781   :  { %v4172_v16 = vmul.f32 %v4168_v1, %v4108_v59 }
0x1783   :  { %v4179_v55 = vmul.f32 %v6319_v50, %v4172_v16 }
0x1785   :  { %v4186_v42 = vadd.f32 %v6324_v10, %v4179_v55 }
0x1787   :  { %4190 = vst [vmem:[#allocation23 + $0x18] sm:$0xff] %v4186_v42 }
0x1788   :  { %4203 = dma.vmem_to_hbm [thread:$0]  %s4196_s21, 512, %s4198_s4, [#allocation4], %s5016_s6, %s5016_s6, %s5017_s25  }
0x1789   :  { %5013 = dma.done.wait [#allocation4], 512  }
0x178a   :  { %5014 = vsyncadd [#allocation4], 4294966784 }
0x178b   :  { %4208 = vsyncpa [#allocation3], 1 }
0x178c   :  { %4209 = vsyncpa [#allocation6], 1 }
0x178d   :  { %4210 = vsyncpa [#allocation9], 1 }
0x178e   :  { %4211 = vsyncpa [#allocation12], 1 }
0x178f   :  { %4212 = vsyncpa [#allocation15], 1 }
0x1790   :  { %4213 = vsyncpa [#allocation18], 1 }
0x1791   :  { %4214 = vsyncpa [#allocation21], 1 }
0x1792   :  { %4215 = vsyncpa [#allocation4], 1 }

</bundles_post_ra>
